<compile_context>
chip_gen: v5e
topology: v5e:2x2
jax: 0.10.0
libtpu: 0.0.40
codegen_flags: <defaults>
</compile_context>

<pallas_src>
import functools

import jax
import jax.numpy as jnp
from jax import lax
from jax.experimental import pallas as pl
from jax.experimental.pallas import tpu as pltpu

NUM_CLASSES = 5
CH = 64          # Four_conv channel width
EPS = 1e-5
FC_PAD = 128     # lane-dense fc output width (real logits sliced out afterwards)


# ---------------------------------------------------------------------------
# In-kernel helpers
# ---------------------------------------------------------------------------
def _pool2x2(y, vsc, hk, wk, row_stride):
    """2x2 / stride-2 max-pool of a conv output value `y` ((hk*row_stride, CH) f32).

    Row m = i*row_stride + j of `y` holds output pixel (i, j); columns j >= wk
    (present when row_stride > wk) are junk and never read.  Per-row vertical
    maxes go to disjoint slices of `vsc` (no shared-scratch serialization);
    because wk is even, the horizontal max is one strided slab read.
    Returns the pooled activation as a ((hk//2)*(wk//2), CH) f32 value in
    row-major (row, col) order.
    """
    ho, wo = hk // 2, wk // 2
    for t in range(ho):
        top = y[(2 * t) * row_stride:(2 * t) * row_stride + wk, :]
        bot = y[(2 * t + 1) * row_stride:(2 * t + 1) * row_stride + wk, :]
        vsc[pl.ds(t * wk, wk), :] = jnp.maximum(top, bot)
    n = ho * wo
    return jnp.maximum(vsc[pl.ds(0, n, stride=2), :],
                       vsc[pl.ds(1, n, stride=2), :])


def _conv4_kernel(*refs, h, w, fuse_fc):
    if fuse_fc:
        (x1_ref, w1_ref, s1_ref, w2_ref, s2_ref, w3_ref, s3_ref, w4_ref,
         s4_ref, fcw_ref, fcb_ref, feat_ref, clf_ref, vsc, xpad) = refs
    else:
        (x1_ref, w1_ref, s1_ref, w2_ref, s2_ref, w3_ref, s3_ref, w4_ref,
         s4_ref, feat_ref, vsc, xpad) = refs

    # ---- block 1: conv as one K=9*cin MXU matmul on the pre-packed input ----
    y = jnp.dot(x1_ref[0], w1_ref[...], preferred_element_type=jnp.float32)
    y = jnp.maximum(y + s1_ref[...], 0.0)                      # (h*w, CH) f32
    pooled = _pool2x2(y, vsc, h, w, w)

    # ---- blocks 2..4: 3x3 conv on a zero-padded flat layout held in VMEM ----
    ph, pw = h // 2, w // 2                 # spatial dims of the pooled input
    for w_ref, s_ref in ((w2_ref, s2_ref), (w3_ref, s3_ref), (w4_ref, s4_ref)):
        wp = pw + 2                         # padded row width
        band = ph * wp                      # conv-output rows (junk cols j >= pw)
        nrows = (ph + 3) * wp               # padded rows + spare row for tap over-read
        # zero-filled padded input, interior = previous pooled activation (bf16)
        xpad[pl.ds(0, nrows), :] = jnp.zeros((nrows, CH), xpad.dtype)
        for i in range(ph):
            xpad[pl.ds((i + 1) * wp + 1, pw), :] = (
                pooled[i * pw:(i + 1) * pw, :].astype(xpad.dtype))
        # 9 taps accumulated in a traced f32 value (no VMEM read-modify-write)
        acc = None
        for kh in range(3):
            for kw in range(3):
                lhs = xpad[pl.ds(kh * wp + kw, band), :]
                d = jnp.dot(lhs, w_ref[kh * 3 + kw],
                            preferred_element_type=jnp.float32)
                acc = d if acc is None else acc + d
        y = jnp.maximum(acc + s_ref[...], 0.0)                 # (band, CH) f32
        pooled = _pool2x2(y, vsc, ph, pw, wp)
        ph, pw = ph // 2, pw // 2

    # ---- outputs: HWC-flat feature (f32) and fused fc head ----
    feat_ref[0] = pooled                                       # (Ho*Wo, CH) f32
    if fuse_fc:
        clf_ref[0] = (jnp.dot(pooled, fcw_ref[...],
                              preferred_element_type=jnp.float32)
                      + fcb_ref[...])


# ---------------------------------------------------------------------------
# Wrapper: one fused pallas_call over the batch
# ---------------------------------------------------------------------------
def _vmem_limit_bytes(h, w, cin, p, fuse_fc, rows_vsc, rows_xpad):
    lane = 128                              # VMEM lane padding
    db = 2                                  # double-buffered pipeline windows
    est = db * (h * w) * lane * 2           # packed block-1 input (bf16)
    est += db * (9 * cin) * lane * 2        # block-1 weights
    est += db * 3 * 9 * CH * lane * 2       # block 2..4 weights
    est += db * 4 * 8 * lane * 4            # BN shifts
    est += rows_vsc * lane * 4 + rows_xpad * lane * 2   # scratch
    est += db * (max(p, 8) * lane * 4 + 8 * lane * 4)   # outputs
    if fuse_fc:
        est += db * (CH * lane * 4 + 8 * lane * 4)      # fc weights + bias
    # generous headroom, still far below v7x's 64 MiB physical VMEM
    return int(min(48 * 2 ** 20, max(8 * 2 ** 20, 4 * est)))


def conv4_forward_fused(x_packed, params, *, n, h, w, cin):
    p = (h // 16) * (w // 16)
    fuse_fc = (p == 1)
    blocks = params["blocks"]

    in_arrays = [x_packed, blocks[0]["w"], blocks[0]["shift"]]
    in_specs = [
        pl.BlockSpec((1, h * w, 9 * cin), lambda b: (b, 0, 0)),
        pl.BlockSpec((9 * cin, CH), lambda b: (0, 0)),
        pl.BlockSpec((1, CH), lambda b: (0, 0)),
    ]
    for blk in blocks[1:]:
        in_arrays += [blk["w"], blk["shift"]]
        in_specs += [pl.BlockSpec((9, CH, CH), lambda b: (0, 0, 0)),
                     pl.BlockSpec((1, CH), lambda b: (0, 0))]
    if fuse_fc:
        in_arrays += [params["fc_w_pad"], params["fc_b_pad"]]
        in_specs += [pl.BlockSpec((CH, FC_PAD), lambda b: (0, 0)),
                     pl.BlockSpec((1, FC_PAD), lambda b: (0, 0))]

    out_shape = [jax.ShapeDtypeStruct((n, p, CH), jnp.float32)]
    out_specs = [pl.BlockSpec((1, p, CH), lambda b: (b, 0, 0))]
    if fuse_fc:
        out_shape.append(jax.ShapeDtypeStruct((n, 1, FC_PAD), jnp.float32))
        out_specs.append(pl.BlockSpec((1, 1, FC_PAD), lambda b: (b, 0, 0)))

    rows_vsc = (h // 2) * w                           # vertical-max scratch rows
    rows_xpad = (h // 2 + 3) * (w // 2 + 2)           # largest padded flat input
    scratch = [pltpu.VMEM((rows_vsc, CH), jnp.float32),
               pltpu.VMEM((rows_xpad, CH), jnp.bfloat16)]

    kernel = functools.partial(_conv4_kernel, h=h, w=w, fuse_fc=fuse_fc)
    return pl.pallas_call(
        kernel,
        out_shape=tuple(out_shape),
        grid_spec=pltpu.PrefetchScalarGridSpec(
            num_scalar_prefetch=0,
            grid=(n,),
            in_specs=in_specs,
            out_specs=out_specs,
            scratch_shapes=scratch,
        ),
        compiler_params=pltpu.CompilerParams(
            dimension_semantics=("parallel",),
            vmem_limit_bytes=_vmem_limit_bytes(h, w, cin, p, fuse_fc,
                                               rows_vsc, rows_xpad),
        ),
    )(*in_arrays)


# ---------------------------------------------------------------------------
# Deterministic parameter construction (synthetic; shapes from __init__)
# ---------------------------------------------------------------------------
def _make_block_params(key, cin, cout=CH):
    k1, k2, k3, k4, k5, k6 = jax.random.split(key, 6)
    w = jax.random.normal(k1, (cout, cin, 3, 3), jnp.float32) / jnp.sqrt(cin * 9.0)
    conv_b = 0.01 * jax.random.normal(k2, (cout,), jnp.float32)
    gamma = 1.0 + 0.1 * jax.random.normal(k3, (cout,), jnp.float32)
    beta = 0.1 * jax.random.normal(k4, (cout,), jnp.float32)
    mean = 0.01 * jax.random.normal(k5, (cout,), jnp.float32)
    var = jnp.abs(1.0 + 0.1 * jax.random.normal(k6, (cout,), jnp.float32))
    # fold eval-mode BatchNorm (+ conv bias) into the weights (scale) and a shift
    scale = gamma / jnp.sqrt(var + EPS)
    shift = scale * (conv_b - mean) + beta
    wf = jnp.transpose(w, (2, 3, 1, 0)) * scale      # (kh, kw, cin, cout)
    return wf, shift


def make_params(key, cin=3, h=16, w=16, num_classes=NUM_CLASSES):
    assert h % 16 == 0 and w % 16 == 0, "4 stride-2 pools need H, W % 16 == 0"
    p = (h // 16) * (w // 16)
    feat_dim = CH * p
    keys = jax.random.split(key, 6)
    blocks = []
    in_ch = cin
    for i in range(4):
        wf, shift = _make_block_params(keys[i], in_ch)
        if i == 0:
            wq = wf.reshape(9 * in_ch, CH)   # block 1 consumes the packed K=9*cin input
        else:
            wq = wf.reshape(9, CH, CH)
        blocks.append({"w": wq.astype(jnp.bfloat16),
                       "shift": shift.reshape(1, CH).astype(jnp.float32)})
        in_ch = CH
    fc_w = jax.random.normal(keys[4], (num_classes, feat_dim), jnp.float32) / jnp.sqrt(feat_dim)
    fc_b = 0.01 * jax.random.normal(keys[5], (num_classes,), jnp.float32)
    params = {"blocks": blocks, "fc_w": fc_w, "fc_b": fc_b}
    if p == 1:   # fc head folded into the kernel epilogue (lane-padded store)
        params["fc_w_pad"] = jnp.zeros((CH, FC_PAD), jnp.float32).at[:, :num_classes].set(fc_w.T)
        params["fc_b_pad"] = jnp.zeros((1, FC_PAD), jnp.float32).at[:, :num_classes].set(fc_b)
    return params


# ---------------------------------------------------------------------------
# BaseNet.forward equivalent
# ---------------------------------------------------------------------------
def basenet_forward(x_nchw, params):
    n, cin, h, w = x_nchw.shape
    x = jnp.transpose(x_nchw, (0, 2, 3, 1))                        # NCHW -> NHWC
    # Pack (kh, kw, cin) into the contraction once in XLA (tiny, one-time) so
    # block 1's conv is a single K=9*cin matmul instead of 9 K=cin ones.
    xp = jnp.pad(x, ((0, 0), (1, 1), (1, 1), (0, 0)))
    cols = [xp[:, kh:kh + h, kw:kw + w, :] for kh in range(3) for kw in range(3)]
    x_packed = jnp.concatenate(cols, axis=-1).reshape(n, h * w, 9 * cin).astype(jnp.bfloat16)

    p = (h // 16) * (w // 16)
    outs = conv4_forward_fused(x_packed, params, n=n, h=h, w=w, cin=cin)
    feat_hwc = outs[0]                                             # (n, p, CH) f32
    # PyTorch flattens (N, C, Ho, Wo) channel-major.
    feature = jnp.transpose(feat_hwc, (0, 2, 1)).reshape(n, -1)
    if p == 1:
        clf = outs[1][:, 0, :NUM_CLASSES]
    else:
        # TODO(synk): fold the fc head into the kernel for Ho*Wo > 1 as well.
        clf = feature @ params["fc_w"].T + params["fc_b"]
    return feature, clf


# ---------------------------------------------------------------------------
# Pure-XLA reference (same bf16-in / f32-accumulate precision) for validation
# ---------------------------------------------------------------------------
def reference_forward(x_nchw, params):
    x = jnp.transpose(x_nchw, (0, 2, 3, 1)).astype(jnp.bfloat16)
    n = x.shape[0]
    for i, blk in enumerate(params["blocks"]):
        cin = x.shape[-1]
        w_hwio = blk["w"].reshape(3, 3, cin, CH)
        y = lax.conv_general_dilated(
            x, w_hwio, window_strides=(1, 1), padding=((1, 1), (1, 1)),
            dimension_numbers=("NHWC", "HWIO", "NHWC"),
            preferred_element_type=jnp.float32)
        y = jnp.maximum(y + blk["shift"].reshape(1, 1, 1, CH), 0.0)
        y = lax.reduce_window(y, -jnp.inf, lax.max,
                              (1, 2, 2, 1), (1, 2, 2, 1), "VALID")
        x = y if i == 3 else y.astype(jnp.bfloat16)
    feature = jnp.transpose(x, (0, 3, 1, 2)).reshape(n, -1)
    clf = feature @ params["fc_w"].T + params["fc_b"]
    return feature, clf


if __name__ == "__main__":
    key = jax.random.PRNGKey(0)
    x = jax.random.normal(key, (2, 3, 16, 16), jnp.float32)       # NCHW, like PyTorch
    n, cin, h, w = x.shape
    params = make_params(jax.random.PRNGKey(42), cin=cin, h=h, w=w)

    fwd = jax.jit(basenet_forward)
    feature, clf = fwd(x, params)
    jax.block_until_ready((feature, clf))

    feat_dim = CH * (h // 16) * (w // 16)
    assert feature.shape == (n, feat_dim), feature.shape
    assert clf.shape == (n, NUM_CLASSES), clf.shape
    assert bool(jnp.all(jnp.isfinite(feature))) and bool(jnp.all(jnp.isfinite(clf)))

    # Numerics check vs a pure-XLA reference at matching (bf16-input) precision.
    feat_ref, clf_ref = jax.jit(reference_forward)(x, params)
    assert bool(jnp.allclose(feature, feat_ref, rtol=5e-3, atol=5e-3)), (
        float(jnp.max(jnp.abs(feature - feat_ref))))
    assert bool(jnp.allclose(clf, clf_ref, rtol=5e-3, atol=5e-3)), (
        float(jnp.max(jnp.abs(clf - clf_ref))))

    print("KERNEL_OK")
</pallas_src>

<mosaic_0001>
module attributes {stable_mosaic.version = 11 : i64} {
  func.func @_conv4_kernel(%arg0: i32, %arg1: memref<1x256x27xbf16, #tpu.memory_space<vmem>>, %arg2: memref<27x64xbf16, #tpu.memory_space<vmem>>, %arg3: memref<1x64xf32, #tpu.memory_space<vmem>>, %arg4: memref<9x64x64xbf16, #tpu.memory_space<vmem>>, %arg5: memref<1x64xf32, #tpu.memory_space<vmem>>, %arg6: memref<9x64x64xbf16, #tpu.memory_space<vmem>>, %arg7: memref<1x64xf32, #tpu.memory_space<vmem>>, %arg8: memref<9x64x64xbf16, #tpu.memory_space<vmem>>, %arg9: memref<1x64xf32, #tpu.memory_space<vmem>>, %arg10: memref<64x128xf32, #tpu.memory_space<vmem>>, %arg11: memref<1x128xf32, #tpu.memory_space<vmem>>, %arg12: memref<1x1x64xf32, #tpu.memory_space<vmem>>, %arg13: memref<1x1x128xf32, #tpu.memory_space<vmem>>, %arg14: memref<128x64xf32, #tpu.memory_space<vmem>>, %arg15: memref<110x64xbf16, #tpu.memory_space<vmem>>) attributes {dimension_semantics = [#tpu.dimension_semantics<parallel>], iteration_bounds = array<i64: 2>, scalar_prefetch = 0 : i64, scratch_operands = 2 : i64, tpu.core_type = #tpu.core_type<tc>, window_params = [{transform_indices = @transform_0, window_bounds = array<i64: 1, 256, 27>}, {pipeline_mode = #tpu.pipeline_mode<synchronous>, transform_indices = @transform_1, window_bounds = array<i64: 27, 64>}, {pipeline_mode = #tpu.pipeline_mode<synchronous>, transform_indices = @transform_2, window_bounds = array<i64: 1, 64>}, {pipeline_mode = #tpu.pipeline_mode<synchronous>, transform_indices = @transform_3, window_bounds = array<i64: 9, 64, 64>}, {pipeline_mode = #tpu.pipeline_mode<synchronous>, transform_indices = @transform_4, window_bounds = array<i64: 1, 64>}, {pipeline_mode = #tpu.pipeline_mode<synchronous>, transform_indices = @transform_5, window_bounds = array<i64: 9, 64, 64>}, {pipeline_mode = #tpu.pipeline_mode<synchronous>, transform_indices = @transform_6, window_bounds = array<i64: 1, 64>}, {pipeline_mode = #tpu.pipeline_mode<synchronous>, transform_indices = @transform_7, window_bounds = array<i64: 9, 64, 64>}, {pipeline_mode = #tpu.pipeline_mode<synchronous>, transform_indices = @transform_8, window_bounds = array<i64: 1, 64>}, {pipeline_mode = #tpu.pipeline_mode<synchronous>, transform_indices = @transform_9, window_bounds = array<i64: 64, 128>}, {pipeline_mode = #tpu.pipeline_mode<synchronous>, transform_indices = @transform_10, window_bounds = array<i64: 1, 128>}, {transform_indices = @transform_11, window_bounds = array<i64: 1, 1, 64>}, {transform_indices = @transform_12, window_bounds = array<i64: 1, 1, 128>}]} {
    %c0 = arith.constant 0 : index
    %c0_0 = arith.constant 0 : index
    %c0_1 = arith.constant 0 : index
    %0 = vector.load %arg1[%c0, %c0_0, %c0_1] : memref<1x256x27xbf16, #tpu.memory_space<vmem>>, vector<1x256x27xbf16>
    %1 = vector.shape_cast %0 : vector<1x256x27xbf16> to vector<256x27xbf16>
    %c0_2 = arith.constant 0 : index
    %c0_3 = arith.constant 0 : index
    %2 = vector.load %arg2[%c0_2, %c0_3] : memref<27x64xbf16, #tpu.memory_space<vmem>>, vector<27x64xbf16>
    %cst = arith.constant dense<0.000000e+00> : vector<256x64xf32>
    %3 = tpu.matmul %1, %2, %cst {dimension_numbers = #tpu.dot_dimension_numbers<[1], [0], [0], [1], [0, 0, 1, 1], [], []>} : vector<256x27xbf16>, vector<27x64xbf16>, vector<256x64xf32> -> vector<256x64xf32>
    %c0_4 = arith.constant 0 : index
    %c0_5 = arith.constant 0 : index
    %4 = vector.load %arg3[%c0_4, %c0_5] : memref<1x64xf32, #tpu.memory_space<vmem>>, vector<1x64xf32>
    %5 = vector.broadcast %4 : vector<1x64xf32> to vector<256x64xf32>
    %6 = arith.addf %3, %5 : vector<256x64xf32>
    %cst_6 = arith.constant 0.000000e+00 : f32
    %7 = vector.broadcast %cst_6 : f32 to vector<256x64xf32>
    %8 = arith.maximumf %6, %7 : vector<256x64xf32>
    %9 = vector.extract_strided_slice %8 {offsets = [0, 0], sizes = [16, 64], strides = [1, 1]} : vector<256x64xf32> to vector<16x64xf32>
    %10 = vector.extract_strided_slice %8 {offsets = [16, 0], sizes = [16, 64], strides = [1, 1]} : vector<256x64xf32> to vector<16x64xf32>
    %11 = arith.maximumf %9, %10 : vector<16x64xf32>
    %c0_7 = arith.constant 0 : index
    %c0_8 = arith.constant 0 : index
    %12 = vector.load %arg14[%c0_7, %c0_8] : memref<128x64xf32, #tpu.memory_space<vmem>>, vector<16x64xf32>
    tpu.vector_store %arg14[%c0_7, %c0_8], %11 {strides = array<i32>} : memref<128x64xf32, #tpu.memory_space<vmem>>, vector<16x64xf32>,
    %13 = vector.extract_strided_slice %8 {offsets = [32, 0], sizes = [16, 64], strides = [1, 1]} : vector<256x64xf32> to vector<16x64xf32>
    %14 = vector.extract_strided_slice %8 {offsets = [48, 0], sizes = [16, 64], strides = [1, 1]} : vector<256x64xf32> to vector<16x64xf32>
    %15 = arith.maximumf %13, %14 : vector<16x64xf32>
    %c16 = arith.constant 16 : index
    %c0_9 = arith.constant 0 : index
    %16 = vector.load %arg14[%c16, %c0_9] : memref<128x64xf32, #tpu.memory_space<vmem>>, vector<16x64xf32>
    tpu.vector_store %arg14[%c16, %c0_9], %15 {strides = array<i32>} : memref<128x64xf32, #tpu.memory_space<vmem>>, vector<16x64xf32>,
    %17 = vector.extract_strided_slice %8 {offsets = [64, 0], sizes = [16, 64], strides = [1, 1]} : vector<256x64xf32> to vector<16x64xf32>
    %18 = vector.extract_strided_slice %8 {offsets = [80, 0], sizes = [16, 64], strides = [1, 1]} : vector<256x64xf32> to vector<16x64xf32>
    %19 = arith.maximumf %17, %18 : vector<16x64xf32>
    %c32 = arith.constant 32 : index
    %c0_10 = arith.constant 0 : index
    %20 = vector.load %arg14[%c32, %c0_10] : memref<128x64xf32, #tpu.memory_space<vmem>>, vector<16x64xf32>
    tpu.vector_store %arg14[%c32, %c0_10], %19 {strides = array<i32>} : memref<128x64xf32, #tpu.memory_space<vmem>>, vector<16x64xf32>,
    %21 = vector.extract_strided_slice %8 {offsets = [96, 0], sizes = [16, 64], strides = [1, 1]} : vector<256x64xf32> to vector<16x64xf32>
    %22 = vector.extract_strided_slice %8 {offsets = [112, 0], sizes = [16, 64], strides = [1, 1]} : vector<256x64xf32> to vector<16x64xf32>
    %23 = arith.maximumf %21, %22 : vector<16x64xf32>
    %c48 = arith.constant 48 : index
    %c0_11 = arith.constant 0 : index
    %24 = vector.load %arg14[%c48, %c0_11] : memref<128x64xf32, #tpu.memory_space<vmem>>, vector<16x64xf32>
    tpu.vector_store %arg14[%c48, %c0_11], %23 {strides = array<i32>} : memref<128x64xf32, #tpu.memory_space<vmem>>, vector<16x64xf32>,
    %25 = vector.extract_strided_slice %8 {offsets = [128, 0], sizes = [16, 64], strides = [1, 1]} : vector<256x64xf32> to vector<16x64xf32>
    %26 = vector.extract_strided_slice %8 {offsets = [144, 0], sizes = [16, 64], strides = [1, 1]} : vector<256x64xf32> to vector<16x64xf32>
    %27 = arith.maximumf %25, %26 : vector<16x64xf32>
    %c64 = arith.constant 64 : index
    %c0_12 = arith.constant 0 : index
    %28 = vector.load %arg14[%c64, %c0_12] : memref<128x64xf32, #tpu.memory_space<vmem>>, vector<16x64xf32>
    tpu.vector_store %arg14[%c64, %c0_12], %27 {strides = array<i32>} : memref<128x64xf32, #tpu.memory_space<vmem>>, vector<16x64xf32>,
    %29 = vector.extract_strided_slice %8 {offsets = [160, 0], sizes = [16, 64], strides = [1, 1]} : vector<256x64xf32> to vector<16x64xf32>
    %30 = vector.extract_strided_slice %8 {offsets = [176, 0], sizes = [16, 64], strides = [1, 1]} : vector<256x64xf32> to vector<16x64xf32>
    %31 = arith.maximumf %29, %30 : vector<16x64xf32>
    %c80 = arith.constant 80 : index
    %c0_13 = arith.constant 0 : index
    %32 = vector.load %arg14[%c80, %c0_13] : memref<128x64xf32, #tpu.memory_space<vmem>>, vector<16x64xf32>
    tpu.vector_store %arg14[%c80, %c0_13], %31 {strides = array<i32>} : memref<128x64xf32, #tpu.memory_space<vmem>>, vector<16x64xf32>,
    %33 = vector.extract_strided_slice %8 {offsets = [192, 0], sizes = [16, 64], strides = [1, 1]} : vector<256x64xf32> to vector<16x64xf32>
    %34 = vector.extract_strided_slice %8 {offsets = [208, 0], sizes = [16, 64], strides = [1, 1]} : vector<256x64xf32> to vector<16x64xf32>
    %35 = arith.maximumf %33, %34 : vector<16x64xf32>
    %c96 = arith.constant 96 : index
    %c0_14 = arith.constant 0 : index
    %36 = vector.load %arg14[%c96, %c0_14] : memref<128x64xf32, #tpu.memory_space<vmem>>, vector<16x64xf32>
    tpu.vector_store %arg14[%c96, %c0_14], %35 {strides = array<i32>} : memref<128x64xf32, #tpu.memory_space<vmem>>, vector<16x64xf32>,
    %37 = vector.extract_strided_slice %8 {offsets = [224, 0], sizes = [16, 64], strides = [1, 1]} : vector<256x64xf32> to vector<16x64xf32>
    %38 = vector.extract_strided_slice %8 {offsets = [240, 0], sizes = [16, 64], strides = [1, 1]} : vector<256x64xf32> to vector<16x64xf32>
    %39 = arith.maximumf %37, %38 : vector<16x64xf32>
    %c112 = arith.constant 112 : index
    %c0_15 = arith.constant 0 : index
    %40 = vector.load %arg14[%c112, %c0_15] : memref<128x64xf32, #tpu.memory_space<vmem>>, vector<16x64xf32>
    tpu.vector_store %arg14[%c112, %c0_15], %39 {strides = array<i32>} : memref<128x64xf32, #tpu.memory_space<vmem>>, vector<16x64xf32>,
    %c0_16 = arith.constant 0 : index
    %c0_17 = arith.constant 0 : index
    %41 = tpu.strided_load %arg14[%c0_16, %c0_17] {strides = array<i32: 2, 1>} : memref<128x64xf32, #tpu.memory_space<vmem>>, vector<64x64xf32>
    %c1 = arith.constant 1 : index
    %c0_18 = arith.constant 0 : index
    %42 = tpu.strided_load %arg14[%c1, %c0_18] {strides = array<i32: 2, 1>} : memref<128x64xf32, #tpu.memory_space<vmem>>, vector<64x64xf32>
    %43 = arith.maximumf %41, %42 : vector<64x64xf32>
    %cst_19 = arith.constant 0.000000e+00 : bf16
    %44 = vector.broadcast %cst_19 : bf16 to vector<110x64xbf16>
    %c0_20 = arith.constant 0 : index
    %c0_21 = arith.constant 0 : index
    %45 = vector.load %arg15[%c0_20, %c0_21] : memref<110x64xbf16, #tpu.memory_space<vmem>>, vector<110x64xbf16>
    tpu.vector_store %arg15[%c0_20, %c0_21], %44 {strides = array<i32>} : memref<110x64xbf16, #tpu.memory_space<vmem>>, vector<110x64xbf16>,
    %46 = vector.extract_strided_slice %43 {offsets = [0, 0], sizes = [8, 64], strides = [1, 1]} : vector<64x64xf32> to vector<8x64xf32>
    %47 = arith.truncf %46 : vector<8x64xf32> to vector<8x64xbf16>
    %c11 = arith.constant 11 : index
    %c0_22 = arith.constant 0 : index
    %48 = vector.load %arg15[%c11, %c0_22] : memref<110x64xbf16, #tpu.memory_space<vmem>>, vector<8x64xbf16>
    tpu.vector_store %arg15[%c11, %c0_22], %47 {strides = array<i32>} : memref<110x64xbf16, #tpu.memory_space<vmem>>, vector<8x64xbf16>,
    %49 = vector.extract_strided_slice %43 {offsets = [8, 0], sizes = [8, 64], strides = [1, 1]} : vector<64x64xf32> to vector<8x64xf32>
    %50 = arith.truncf %49 : vector<8x64xf32> to vector<8x64xbf16>
    %c21 = arith.constant 21 : index
    %c0_23 = arith.constant 0 : index
    %51 = vector.load %arg15[%c21, %c0_23] : memref<110x64xbf16, #tpu.memory_space<vmem>>, vector<8x64xbf16>
    tpu.vector_store %arg15[%c21, %c0_23], %50 {strides = array<i32>} : memref<110x64xbf16, #tpu.memory_space<vmem>>, vector<8x64xbf16>,
    %52 = vector.extract_strided_slice %43 {offsets = [16, 0], sizes = [8, 64], strides = [1, 1]} : vector<64x64xf32> to vector<8x64xf32>
    %53 = arith.truncf %52 : vector<8x64xf32> to vector<8x64xbf16>
    %c31 = arith.constant 31 : index
    %c0_24 = arith.constant 0 : index
    %54 = vector.load %arg15[%c31, %c0_24] : memref<110x64xbf16, #tpu.memory_space<vmem>>, vector<8x64xbf16>
    tpu.vector_store %arg15[%c31, %c0_24], %53 {strides = array<i32>} : memref<110x64xbf16, #tpu.memory_space<vmem>>, vector<8x64xbf16>,
    %55 = vector.extract_strided_slice %43 {offsets = [24, 0], sizes = [8, 64], strides = [1, 1]} : vector<64x64xf32> to vector<8x64xf32>
    %56 = arith.truncf %55 : vector<8x64xf32> to vector<8x64xbf16>
    %c41 = arith.constant 41 : index
    %c0_25 = arith.constant 0 : index
    %57 = vector.load %arg15[%c41, %c0_25] : memref<110x64xbf16, #tpu.memory_space<vmem>>, vector<8x64xbf16>
    tpu.vector_store %arg15[%c41, %c0_25], %56 {strides = array<i32>} : memref<110x64xbf16, #tpu.memory_space<vmem>>, vector<8x64xbf16>,
    %58 = vector.extract_strided_slice %43 {offsets = [32, 0], sizes = [8, 64], strides = [1, 1]} : vector<64x64xf32> to vector<8x64xf32>
    %59 = arith.truncf %58 : vector<8x64xf32> to vector<8x64xbf16>
    %c51 = arith.constant 51 : index
    %c0_26 = arith.constant 0 : index
    %60 = vector.load %arg15[%c51, %c0_26] : memref<110x64xbf16, #tpu.memory_space<vmem>>, vector<8x64xbf16>
    tpu.vector_store %arg15[%c51, %c0_26], %59 {strides = array<i32>} : memref<110x64xbf16, #tpu.memory_space<vmem>>, vector<8x64xbf16>,
    %61 = vector.extract_strided_slice %43 {offsets = [40, 0], sizes = [8, 64], strides = [1, 1]} : vector<64x64xf32> to vector<8x64xf32>
    %62 = arith.truncf %61 : vector<8x64xf32> to vector<8x64xbf16>
    %c61 = arith.constant 61 : index
    %c0_27 = arith.constant 0 : index
    %63 = vector.load %arg15[%c61, %c0_27] : memref<110x64xbf16, #tpu.memory_space<vmem>>, vector<8x64xbf16>
    tpu.vector_store %arg15[%c61, %c0_27], %62 {strides = array<i32>} : memref<110x64xbf16, #tpu.memory_space<vmem>>, vector<8x64xbf16>,
    %64 = vector.extract_strided_slice %43 {offsets = [48, 0], sizes = [8, 64], strides = [1, 1]} : vector<64x64xf32> to vector<8x64xf32>
    %65 = arith.truncf %64 : vector<8x64xf32> to vector<8x64xbf16>
    %c71 = arith.constant 71 : index
    %c0_28 = arith.constant 0 : index
    %66 = vector.load %arg15[%c71, %c0_28] : memref<110x64xbf16, #tpu.memory_space<vmem>>, vector<8x64xbf16>
    tpu.vector_store %arg15[%c71, %c0_28], %65 {strides = array<i32>} : memref<110x64xbf16, #tpu.memory_space<vmem>>, vector<8x64xbf16>,
    %67 = vector.extract_strided_slice %43 {offsets = [56, 0], sizes = [8, 64], strides = [1, 1]} : vector<64x64xf32> to vector<8x64xf32>
    %68 = arith.truncf %67 : vector<8x64xf32> to vector<8x64xbf16>
    %c81 = arith.constant 81 : index
    %c0_29 = arith.constant 0 : index
    %69 = vector.load %arg15[%c81, %c0_29] : memref<110x64xbf16, #tpu.memory_space<vmem>>, vector<8x64xbf16>
    tpu.vector_store %arg15[%c81, %c0_29], %68 {strides = array<i32>} : memref<110x64xbf16, #tpu.memory_space<vmem>>, vector<8x64xbf16>,
    %c0_30 = arith.constant 0 : index
    %c0_31 = arith.constant 0 : index
    %70 = vector.load %arg15[%c0_30, %c0_31] : memref<110x64xbf16, #tpu.memory_space<vmem>>, vector<80x64xbf16>
    %c0_32 = arith.constant 0 : index
    %c0_33 = arith.constant 0 : index
    %c0_34 = arith.constant 0 : index
    %71 = vector.load %arg4[%c0_32, %c0_33, %c0_34] : memref<9x64x64xbf16, #tpu.memory_space<vmem>>, vector<1x64x64xbf16>
    %72 = vector.shape_cast %71 : vector<1x64x64xbf16> to vector<64x64xbf16>
    %cst_35 = arith.constant dense<0.000000e+00> : vector<80x64xf32>
    %73 = tpu.matmul %70, %72, %cst_35 {dimension_numbers = #tpu.dot_dimension_numbers<[1], [0], [0], [1], [0, 0, 1, 1], [], []>} : vector<80x64xbf16>, vector<64x64xbf16>, vector<80x64xf32> -> vector<80x64xf32>
    %c1_36 = arith.constant 1 : index
    %c0_37 = arith.constant 0 : index
    %74 = vector.load %arg15[%c1_36, %c0_37] : memref<110x64xbf16, #tpu.memory_space<vmem>>, vector<80x64xbf16>
    %c1_38 = arith.constant 1 : index
    %c0_39 = arith.constant 0 : index
    %c0_40 = arith.constant 0 : index
    %75 = vector.load %arg4[%c1_38, %c0_39, %c0_40] : memref<9x64x64xbf16, #tpu.memory_space<vmem>>, vector<1x64x64xbf16>
    %76 = vector.shape_cast %75 : vector<1x64x64xbf16> to vector<64x64xbf16>
    %cst_41 = arith.constant dense<0.000000e+00> : vector<80x64xf32>
    %77 = tpu.matmul %74, %76, %cst_41 {dimension_numbers = #tpu.dot_dimension_numbers<[1], [0], [0], [1], [0, 0, 1, 1], [], []>} : vector<80x64xbf16>, vector<64x64xbf16>, vector<80x64xf32> -> vector<80x64xf32>
    %78 = arith.addf %73, %77 : vector<80x64xf32>
    %c2 = arith.constant 2 : index
    %c0_42 = arith.constant 0 : index
    %79 = vector.load %arg15[%c2, %c0_42] : memref<110x64xbf16, #tpu.memory_space<vmem>>, vector<80x64xbf16>
    %c2_43 = arith.constant 2 : index
    %c0_44 = arith.constant 0 : index
    %c0_45 = arith.constant 0 : index
    %80 = vector.load %arg4[%c2_43, %c0_44, %c0_45] : memref<9x64x64xbf16, #tpu.memory_space<vmem>>, vector<1x64x64xbf16>
    %81 = vector.shape_cast %80 : vector<1x64x64xbf16> to vector<64x64xbf16>
    %cst_46 = arith.constant dense<0.000000e+00> : vector<80x64xf32>
    %82 = tpu.matmul %79, %81, %cst_46 {dimension_numbers = #tpu.dot_dimension_numbers<[1], [0], [0], [1], [0, 0, 1, 1], [], []>} : vector<80x64xbf16>, vector<64x64xbf16>, vector<80x64xf32> -> vector<80x64xf32>
    %83 = arith.addf %78, %82 : vector<80x64xf32>
    %c10 = arith.constant 10 : index
    %c0_47 = arith.constant 0 : index
    %84 = vector.load %arg15[%c10, %c0_47] : memref<110x64xbf16, #tpu.memory_space<vmem>>, vector<80x64xbf16>
    %c3 = arith.constant 3 : index
    %c0_48 = arith.constant 0 : index
    %c0_49 = arith.constant 0 : index
    %85 = vector.load %arg4[%c3, %c0_48, %c0_49] : memref<9x64x64xbf16, #tpu.memory_space<vmem>>, vector<1x64x64xbf16>
    %86 = vector.shape_cast %85 : vector<1x64x64xbf16> to vector<64x64xbf16>
    %cst_50 = arith.constant dense<0.000000e+00> : vector<80x64xf32>
    %87 = tpu.matmul %84, %86, %cst_50 {dimension_numbers = #tpu.dot_dimension_numbers<[1], [0], [0], [1], [0, 0, 1, 1], [], []>} : vector<80x64xbf16>, vector<64x64xbf16>, vector<80x64xf32> -> vector<80x64xf32>
    %88 = arith.addf %83, %87 : vector<80x64xf32>
    %c11_51 = arith.constant 11 : index
    %c0_52 = arith.constant 0 : index
    %89 = vector.load %arg15[%c11_51, %c0_52] : memref<110x64xbf16, #tpu.memory_space<vmem>>, vector<80x64xbf16>
    %c4 = arith.constant 4 : index
    %c0_53 = arith.constant 0 : index
    %c0_54 = arith.constant 0 : index
    %90 = vector.load %arg4[%c4, %c0_53, %c0_54] : memref<9x64x64xbf16, #tpu.memory_space<vmem>>, vector<1x64x64xbf16>
    %91 = vector.shape_cast %90 : vector<1x64x64xbf16> to vector<64x64xbf16>
    %cst_55 = arith.constant dense<0.000000e+00> : vector<80x64xf32>
    %92 = tpu.matmul %89, %91, %cst_55 {dimension_numbers = #tpu.dot_dimension_numbers<[1], [0], [0], [1], [0, 0, 1, 1], [], []>} : vector<80x64xbf16>, vector<64x64xbf16>, vector<80x64xf32> -> vector<80x64xf32>
    %93 = arith.addf %88, %92 : vector<80x64xf32>
    %c12 = arith.constant 12 : index
    %c0_56 = arith.constant 0 : index
    %94 = vector.load %arg15[%c12, %c0_56] : memref<110x64xbf16, #tpu.memory_space<vmem>>, vector<80x64xbf16>
    %c5 = arith.constant 5 : index
    %c0_57 = arith.constant 0 : index
    %c0_58 = arith.constant 0 : index
    %95 = vector.load %arg4[%c5, %c0_57, %c0_58] : memref<9x64x64xbf16, #tpu.memory_space<vmem>>, vector<1x64x64xbf16>
    %96 = vector.shape_cast %95 : vector<1x64x64xbf16> to vector<64x64xbf16>
    %cst_59 = arith.constant dense<0.000000e+00> : vector<80x64xf32>
    %97 = tpu.matmul %94, %96, %cst_59 {dimension_numbers = #tpu.dot_dimension_numbers<[1], [0], [0], [1], [0, 0, 1, 1], [], []>} : vector<80x64xbf16>, vector<64x64xbf16>, vector<80x64xf32> -> vector<80x64xf32>
    %98 = arith.addf %93, %97 : vector<80x64xf32>
    %c20 = arith.constant 20 : index
    %c0_60 = arith.constant 0 : index
    %99 = vector.load %arg15[%c20, %c0_60] : memref<110x64xbf16, #tpu.memory_space<vmem>>, vector<80x64xbf16>
    %c6 = arith.constant 6 : index
    %c0_61 = arith.constant 0 : index
    %c0_62 = arith.constant 0 : index
    %100 = vector.load %arg4[%c6, %c0_61, %c0_62] : memref<9x64x64xbf16, #tpu.memory_space<vmem>>, vector<1x64x64xbf16>
    %101 = vector.shape_cast %100 : vector<1x64x64xbf16> to vector<64x64xbf16>
    %cst_63 = arith.constant dense<0.000000e+00> : vector<80x64xf32>
    %102 = tpu.matmul %99, %101, %cst_63 {dimension_numbers = #tpu.dot_dimension_numbers<[1], [0], [0], [1], [0, 0, 1, 1], [], []>} : vector<80x64xbf16>, vector<64x64xbf16>, vector<80x64xf32> -> vector<80x64xf32>
    %103 = arith.addf %98, %102 : vector<80x64xf32>
    %c21_64 = arith.constant 21 : index
    %c0_65 = arith.constant 0 : index
    %104 = vector.load %arg15[%c21_64, %c0_65] : memref<110x64xbf16, #tpu.memory_space<vmem>>, vector<80x64xbf16>
    %c7 = arith.constant 7 : index
    %c0_66 = arith.constant 0 : index
    %c0_67 = arith.constant 0 : index
    %105 = vector.load %arg4[%c7, %c0_66, %c0_67] : memref<9x64x64xbf16, #tpu.memory_space<vmem>>, vector<1x64x64xbf16>
    %106 = vector.shape_cast %105 : vector<1x64x64xbf16> to vector<64x64xbf16>
    %cst_68 = arith.constant dense<0.000000e+00> : vector<80x64xf32>
    %107 = tpu.matmul %104, %106, %cst_68 {dimension_numbers = #tpu.dot_dimension_numbers<[1], [0], [0], [1], [0, 0, 1, 1], [], []>} : vector<80x64xbf16>, vector<64x64xbf16>, vector<80x64xf32> -> vector<80x64xf32>
    %108 = arith.addf %103, %107 : vector<80x64xf32>
    %c22 = arith.constant 22 : index
    %c0_69 = arith.constant 0 : index
    %109 = vector.load %arg15[%c22, %c0_69] : memref<110x64xbf16, #tpu.memory_space<vmem>>, vector<80x64xbf16>
    %c8 = arith.constant 8 : index
    %c0_70 = arith.constant 0 : index
    %c0_71 = arith.constant 0 : index
    %110 = vector.load %arg4[%c8, %c0_70, %c0_71] : memref<9x64x64xbf16, #tpu.memory_space<vmem>>, vector<1x64x64xbf16>
    %111 = vector.shape_cast %110 : vector<1x64x64xbf16> to vector<64x64xbf16>
    %cst_72 = arith.constant dense<0.000000e+00> : vector<80x64xf32>
    %112 = tpu.matmul %109, %111, %cst_72 {dimension_numbers = #tpu.dot_dimension_numbers<[1], [0], [0], [1], [0, 0, 1, 1], [], []>} : vector<80x64xbf16>, vector<64x64xbf16>, vector<80x64xf32> -> vector<80x64xf32>
    %113 = arith.addf %108, %112 : vector<80x64xf32>
    %c0_73 = arith.constant 0 : index
    %c0_74 = arith.constant 0 : index
    %114 = vector.load %arg5[%c0_73, %c0_74] : memref<1x64xf32, #tpu.memory_space<vmem>>, vector<1x64xf32>
    %115 = vector.broadcast %114 : vector<1x64xf32> to vector<80x64xf32>
    %116 = arith.addf %113, %115 : vector<80x64xf32>
    %cst_75 = arith.constant 0.000000e+00 : f32
    %117 = vector.broadcast %cst_75 : f32 to vector<80x64xf32>
    %118 = arith.maximumf %116, %117 : vector<80x64xf32>
    %119 = vector.extract_strided_slice %118 {offsets = [0, 0], sizes = [8, 64], strides = [1, 1]} : vector<80x64xf32> to vector<8x64xf32>
    %120 = vector.extract_strided_slice %118 {offsets = [10, 0], sizes = [8, 64], strides = [1, 1]} : vector<80x64xf32> to vector<8x64xf32>
    %121 = arith.maximumf %119, %120 : vector<8x64xf32>
    %c0_76 = arith.constant 0 : index
    %c0_77 = arith.constant 0 : index
    %122 = vector.load %arg14[%c0_76, %c0_77] : memref<128x64xf32, #tpu.memory_space<vmem>>, vector<8x64xf32>
    tpu.vector_store %arg14[%c0_76, %c0_77], %121 {strides = array<i32>} : memref<128x64xf32, #tpu.memory_space<vmem>>, vector<8x64xf32>,
    %123 = vector.extract_strided_slice %118 {offsets = [20, 0], sizes = [8, 64], strides = [1, 1]} : vector<80x64xf32> to vector<8x64xf32>
    %124 = vector.extract_strided_slice %118 {offsets = [30, 0], sizes = [8, 64], strides = [1, 1]} : vector<80x64xf32> to vector<8x64xf32>
    %125 = arith.maximumf %123, %124 : vector<8x64xf32>
    %c8_78 = arith.constant 8 : index
    %c0_79 = arith.constant 0 : index
    %126 = vector.load %arg14[%c8_78, %c0_79] : memref<128x64xf32, #tpu.memory_space<vmem>>, vector<8x64xf32>
    tpu.vector_store %arg14[%c8_78, %c0_79], %125 {strides = array<i32>} : memref<128x64xf32, #tpu.memory_space<vmem>>, vector<8x64xf32>,
    %127 = vector.extract_strided_slice %118 {offsets = [40, 0], sizes = [8, 64], strides = [1, 1]} : vector<80x64xf32> to vector<8x64xf32>
    %128 = vector.extract_strided_slice %118 {offsets = [50, 0], sizes = [8, 64], strides = [1, 1]} : vector<80x64xf32> to vector<8x64xf32>
    %129 = arith.maximumf %127, %128 : vector<8x64xf32>
    %c16_80 = arith.constant 16 : index
    %c0_81 = arith.constant 0 : index
    %130 = vector.load %arg14[%c16_80, %c0_81] : memref<128x64xf32, #tpu.memory_space<vmem>>, vector<8x64xf32>
    tpu.vector_store %arg14[%c16_80, %c0_81], %129 {strides = array<i32>} : memref<128x64xf32, #tpu.memory_space<vmem>>, vector<8x64xf32>,
    %131 = vector.extract_strided_slice %118 {offsets = [60, 0], sizes = [8, 64], strides = [1, 1]} : vector<80x64xf32> to vector<8x64xf32>
    %132 = vector.extract_strided_slice %118 {offsets = [70, 0], sizes = [8, 64], strides = [1, 1]} : vector<80x64xf32> to vector<8x64xf32>
    %133 = arith.maximumf %131, %132 : vector<8x64xf32>
    %c24 = arith.constant 24 : index
    %c0_82 = arith.constant 0 : index
    %134 = vector.load %arg14[%c24, %c0_82] : memref<128x64xf32, #tpu.memory_space<vmem>>, vector<8x64xf32>
    tpu.vector_store %arg14[%c24, %c0_82], %133 {strides = array<i32>} : memref<128x64xf32, #tpu.memory_space<vmem>>, vector<8x64xf32>,
    %c0_83 = arith.constant 0 : index
    %c0_84 = arith.constant 0 : index
    %135 = tpu.strided_load %arg14[%c0_83, %c0_84] {strides = array<i32: 2, 1>} : memref<128x64xf32, #tpu.memory_space<vmem>>, vector<16x64xf32>
    %c1_85 = arith.constant 1 : index
    %c0_86 = arith.constant 0 : index
    %136 = tpu.strided_load %arg14[%c1_85, %c0_86] {strides = array<i32: 2, 1>} : memref<128x64xf32, #tpu.memory_space<vmem>>, vector<16x64xf32>
    %137 = arith.maximumf %135, %136 : vector<16x64xf32>
    %cst_87 = arith.constant 0.000000e+00 : bf16
    %138 = vector.broadcast %cst_87 : bf16 to vector<42x64xbf16>
    %c0_88 = arith.constant 0 : index
    %c0_89 = arith.constant 0 : index
    %139 = vector.load %arg15[%c0_88, %c0_89] : memref<110x64xbf16, #tpu.memory_space<vmem>>, vector<42x64xbf16>
    tpu.vector_store %arg15[%c0_88, %c0_89], %138 {strides = array<i32>} : memref<110x64xbf16, #tpu.memory_space<vmem>>, vector<42x64xbf16>,
    %140 = vector.extract_strided_slice %137 {offsets = [0, 0], sizes = [4, 64], strides = [1, 1]} : vector<16x64xf32> to vector<4x64xf32>
    %141 = arith.truncf %140 : vector<4x64xf32> to vector<4x64xbf16>
    %c7_90 = arith.constant 7 : index
    %c0_91 = arith.constant 0 : index
    %142 = vector.load %arg15[%c7_90, %c0_91] : memref<110x64xbf16, #tpu.memory_space<vmem>>, vector<4x64xbf16>
    tpu.vector_store %arg15[%c7_90, %c0_91], %141 {strides = array<i32>} : memref<110x64xbf16, #tpu.memory_space<vmem>>, vector<4x64xbf16>,
    %143 = vector.extract_strided_slice %137 {offsets = [4, 0], sizes = [4, 64], strides = [1, 1]} : vector<16x64xf32> to vector<4x64xf32>
    %144 = arith.truncf %143 : vector<4x64xf32> to vector<4x64xbf16>
    %c13 = arith.constant 13 : index
    %c0_92 = arith.constant 0 : index
    %145 = vector.load %arg15[%c13, %c0_92] : memref<110x64xbf16, #tpu.memory_space<vmem>>, vector<4x64xbf16>
    tpu.vector_store %arg15[%c13, %c0_92], %144 {strides = array<i32>} : memref<110x64xbf16, #tpu.memory_space<vmem>>, vector<4x64xbf16>,
    %146 = vector.extract_strided_slice %137 {offsets = [8, 0], sizes = [4, 64], strides = [1, 1]} : vector<16x64xf32> to vector<4x64xf32>
    %147 = arith.truncf %146 : vector<4x64xf32> to vector<4x64xbf16>
    %c19 = arith.constant 19 : index
    %c0_93 = arith.constant 0 : index
    %148 = vector.load %arg15[%c19, %c0_93] : memref<110x64xbf16, #tpu.memory_space<vmem>>, vector<4x64xbf16>
    tpu.vector_store %arg15[%c19, %c0_93], %147 {strides = array<i32>} : memref<110x64xbf16, #tpu.memory_space<vmem>>, vector<4x64xbf16>,
    %149 = vector.extract_strided_slice %137 {offsets = [12, 0], sizes = [4, 64], strides = [1, 1]} : vector<16x64xf32> to vector<4x64xf32>
    %150 = arith.truncf %149 : vector<4x64xf32> to vector<4x64xbf16>
    %c25 = arith.constant 25 : index
    %c0_94 = arith.constant 0 : index
    %151 = vector.load %arg15[%c25, %c0_94] : memref<110x64xbf16, #tpu.memory_space<vmem>>, vector<4x64xbf16>
    tpu.vector_store %arg15[%c25, %c0_94], %150 {strides = array<i32>} : memref<110x64xbf16, #tpu.memory_space<vmem>>, vector<4x64xbf16>,
    %c0_95 = arith.constant 0 : index
    %c0_96 = arith.constant 0 : index
    %152 = vector.load %arg15[%c0_95, %c0_96] : memref<110x64xbf16, #tpu.memory_space<vmem>>, vector<24x64xbf16>
    %c0_97 = arith.constant 0 : index
    %c0_98 = arith.constant 0 : index
    %c0_99 = arith.constant 0 : index
    %153 = vector.load %arg6[%c0_97, %c0_98, %c0_99] : memref<9x64x64xbf16, #tpu.memory_space<vmem>>, vector<1x64x64xbf16>
    %154 = vector.shape_cast %153 : vector<1x64x64xbf16> to vector<64x64xbf16>
    %cst_100 = arith.constant dense<0.000000e+00> : vector<24x64xf32>
    %155 = tpu.matmul %152, %154, %cst_100 {dimension_numbers = #tpu.dot_dimension_numbers<[1], [0], [0], [1], [0, 0, 1, 1], [], []>} : vector<24x64xbf16>, vector<64x64xbf16>, vector<24x64xf32> -> vector<24x64xf32>
    %c1_101 = arith.constant 1 : index
    %c0_102 = arith.constant 0 : index
    %156 = vector.load %arg15[%c1_101, %c0_102] : memref<110x64xbf16, #tpu.memory_space<vmem>>, vector<24x64xbf16>
    %c1_103 = arith.constant 1 : index
    %c0_104 = arith.constant 0 : index
    %c0_105 = arith.constant 0 : index
    %157 = vector.load %arg6[%c1_103, %c0_104, %c0_105] : memref<9x64x64xbf16, #tpu.memory_space<vmem>>, vector<1x64x64xbf16>
    %158 = vector.shape_cast %157 : vector<1x64x64xbf16> to vector<64x64xbf16>
    %cst_106 = arith.constant dense<0.000000e+00> : vector<24x64xf32>
    %159 = tpu.matmul %156, %158, %cst_106 {dimension_numbers = #tpu.dot_dimension_numbers<[1], [0], [0], [1], [0, 0, 1, 1], [], []>} : vector<24x64xbf16>, vector<64x64xbf16>, vector<24x64xf32> -> vector<24x64xf32>
    %160 = arith.addf %155, %159 : vector<24x64xf32>
    %c2_107 = arith.constant 2 : index
    %c0_108 = arith.constant 0 : index
    %161 = vector.load %arg15[%c2_107, %c0_108] : memref<110x64xbf16, #tpu.memory_space<vmem>>, vector<24x64xbf16>
    %c2_109 = arith.constant 2 : index
    %c0_110 = arith.constant 0 : index
    %c0_111 = arith.constant 0 : index
    %162 = vector.load %arg6[%c2_109, %c0_110, %c0_111] : memref<9x64x64xbf16, #tpu.memory_space<vmem>>, vector<1x64x64xbf16>
    %163 = vector.shape_cast %162 : vector<1x64x64xbf16> to vector<64x64xbf16>
    %cst_112 = arith.constant dense<0.000000e+00> : vector<24x64xf32>
    %164 = tpu.matmul %161, %163, %cst_112 {dimension_numbers = #tpu.dot_dimension_numbers<[1], [0], [0], [1], [0, 0, 1, 1], [], []>} : vector<24x64xbf16>, vector<64x64xbf16>, vector<24x64xf32> -> vector<24x64xf32>
    %165 = arith.addf %160, %164 : vector<24x64xf32>
    %c6_113 = arith.constant 6 : index
    %c0_114 = arith.constant 0 : index
    %166 = vector.load %arg15[%c6_113, %c0_114] : memref<110x64xbf16, #tpu.memory_space<vmem>>, vector<24x64xbf16>
    %c3_115 = arith.constant 3 : index
    %c0_116 = arith.constant 0 : index
    %c0_117 = arith.constant 0 : index
    %167 = vector.load %arg6[%c3_115, %c0_116, %c0_117] : memref<9x64x64xbf16, #tpu.memory_space<vmem>>, vector<1x64x64xbf16>
    %168 = vector.shape_cast %167 : vector<1x64x64xbf16> to vector<64x64xbf16>
    %cst_118 = arith.constant dense<0.000000e+00> : vector<24x64xf32>
    %169 = tpu.matmul %166, %168, %cst_118 {dimension_numbers = #tpu.dot_dimension_numbers<[1], [0], [0], [1], [0, 0, 1, 1], [], []>} : vector<24x64xbf16>, vector<64x64xbf16>, vector<24x64xf32> -> vector<24x64xf32>
    %170 = arith.addf %165, %169 : vector<24x64xf32>
    %c7_119 = arith.constant 7 : index
    %c0_120 = arith.constant 0 : index
    %171 = vector.load %arg15[%c7_119, %c0_120] : memref<110x64xbf16, #tpu.memory_space<vmem>>, vector<24x64xbf16>
    %c4_121 = arith.constant 4 : index
    %c0_122 = arith.constant 0 : index
    %c0_123 = arith.constant 0 : index
    %172 = vector.load %arg6[%c4_121, %c0_122, %c0_123] : memref<9x64x64xbf16, #tpu.memory_space<vmem>>, vector<1x64x64xbf16>
    %173 = vector.shape_cast %172 : vector<1x64x64xbf16> to vector<64x64xbf16>
    %cst_124 = arith.constant dense<0.000000e+00> : vector<24x64xf32>
    %174 = tpu.matmul %171, %173, %cst_124 {dimension_numbers = #tpu.dot_dimension_numbers<[1], [0], [0], [1], [0, 0, 1, 1], [], []>} : vector<24x64xbf16>, vector<64x64xbf16>, vector<24x64xf32> -> vector<24x64xf32>
    %175 = arith.addf %170, %174 : vector<24x64xf32>
    %c8_125 = arith.constant 8 : index
    %c0_126 = arith.constant 0 : index
    %176 = vector.load %arg15[%c8_125, %c0_126] : memref<110x64xbf16, #tpu.memory_space<vmem>>, vector<24x64xbf16>
    %c5_127 = arith.constant 5 : index
    %c0_128 = arith.constant 0 : index
    %c0_129 = arith.constant 0 : index
    %177 = vector.load %arg6[%c5_127, %c0_128, %c0_129] : memref<9x64x64xbf16, #tpu.memory_space<vmem>>, vector<1x64x64xbf16>
    %178 = vector.shape_cast %177 : vector<1x64x64xbf16> to vector<64x64xbf16>
    %cst_130 = arith.constant dense<0.000000e+00> : vector<24x64xf32>
    %179 = tpu.matmul %176, %178, %cst_130 {dimension_numbers = #tpu.dot_dimension_numbers<[1], [0], [0], [1], [0, 0, 1, 1], [], []>} : vector<24x64xbf16>, vector<64x64xbf16>, vector<24x64xf32> -> vector<24x64xf32>
    %180 = arith.addf %175, %179 : vector<24x64xf32>
    %c12_131 = arith.constant 12 : index
    %c0_132 = arith.constant 0 : index
    %181 = vector.load %arg15[%c12_131, %c0_132] : memref<110x64xbf16, #tpu.memory_space<vmem>>, vector<24x64xbf16>
    %c6_133 = arith.constant 6 : index
    %c0_134 = arith.constant 0 : index
    %c0_135 = arith.constant 0 : index
    %182 = vector.load %arg6[%c6_133, %c0_134, %c0_135] : memref<9x64x64xbf16, #tpu.memory_space<vmem>>, vector<1x64x64xbf16>
    %183 = vector.shape_cast %182 : vector<1x64x64xbf16> to vector<64x64xbf16>
    %cst_136 = arith.constant dense<0.000000e+00> : vector<24x64xf32>
    %184 = tpu.matmul %181, %183, %cst_136 {dimension_numbers = #tpu.dot_dimension_numbers<[1], [0], [0], [1], [0, 0, 1, 1], [], []>} : vector<24x64xbf16>, vector<64x64xbf16>, vector<24x64xf32> -> vector<24x64xf32>
    %185 = arith.addf %180, %184 : vector<24x64xf32>
    %c13_137 = arith.constant 13 : index
    %c0_138 = arith.constant 0 : index
    %186 = vector.load %arg15[%c13_137, %c0_138] : memref<110x64xbf16, #tpu.memory_space<vmem>>, vector<24x64xbf16>
    %c7_139 = arith.constant 7 : index
    %c0_140 = arith.constant 0 : index
    %c0_141 = arith.constant 0 : index
    %187 = vector.load %arg6[%c7_139, %c0_140, %c0_141] : memref<9x64x64xbf16, #tpu.memory_space<vmem>>, vector<1x64x64xbf16>
    %188 = vector.shape_cast %187 : vector<1x64x64xbf16> to vector<64x64xbf16>
    %cst_142 = arith.constant dense<0.000000e+00> : vector<24x64xf32>
    %189 = tpu.matmul %186, %188, %cst_142 {dimension_numbers = #tpu.dot_dimension_numbers<[1], [0], [0], [1], [0, 0, 1, 1], [], []>} : vector<24x64xbf16>, vector<64x64xbf16>, vector<24x64xf32> -> vector<24x64xf32>
    %190 = arith.addf %185, %189 : vector<24x64xf32>
    %c14 = arith.constant 14 : index
    %c0_143 = arith.constant 0 : index
    %191 = vector.load %arg15[%c14, %c0_143] : memref<110x64xbf16, #tpu.memory_space<vmem>>, vector<24x64xbf16>
    %c8_144 = arith.constant 8 : index
    %c0_145 = arith.constant 0 : index
    %c0_146 = arith.constant 0 : index
    %192 = vector.load %arg6[%c8_144, %c0_145, %c0_146] : memref<9x64x64xbf16, #tpu.memory_space<vmem>>, vector<1x64x64xbf16>
    %193 = vector.shape_cast %192 : vector<1x64x64xbf16> to vector<64x64xbf16>
    %cst_147 = arith.constant dense<0.000000e+00> : vector<24x64xf32>
    %194 = tpu.matmul %191, %193, %cst_147 {dimension_numbers = #tpu.dot_dimension_numbers<[1], [0], [0], [1], [0, 0, 1, 1], [], []>} : vector<24x64xbf16>, vector<64x64xbf16>, vector<24x64xf32> -> vector<24x64xf32>
    %195 = arith.addf %190, %194 : vector<24x64xf32>
    %c0_148 = arith.constant 0 : index
    %c0_149 = arith.constant 0 : index
    %196 = vector.load %arg7[%c0_148, %c0_149] : memref<1x64xf32, #tpu.memory_space<vmem>>, vector<1x64xf32>
    %197 = vector.broadcast %196 : vector<1x64xf32> to vector<24x64xf32>
    %198 = arith.addf %195, %197 : vector<24x64xf32>
    %cst_150 = arith.constant 0.000000e+00 : f32
    %199 = vector.broadcast %cst_150 : f32 to vector<24x64xf32>
    %200 = arith.maximumf %198, %199 : vector<24x64xf32>
    %201 = vector.extract_strided_slice %200 {offsets = [0, 0], sizes = [4, 64], strides = [1, 1]} : vector<24x64xf32> to vector<4x64xf32>
    %202 = vector.extract_strided_slice %200 {offsets = [6, 0], sizes = [4, 64], strides = [1, 1]} : vector<24x64xf32> to vector<4x64xf32>
    %203 = arith.maximumf %201, %202 : vector<4x64xf32>
    %c0_151 = arith.constant 0 : index
    %c0_152 = arith.constant 0 : index
    %204 = vector.load %arg14[%c0_151, %c0_152] : memref<128x64xf32, #tpu.memory_space<vmem>>, vector<4x64xf32>
    tpu.vector_store %arg14[%c0_151, %c0_152], %203 {strides = array<i32>} : memref<128x64xf32, #tpu.memory_space<vmem>>, vector<4x64xf32>,
    %205 = vector.extract_strided_slice %200 {offsets = [12, 0], sizes = [4, 64], strides = [1, 1]} : vector<24x64xf32> to vector<4x64xf32>
    %206 = vector.extract_strided_slice %200 {offsets = [18, 0], sizes = [4, 64], strides = [1, 1]} : vector<24x64xf32> to vector<4x64xf32>
    %207 = arith.maximumf %205, %206 : vector<4x64xf32>
    %c4_153 = arith.constant 4 : index
    %c0_154 = arith.constant 0 : index
    %208 = vector.load %arg14[%c4_153, %c0_154] : memref<128x64xf32, #tpu.memory_space<vmem>>, vector<4x64xf32>
    tpu.vector_store %arg14[%c4_153, %c0_154], %207 {strides = array<i32>} : memref<128x64xf32, #tpu.memory_space<vmem>>, vector<4x64xf32>,
    %c0_155 = arith.constant 0 : index
    %c0_156 = arith.constant 0 : index
    %209 = tpu.strided_load %arg14[%c0_155, %c0_156] {strides = array<i32: 2, 1>} : memref<128x64xf32, #tpu.memory_space<vmem>>, vector<4x64xf32>
    %c1_157 = arith.constant 1 : index
    %c0_158 = arith.constant 0 : index
    %210 = tpu.strided_load %arg14[%c1_157, %c0_158] {strides = array<i32: 2, 1>} : memref<128x64xf32, #tpu.memory_space<vmem>>, vector<4x64xf32>
    %211 = arith.maximumf %209, %210 : vector<4x64xf32>
    %cst_159 = arith.constant 0.000000e+00 : bf16
    %212 = vector.broadcast %cst_159 : bf16 to vector<20x64xbf16>
    %c0_160 = arith.constant 0 : index
    %c0_161 = arith.constant 0 : index
    %213 = vector.load %arg15[%c0_160, %c0_161] : memref<110x64xbf16, #tpu.memory_space<vmem>>, vector<20x64xbf16>
    tpu.vector_store %arg15[%c0_160, %c0_161], %212 {strides = array<i32>} : memref<110x64xbf16, #tpu.memory_space<vmem>>, vector<20x64xbf16>,
    %214 = vector.extract_strided_slice %211 {offsets = [0, 0], sizes = [2, 64], strides = [1, 1]} : vector<4x64xf32> to vector<2x64xf32>
    %215 = arith.truncf %214 : vector<2x64xf32> to vector<2x64xbf16>
    %c5_162 = arith.constant 5 : index
    %c0_163 = arith.constant 0 : index
    %216 = vector.load %arg15[%c5_162, %c0_163] : memref<110x64xbf16, #tpu.memory_space<vmem>>, vector<2x64xbf16>
    tpu.vector_store %arg15[%c5_162, %c0_163], %215 {strides = array<i32>} : memref<110x64xbf16, #tpu.memory_space<vmem>>, vector<2x64xbf16>,
    %217 = vector.extract_strided_slice %211 {offsets = [2, 0], sizes = [2, 64], strides = [1, 1]} : vector<4x64xf32> to vector<2x64xf32>
    %218 = arith.truncf %217 : vector<2x64xf32> to vector<2x64xbf16>
    %c9 = arith.constant 9 : index
    %c0_164 = arith.constant 0 : index
    %219 = vector.load %arg15[%c9, %c0_164] : memref<110x64xbf16, #tpu.memory_space<vmem>>, vector<2x64xbf16>
    tpu.vector_store %arg15[%c9, %c0_164], %218 {strides = array<i32>} : memref<110x64xbf16, #tpu.memory_space<vmem>>, vector<2x64xbf16>,
    %c0_165 = arith.constant 0 : index
    %c0_166 = arith.constant 0 : index
    %220 = vector.load %arg15[%c0_165, %c0_166] : memref<110x64xbf16, #tpu.memory_space<vmem>>, vector<8x64xbf16>
    %c0_167 = arith.constant 0 : index
    %c0_168 = arith.constant 0 : index
    %c0_169 = arith.constant 0 : index
    %221 = vector.load %arg8[%c0_167, %c0_168, %c0_169] : memref<9x64x64xbf16, #tpu.memory_space<vmem>>, vector<1x64x64xbf16>
    %222 = vector.shape_cast %221 : vector<1x64x64xbf16> to vector<64x64xbf16>
    %cst_170 = arith.constant dense<0.000000e+00> : vector<8x64xf32>
    %223 = tpu.matmul %220, %222, %cst_170 {dimension_numbers = #tpu.dot_dimension_numbers<[1], [0], [0], [1], [0, 0, 1, 1], [], []>} : vector<8x64xbf16>, vector<64x64xbf16>, vector<8x64xf32> -> vector<8x64xf32>
    %c1_171 = arith.constant 1 : index
    %c0_172 = arith.constant 0 : index
    %224 = vector.load %arg15[%c1_171, %c0_172] : memref<110x64xbf16, #tpu.memory_space<vmem>>, vector<8x64xbf16>
    %c1_173 = arith.constant 1 : index
    %c0_174 = arith.constant 0 : index
    %c0_175 = arith.constant 0 : index
    %225 = vector.load %arg8[%c1_173, %c0_174, %c0_175] : memref<9x64x64xbf16, #tpu.memory_space<vmem>>, vector<1x64x64xbf16>
    %226 = vector.shape_cast %225 : vector<1x64x64xbf16> to vector<64x64xbf16>
    %cst_176 = arith.constant dense<0.000000e+00> : vector<8x64xf32>
    %227 = tpu.matmul %224, %226, %cst_176 {dimension_numbers = #tpu.dot_dimension_numbers<[1], [0], [0], [1], [0, 0, 1, 1], [], []>} : vector<8x64xbf16>, vector<64x64xbf16>, vector<8x64xf32> -> vector<8x64xf32>
    %228 = arith.addf %223, %227 : vector<8x64xf32>
    %c2_177 = arith.constant 2 : index
    %c0_178 = arith.constant 0 : index
    %229 = vector.load %arg15[%c2_177, %c0_178] : memref<110x64xbf16, #tpu.memory_space<vmem>>, vector<8x64xbf16>
    %c2_179 = arith.constant 2 : index
    %c0_180 = arith.constant 0 : index
    %c0_181 = arith.constant 0 : index
    %230 = vector.load %arg8[%c2_179, %c0_180, %c0_181] : memref<9x64x64xbf16, #tpu.memory_space<vmem>>, vector<1x64x64xbf16>
    %231 = vector.shape_cast %230 : vector<1x64x64xbf16> to vector<64x64xbf16>
    %cst_182 = arith.constant dense<0.000000e+00> : vector<8x64xf32>
    %232 = tpu.matmul %229, %231, %cst_182 {dimension_numbers = #tpu.dot_dimension_numbers<[1], [0], [0], [1], [0, 0, 1, 1], [], []>} : vector<8x64xbf16>, vector<64x64xbf16>, vector<8x64xf32> -> vector<8x64xf32>
    %233 = arith.addf %228, %232 : vector<8x64xf32>
    %c4_183 = arith.constant 4 : index
    %c0_184 = arith.constant 0 : index
    %234 = vector.load %arg15[%c4_183, %c0_184] : memref<110x64xbf16, #tpu.memory_space<vmem>>, vector<8x64xbf16>
    %c3_185 = arith.constant 3 : index
    %c0_186 = arith.constant 0 : index
    %c0_187 = arith.constant 0 : index
    %235 = vector.load %arg8[%c3_185, %c0_186, %c0_187] : memref<9x64x64xbf16, #tpu.memory_space<vmem>>, vector<1x64x64xbf16>
    %236 = vector.shape_cast %235 : vector<1x64x64xbf16> to vector<64x64xbf16>
    %cst_188 = arith.constant dense<0.000000e+00> : vector<8x64xf32>
    %237 = tpu.matmul %234, %236, %cst_188 {dimension_numbers = #tpu.dot_dimension_numbers<[1], [0], [0], [1], [0, 0, 1, 1], [], []>} : vector<8x64xbf16>, vector<64x64xbf16>, vector<8x64xf32> -> vector<8x64xf32>
    %238 = arith.addf %233, %237 : vector<8x64xf32>
    %c5_189 = arith.constant 5 : index
    %c0_190 = arith.constant 0 : index
    %239 = vector.load %arg15[%c5_189, %c0_190] : memref<110x64xbf16, #tpu.memory_space<vmem>>, vector<8x64xbf16>
    %c4_191 = arith.constant 4 : index
    %c0_192 = arith.constant 0 : index
    %c0_193 = arith.constant 0 : index
    %240 = vector.load %arg8[%c4_191, %c0_192, %c0_193] : memref<9x64x64xbf16, #tpu.memory_space<vmem>>, vector<1x64x64xbf16>
    %241 = vector.shape_cast %240 : vector<1x64x64xbf16> to vector<64x64xbf16>
    %cst_194 = arith.constant dense<0.000000e+00> : vector<8x64xf32>
    %242 = tpu.matmul %239, %241, %cst_194 {dimension_numbers = #tpu.dot_dimension_numbers<[1], [0], [0], [1], [0, 0, 1, 1], [], []>} : vector<8x64xbf16>, vector<64x64xbf16>, vector<8x64xf32> -> vector<8x64xf32>
    %243 = arith.addf %238, %242 : vector<8x64xf32>
    %c6_195 = arith.constant 6 : index
    %c0_196 = arith.constant 0 : index
    %244 = vector.load %arg15[%c6_195, %c0_196] : memref<110x64xbf16, #tpu.memory_space<vmem>>, vector<8x64xbf16>
    %c5_197 = arith.constant 5 : index
    %c0_198 = arith.constant 0 : index
    %c0_199 = arith.constant 0 : index
    %245 = vector.load %arg8[%c5_197, %c0_198, %c0_199] : memref<9x64x64xbf16, #tpu.memory_space<vmem>>, vector<1x64x64xbf16>
    %246 = vector.shape_cast %245 : vector<1x64x64xbf16> to vector<64x64xbf16>
    %cst_200 = arith.constant dense<0.000000e+00> : vector<8x64xf32>
    %247 = tpu.matmul %244, %246, %cst_200 {dimension_numbers = #tpu.dot_dimension_numbers<[1], [0], [0], [1], [0, 0, 1, 1], [], []>} : vector<8x64xbf16>, vector<64x64xbf16>, vector<8x64xf32> -> vector<8x64xf32>
    %248 = arith.addf %243, %247 : vector<8x64xf32>
    %c8_201 = arith.constant 8 : index
    %c0_202 = arith.constant 0 : index
    %249 = vector.load %arg15[%c8_201, %c0_202] : memref<110x64xbf16, #tpu.memory_space<vmem>>, vector<8x64xbf16>
    %c6_203 = arith.constant 6 : index
    %c0_204 = arith.constant 0 : index
    %c0_205 = arith.constant 0 : index
    %250 = vector.load %arg8[%c6_203, %c0_204, %c0_205] : memref<9x64x64xbf16, #tpu.memory_space<vmem>>, vector<1x64x64xbf16>
    %251 = vector.shape_cast %250 : vector<1x64x64xbf16> to vector<64x64xbf16>
    %cst_206 = arith.constant dense<0.000000e+00> : vector<8x64xf32>
    %252 = tpu.matmul %249, %251, %cst_206 {dimension_numbers = #tpu.dot_dimension_numbers<[1], [0], [0], [1], [0, 0, 1, 1], [], []>} : vector<8x64xbf16>, vector<64x64xbf16>, vector<8x64xf32> -> vector<8x64xf32>
    %253 = arith.addf %248, %252 : vector<8x64xf32>
    %c9_207 = arith.constant 9 : index
    %c0_208 = arith.constant 0 : index
    %254 = vector.load %arg15[%c9_207, %c0_208] : memref<110x64xbf16, #tpu.memory_space<vmem>>, vector<8x64xbf16>
    %c7_209 = arith.constant 7 : index
    %c0_210 = arith.constant 0 : index
    %c0_211 = arith.constant 0 : index
    %255 = vector.load %arg8[%c7_209, %c0_210, %c0_211] : memref<9x64x64xbf16, #tpu.memory_space<vmem>>, vector<1x64x64xbf16>
    %256 = vector.shape_cast %255 : vector<1x64x64xbf16> to vector<64x64xbf16>
    %cst_212 = arith.constant dense<0.000000e+00> : vector<8x64xf32>
    %257 = tpu.matmul %254, %256, %cst_212 {dimension_numbers = #tpu.dot_dimension_numbers<[1], [0], [0], [1], [0, 0, 1, 1], [], []>} : vector<8x64xbf16>, vector<64x64xbf16>, vector<8x64xf32> -> vector<8x64xf32>
    %258 = arith.addf %253, %257 : vector<8x64xf32>
    %c10_213 = arith.constant 10 : index
    %c0_214 = arith.constant 0 : index
    %259 = vector.load %arg15[%c10_213, %c0_214] : memref<110x64xbf16, #tpu.memory_space<vmem>>, vector<8x64xbf16>
    %c8_215 = arith.constant 8 : index
    %c0_216 = arith.constant 0 : index
    %c0_217 = arith.constant 0 : index
    %260 = vector.load %arg8[%c8_215, %c0_216, %c0_217] : memref<9x64x64xbf16, #tpu.memory_space<vmem>>, vector<1x64x64xbf16>
    %261 = vector.shape_cast %260 : vector<1x64x64xbf16> to vector<64x64xbf16>
    %cst_218 = arith.constant dense<0.000000e+00> : vector<8x64xf32>
    %262 = tpu.matmul %259, %261, %cst_218 {dimension_numbers = #tpu.dot_dimension_numbers<[1], [0], [0], [1], [0, 0, 1, 1], [], []>} : vector<8x64xbf16>, vector<64x64xbf16>, vector<8x64xf32> -> vector<8x64xf32>
    %263 = arith.addf %258, %262 : vector<8x64xf32>
    %c0_219 = arith.constant 0 : index
    %c0_220 = arith.constant 0 : index
    %264 = vector.load %arg9[%c0_219, %c0_220] : memref<1x64xf32, #tpu.memory_space<vmem>>, vector<1x64xf32>
    %265 = vector.broadcast %264 : vector<1x64xf32> to vector<8x64xf32>
    %266 = arith.addf %263, %265 : vector<8x64xf32>
    %cst_221 = arith.constant 0.000000e+00 : f32
    %267 = vector.broadcast %cst_221 : f32 to vector<8x64xf32>
    %268 = arith.maximumf %266, %267 : vector<8x64xf32>
    %269 = vector.extract_strided_slice %268 {offsets = [0, 0], sizes = [2, 64], strides = [1, 1]} : vector<8x64xf32> to vector<2x64xf32>
    %270 = vector.extract_strided_slice %268 {offsets = [4, 0], sizes = [2, 64], strides = [1, 1]} : vector<8x64xf32> to vector<2x64xf32>
    %271 = arith.maximumf %269, %270 : vector<2x64xf32>
    %c0_222 = arith.constant 0 : index
    %c0_223 = arith.constant 0 : index
    %272 = vector.load %arg14[%c0_222, %c0_223] : memref<128x64xf32, #tpu.memory_space<vmem>>, vector<2x64xf32>
    tpu.vector_store %arg14[%c0_222, %c0_223], %271 {strides = array<i32>} : memref<128x64xf32, #tpu.memory_space<vmem>>, vector<2x64xf32>,
    %c0_224 = arith.constant 0 : index
    %c0_225 = arith.constant 0 : index
    %273 = tpu.strided_load %arg14[%c0_224, %c0_225] {strides = array<i32: 2, 1>} : memref<128x64xf32, #tpu.memory_space<vmem>>, vector<1x64xf32>
    %c1_226 = arith.constant 1 : index
    %c0_227 = arith.constant 0 : index
    %274 = tpu.strided_load %arg14[%c1_226, %c0_227] {strides = array<i32: 2, 1>} : memref<128x64xf32, #tpu.memory_space<vmem>>, vector<1x64xf32>
    %275 = arith.maximumf %273, %274 : vector<1x64xf32>
    %c0_228 = arith.constant 0 : index
    %c0_229 = arith.constant 0 : index
    %c0_230 = arith.constant 0 : index
    %276 = vector.load %arg12[%c0_228, %c0_229, %c0_230] : memref<1x1x64xf32, #tpu.memory_space<vmem>>, vector<1x1x64xf32>
    %277 = vector.shape_cast %276 : vector<1x1x64xf32> to vector<1x64xf32>
    %278 = vector.shape_cast %275 : vector<1x64xf32> to vector<1x1x64xf32>
    tpu.vector_store %arg12[%c0_228, %c0_229, %c0_230], %278 {strides = array<i32>} : memref<1x1x64xf32, #tpu.memory_space<vmem>>, vector<1x1x64xf32>,
    %c0_231 = arith.constant 0 : index
    %c0_232 = arith.constant 0 : index
    %279 = vector.load %arg10[%c0_231, %c0_232] : memref<64x128xf32, #tpu.memory_space<vmem>>, vector<64x128xf32>
    %cst_233 = arith.constant dense<0.000000e+00> : vector<1x128xf32>
    %280 = tpu.matmul %275, %279, %cst_233 {dimension_numbers = #tpu.dot_dimension_numbers<[1], [0], [0], [1], [0, 0, 1, 1], [], []>} : vector<1x64xf32>, vector<64x128xf32>, vector<1x128xf32> -> vector<1x128xf32>
    %c0_234 = arith.constant 0 : index
    %c0_235 = arith.constant 0 : index
    %281 = vector.load %arg11[%c0_234, %c0_235] : memref<1x128xf32, #tpu.memory_space<vmem>>, vector<1x128xf32>
    %282 = arith.addf %280, %281 : vector<1x128xf32>
    %c0_236 = arith.constant 0 : index
    %c0_237 = arith.constant 0 : index
    %c0_238 = arith.constant 0 : index
    %283 = vector.load %arg13[%c0_236, %c0_237, %c0_238] : memref<1x1x128xf32, #tpu.memory_space<vmem>>, vector<1x1x128xf32>
    %284 = vector.shape_cast %283 : vector<1x1x128xf32> to vector<1x128xf32>
    %285 = vector.shape_cast %282 : vector<1x128xf32> to vector<1x1x128xf32>
    tpu.vector_store %arg13[%c0_236, %c0_237, %c0_238], %285 {strides = array<i32>} : memref<1x1x128xf32, #tpu.memory_space<vmem>>, vector<1x1x128xf32>,
    return
  }
  func.func @transform_0(%arg0: i32) -> (i32, i32, i32) {
    %c0_i32 = arith.constant 0 : i32
    %c0_i32_0 = arith.constant 0 : i32
    %c0_i32_1 = arith.constant 0 : i32
    return %arg0, %c0_i32, %c0_i32_0 : i32, i32, i32
  }
  func.func @transform_1(%arg0: i32) -> (i32, i32) {
    %c0_i32 = arith.constant 0 : i32
    %c0_i32_0 = arith.constant 0 : i32
    %c0_i32_1 = arith.constant 0 : i32
    return %c0_i32, %c0_i32_0 : i32, i32
  }
  func.func @transform_2(%arg0: i32) -> (i32, i32) {
    %c0_i32 = arith.constant 0 : i32
    %c0_i32_0 = arith.constant 0 : i32
    %c0_i32_1 = arith.constant 0 : i32
    return %c0_i32, %c0_i32_0 : i32, i32
  }
  func.func @transform_3(%arg0: i32) -> (i32, i32, i32) {
    %c0_i32 = arith.constant 0 : i32
    %c0_i32_0 = arith.constant 0 : i32
    %c0_i32_1 = arith.constant 0 : i32
    %c0_i32_2 = arith.constant 0 : i32
    return %c0_i32, %c0_i32_0, %c0_i32_1 : i32, i32, i32
  }
  func.func @transform_4(%arg0: i32) -> (i32, i32) {
    %c0_i32 = arith.constant 0 : i32
    %c0_i32_0 = arith.constant 0 : i32
    %c0_i32_1 = arith.constant 0 : i32
    return %c0_i32, %c0_i32_0 : i32, i32
  }
  func.func @transform_5(%arg0: i32) -> (i32, i32, i32) {
    %c0_i32 = arith.constant 0 : i32
    %c0_i32_0 = arith.constant 0 : i32
    %c0_i32_1 = arith.constant 0 : i32
    %c0_i32_2 = arith.constant 0 : i32
    return %c0_i32, %c0_i32_0, %c0_i32_1 : i32, i32, i32
  }
  func.func @transform_6(%arg0: i32) -> (i32, i32) {
    %c0_i32 = arith.constant 0 : i32
    %c0_i32_0 = arith.constant 0 : i32
    %c0_i32_1 = arith.constant 0 : i32
    return %c0_i32, %c0_i32_0 : i32, i32
  }
  func.func @transform_7(%arg0: i32) -> (i32, i32, i32) {
    %c0_i32 = arith.constant 0 : i32
    %c0_i32_0 = arith.constant 0 : i32
    %c0_i32_1 = arith.constant 0 : i32
    %c0_i32_2 = arith.constant 0 : i32
    return %c0_i32, %c0_i32_0, %c0_i32_1 : i32, i32, i32
  }
  func.func @transform_8(%arg0: i32) -> (i32, i32) {
    %c0_i32 = arith.constant 0 : i32
    %c0_i32_0 = arith.constant 0 : i32
    %c0_i32_1 = arith.constant 0 : i32
    return %c0_i32, %c0_i32_0 : i32, i32
  }
  func.func @transform_9(%arg0: i32) -> (i32, i32) {
    %c0_i32 = arith.constant 0 : i32
    %c0_i32_0 = arith.constant 0 : i32
    %c0_i32_1 = arith.constant 0 : i32
    return %c0_i32, %c0_i32_0 : i32, i32
  }
  func.func @transform_10(%arg0: i32) -> (i32, i32) {
    %c0_i32 = arith.constant 0 : i32
    %c0_i32_0 = arith.constant 0 : i32
    %c0_i32_1 = arith.constant 0 : i32
    return %c0_i32, %c0_i32_0 : i32, i32
  }
  func.func @transform_11(%arg0: i32) -> (i32, i32, i32) {
    %c0_i32 = arith.constant 0 : i32
    %c0_i32_0 = arith.constant 0 : i32
    %c0_i32_1 = arith.constant 0 : i32
    return %arg0, %c0_i32, %c0_i32_0 : i32, i32, i32
  }
  func.func @transform_12(%arg0: i32) -> (i32, i32, i32) {
    %c0_i32 = arith.constant 0 : i32
    %c0_i32_0 = arith.constant 0 : i32
    %c0_i32_1 = arith.constant 0 : i32
    return %arg0, %c0_i32, %c0_i32_0 : i32, i32, i32
  }
}

</mosaic_0001>

<bundles_post_ra>
// kernel: basenet_forward.1
= control target key start
LH: loop header
LB: loop body
LE: loop exit
PB: predicated region body
PF: predicated region fallthrough
CT: control target
= control target key end

     0   :  { %s5956_s0 = inlined_call_operand.vmem [shape: bf16[2,256,27], index: 0, kind: input, shape index: {}]   ;;  %s5957_s1 = inlined_call_operand.vmem [shape: bf16[27,64], index: 1, kind: input, shape index: {}]   ;;  %s5958_s2 = inlined_call_operand.vmem [shape: f32[1,64], index: 2, kind: input, shape index: {}]   ;;  %s5959_s3 = inlined_call_operand.vmem [shape: bf16[9,64,64], index: 3, kind: input, shape index: {}]   ;;  %s5960_s4 = inlined_call_operand.vmem [shape: f32[1,64], index: 4, kind: input, shape index: {}]   ;;  %s5961_s5 = inlined_call_operand.vmem [shape: bf16[9,64,64], index: 5, kind: input, shape index: {}]   ;;  %s5962_s6 = inlined_call_operand.vmem [shape: f32[1,64], index: 6, kind: input, shape index: {}]   ;;  %s5963_s7 = inlined_call_operand.vmem [shape: bf16[9,64,64], index: 7, kind: input, shape index: {}]   ;;  %s5964_s8 = inlined_call_operand.vmem [shape: f32[1,64], index: 8, kind: input, shape index: {}]   ;;  %s5965_s9 = inlined_call_operand.vmem [shape: f32[64,128], index: 9, kind: input, shape index: {}]   ;;  %s5966_s10 = inlined_call_operand.vmem [shape: f32[1,128], index: 10, kind: input, shape index: {}]   ;;  %s5967_s11 = inlined_call_operand.hbm [shape: f32[2,1,64], index: 11, kind: output, shape index: {0}]   ;;  %s5968_s12 = inlined_call_operand.hbm [shape: f32[2,1,128], index: 12, kind: output, shape index: {1}]  }
   0x1   :  { %5974 = sst [smem:[#allocation10_spill]] %s5956_s0 }
   0x2   :  { %5975 = sst [smem:[#allocation11_spill]] %s5957_s1 }
   0x3   :  { %5976 = sst [smem:[#allocation12_spill]] %s5958_s2 }
   0x4   :  { %5977 = sst [smem:[#allocation13_spill]] %s5959_s3 }
   0x5   :  { %5978 = sst [smem:[#allocation14_spill]] %s5960_s4 }
   0x6   :  { %5979 = sst [smem:[#allocation15_spill]] %s5961_s5 }
   0x7   :  { %18 = vsyncpa [#allocation5], 0 }
   0x8   :  { %20 = vsyncpa [#allocation5 + $0x1], 0 }
   0x9   :  { %21 = vsyncpa [#allocation7], 0 }
   0xa   :  { %23 = vsyncpa [#allocation7 + $0x1], 0  ;;  %s4849_s21 = smov 0   ;;  %s4851_s22 = smov 0  }
   0xb   :  { %s4853_s23 = smov 0   ;;  %s4855_s24 = smov 0  }
   0xc LB: > { %s4870_s25 = sadd.s32 4294967295, %s4780_s24   ;;  %s3640_s26 = sadd.s32 4294967294, %s4780_s24   ;;  %s4780_s24 = sphi %s4855_s24, %s6019_s24   ;;  %s4776_s23 = sphi %s4853_s23, %s6018_s23   ;;  %s4772_s22 = sphi %s4851_s22, %s6017_s22   ;;  %s4768_s21 = sphi %s4849_s21, %s6016_s21  }
   0xd   : > { %s4874_s27 = sadd.s32 1, %s4780_s24   ;;  %s272_s28 = sadd.s32 1, %s4776_s23 }
   0xe   : > { %s269_s29 = ssub.s32 %s4780_s24, %s4874_s27  ;;  %p282_p0 = scmp.ne.s32.totalorder %s4776_s23, %s4772_s22 }
   0xf   : > { %p270_p1 = scmp.eq.s32.totalorder %s269_s29, 0  ;;  %p283_p2 = scmp.eq.s32.totalorder %s4870_s25, 1 }
  0x10   : > { %p288_p3 = scmp.ne.s32.totalorder %s4772_s22, %s4768_s21  ;;  %p289_p4 = scmp.eq.s32.totalorder %s3640_s26, 1 }
  0x11   : > { %s4885_s30 = scalar_select %p270_p1, %s4776_s23, %s272_s28  }
  0x12   : > { %p4887_p5 = por %p283_p2, %p282_p0  ;;  %p4891_p6 = por %p289_p4, %p288_p3 }
  0x13   : > { %p3643_p7 = scmp.ge.s32.totalorder %s4780_s24, 1  ;;  %p371_p8 = scmp.lt.s32.totalorder %s4780_s24, 3 }
  0x15   : > { %p372_p9 = pnand %p3643_p7, %p371_p8 }
  0x16   : > { %s5982_s1 = sld [smem:[#allocation11_spill]] (!%p372_p9)  ;;  %p416_p10 = scmp.lt.s32.totalorder (!%p372_p9), %s4870_s25, 1 }
  0x17   : > { %375 = sbr.rel (%p372_p9) target bundleno = 1376 (0x560), region = 64  ;;  %s5983_s0 = sld [smem:[#allocation10_spill]] (!%p372_p9) }
  0x18   : > { %s5984_s3 = sld [smem:[#allocation13_spill]] (!%p372_p9)  ;;  %s5900_s28 = sand.u32 (!%p372_p9), 1, %s4772_s22  }
  0x19   : > { %s5985_s2 = sld [smem:[#allocation12_spill]] (!%p372_p9)  ;;  %s409_s29 = scalar_lea.vmem (!%p372_p9), [#allocation4], %s5900_s28 }
  0x1a   : > { %s6002_s5 = sld [smem:[#allocation15_spill]] (!%p372_p9)  ;;  %s3540_s18 = scalar_lea.hbm (!%p372_p9), %s5967_s11, %s4870_s25 }
  0x1b   : > { %s6008_s4 = sld [smem:[#allocation14_spill]] (!%p372_p9) }
  0x1c   : > { %v3716_v0 = vld [vmem:[%s5982_s1 + $0x8] sm:$0xf]  ;;  %v4499_v1 = vld [vmem:[%s5982_s1 + $0x8] sm:$0x30]  ;;  %vm5973_vm0 = vcmask 1044480   ;;  %vm603_vm1 = vcmask 1045504  }
  0x1d   : > { %v3717_v2 = vor.u32 %v4499_v1, %v3716_v0  ;;  %v4782_v3 = vmov 65535   ;;  %s417_s19 = scalar_select %p416_p10, %s4870_s25, 1  ;;  %v4498_v7 = vld [vmem:[%s5982_s1] sm:$0xff]  ;;  %vm553_vm2 = vcmask 220160   ;;  %vm802_vm3 = vcmask 519168  }
  0x1e   : > { %v604_v4 = vsel %vm5973_vm0, 4294967295, %v4782_v3  ;;  %v4783_v19 = vmov 0   ;;  %v4507_v20 = vld [vmem:[%s5984_s3 + $0x18] sm:$0xff]  ;;  %v4506_v22 = vld [vmem:[%s5984_s3 + $0x10] sm:$0xff]  ;;  %v4505_v27 = vld [vmem:[%s5984_s3 + $0x8] sm:$0xff]  ;;  %vm732_vm4 = vcmask 523264  }
  0x1f   : > { %v605_v5 = vsel %vm603_vm1, %v604_v4, 0  ;;  %s4481_s20 = sshll.u32 %s417_s19, 7  ;;  %804 = vst.msk [vmem:[#allocation3 + $0x4] sm:$0xf] %vm802_vm3, %v4783_v19  ;;  %v4945_v21 = vld [vmem:[%s5985_s2] ss:$0 sm:$0xff]  ;;  %1195 = vmatpush.bf16.msra.mxu2 %v4507_v20 }
  0x20   : > { %v607_v6 = vand.u32 %v3717_v2, %v605_v5  ;;  %s4913_s16 = scalar_lea.vmem %s5983_s0, %s4481_s20  ;;  %803 = vst.msk [vmem:[#allocation3] sm:$0xf] %vm802_vm3, %v4783_v19  ;;  %v4504_v31 = vld [vmem:[%s5984_s3] sm:$0xff]  ;;  %vm5972_vm5 = vcmask 519169   ;;  %vm831_vm6 = vsmask.f32 7942 }
  0x21   : > { %v4482_v8 = vld [vmem:[%s4913_s16] sm:$0xff]  ;;  %v4483_v9 = vld [vmem:[%s4913_s16 + $0x8] sm:$0xff]  ;;  %v4484_v10 = vld [vmem:[%s4913_s16 + $0x10] sm:$0xff]  ;;  %805 = vst.msk [vmem:[#allocation3 + $0x8] sm:$0xf] %vm802_vm3, %v4783_v19  ;;  %vm5970_vm7 = vcmask 517120  }
  0x22   : > { %615 = vmatpush.bf16.msra.mxu0 %v607_v6  ;;  %v4485_v11 = vld [vmem:[%s4913_s16 + $0x18] sm:$0xff]  ;;  %v4486_v12 = vld [vmem:[%s4913_s16 + $0x20] sm:$0xff]  ;;  %v4487_v13 = vld [vmem:[%s4913_s16 + $0x28] sm:$0xff]  ;;  %806 = vst.msk [vmem:[#allocation3 + $0xc] sm:$0xf] %vm802_vm3, %v4783_v19  ;;  %vm5971_vm11 = vcmask 518144  }
  0x23   : > { %v4488_v14 = vld [vmem:[%s4913_s16 + $0x30] sm:$0xff]  ;;  %v4489_v15 = vld [vmem:[%s4913_s16 + $0x38] sm:$0xff]  ;;  %v4490_v16 = vld [vmem:[%s4913_s16 + $0x40] sm:$0xff]  ;;  %807 = vst.msk [vmem:[#allocation3 + $0x10] sm:$0xf] %vm802_vm3, %v4783_v19  ;;  %1196 = vmatpush.bf16.msra.mxu2 %v4506_v22  ;;  %vm5969_vm12 = vcmask 519170  }
  0x24   : > { %808 = vst.msk [vmem:[#allocation3 + $0x14] sm:$0xf] %vm802_vm3, %v4783_v19  ;;  %v4491_v24 = vld [vmem:[%s4913_s16 + $0x48] sm:$0xff]  ;;  %v4492_v38 = vld [vmem:[%s4913_s16 + $0x50] sm:$0xff]  ;;  %vm837_vm8 = vsmask.f32 1280  ;;  %vm4987_vm9 = vmand %vm5972_vm5, %vm831_vm6 }
  0x25   : > { %809 = vst.msk [vmem:[#allocation3 + $0x18] sm:$0xf] %vm802_vm3, %v4783_v19  ;;  %v4493_v53 = vld [vmem:[%s4913_s16 + $0x58] sm:$0xff]  ;;  %vm4994_vm10 = vmand %vm5970_vm7, %vm837_vm8  ;;  %vm855_vm13 = vsmask.f32 7946  ;;  %vm878_vm8 = vcmask 519171  }
  0x26   : > { %616 = vmatpush.bf16.msra.mxu0 %v4498_v7  ;;  %810 = vst.msk [vmem:[#allocation3 + $0x1c] sm:$0xf] %vm802_vm3, %v4783_v19  ;;  %v833_v50 = vld [vmem:[#allocation3 + $0x4] sm:$0xe]  ;;  %v4515_v22 = vld [vmem:[%s5984_s3 + $0x58] sm:$0xff]  ;;  %vm5033_vm15 = vmand %vm5969_vm12, %vm855_vm13  ;;  %s3544_s0 = sshll.u32 %s3540_s18, 4  ;;  %s3545_s0 = int_to_ptr.hbm [resolvable:$true] %s3544_s0 }
  0x27   : > { %811 = vst.msk [vmem:[#allocation3 + $0x20] sm:$0xf] %vm802_vm3, %v4783_v19  ;;  %1197 = vmatpush.bf16.msra.mxu2 %v4505_v27  ;;  %v5011_v5 = vld [vmem:[#allocation3] sm:$0xe]  ;;  %1293 = vmatpush.bf16.msra.mxu3 %v4515_v22  ;;  %vm861_vm14 = vsmask.f32 2304 }
  0x28   : > { %812 = vst.msk [vmem:[#allocation3 + $0x24] sm:$0xf] %vm802_vm3, %v4783_v19  ;;  %v839_v56 = vld [vmem:[#allocation3 + $0x8] sm:$0x3]  ;;  %v857_v27 = vld [vmem:[#allocation3 + $0x8] sm:$0xc]  ;;  %vm5043_vm6 = vmand %vm5971_vm11, %vm861_vm14 }
  0x29   : > { %3718 = vmatmul.msk.bf16.vlgmr.msra.gmra.mxu0 %vm553_vm2, %v4482_v8  ;;  %813 = vst.msk [vmem:[#allocation3 + $0x28] sm:$0xf] %vm802_vm3, %v4783_v19  ;;  %vm879_vm13 = vsmask.f32 7950  ;;  %vm885_vm12 = vsmask.f32 3328 }
  0x2a   : > { %814 = vst.msk [vmem:[#allocation3 + $0x2c] sm:$0xf] %vm802_vm3, %v4783_v19  ;;  %vm5074_vm14 = vmand %vm878_vm8, %vm879_vm13  ;;  %vm901_vm8 = vsmask.f32 7938  ;;  %vm906_vm13 = vcmask 516096   ;;  %v4553_v55 = vld [vmem:[%s6002_s5 + $0x28] sm:$0xff] }
  0x2b   : > { %815 = vst.msk [vmem:[#allocation3 + $0x30] sm:$0xf] %vm802_vm3, %v4783_v19  ;;  %1198 = vmatpush.bf16.msra.mxu2 %v4504_v31  ;;  %v4514_v31 = vld [vmem:[%s5984_s3 + $0x50] sm:$0xff]  ;;  %vm5083_vm7 = vmand %vm802_vm3, %vm885_vm12  ;;  %vm1039_vm12 = vsmask.f32 7424  ;;  %s3528_s19 = scalar_lea.sflag [#allocation5], %s5900_s28 }
  0x2c   : > { %1294 = vmatpush.bf16.msra.mxu3 %v4514_v31  ;;  %vm907_vm11 = vsmask.f32 256  ;;  %vm5124_vm5 = vmand %vm802_vm3, %vm901_vm8  ;;  %s4700_s20 = sshra.s32 %s3545_s0, 4  ;;  %s4701_s20 = int_to_ptr.hbm [resolvable:$true] %s4700_s20 }
  0x2d   : > { %vm5129_vm0 = vmand %vm906_vm13, %vm907_vm11  ;;  %s4702_s26 = scalar_lea.hbm %s4701_s20, 1  ;;  %p4707_p0 = scmp.lt.s32.totalorder %s4701_s20, %s5967_s11 }
  0x2e   : > { %p4703_p11 = scmp.ne.s32.totalorder %s4701_s20, %s4702_s26 }
  0x30   : > { %p4704_p12 = pnand %p4703_p11, %p4887_p5 }
  0x32   : > { %p4705_p13 = pneg %p4704_p12 }
  0x39   : > { %3719 = vmatmul.msk.bf16.gmra.mxu0 %vm553_vm2, %v4483_v9 }
  0x49   : > { %3720 = vmatmul.msk.bf16.gmra.mxu0 %vm553_vm2, %v4484_v10 }
  0x59   : > { %3721 = vmatmul.msk.bf16.gmra.mxu0 %vm553_vm2, %v4485_v11  ;;  %v4494_v11 = vld [vmem:[%s4913_s16 + $0x60] sm:$0xff] }
  0x69   : > { %3722 = vmatmul.msk.bf16.gmra.mxu0 %vm553_vm2, %v4486_v12 }
  0x79   : > { %3723 = vmatmul.msk.bf16.gmra.mxu0 %vm553_vm2, %v4487_v13 }
  0x89   : > { %3724 = vmatmul.msk.bf16.gmra.mxu0 %vm553_vm2, %v4488_v14 }
  0x99   : > { %3725 = vmatmul.msk.bf16.gmra.mxu0 %vm553_vm2, %v4489_v15 }
  0xa6   : > { %v618_v17 = vpop.f32.mrf.mxu0 }
  0xa7   : > { %v619_v23 = vadd.f32 %v4945_v21, %v618_v17 }
  0xa9   : > { %3726 = vmatmul.msk.bf16.gmra.mxu0 %vm553_vm2, %v4490_v16  ;;  %v698_v28 = vmax.f32 %v619_v23, 0.0 }
  0xae   : > { %v620_v18 = vpop.f32.mrf.mxu0 }
  0xaf   : > { %v621_v32 = vadd.f32 %v4945_v21, %v620_v18 }
  0xb1   : > { %v699_v35 = vmax.f32 %v621_v32, 0.0 }
  0xb6   : > { %v623_v25 = vpop.f32.mrf.mxu0 }
  0xb7   : > { %v624_v26 = vadd.f32 %v4945_v21, %v623_v25  ;;  %v4511_v25 = vld [vmem:[%s5984_s3 + $0x38] sm:$0xff] }
  0xb8   : > { %1127 = vmatpush.bf16.msra.mxu1 %v4511_v25 }
  0xb9   : > { %v700_v29 = vmax.f32 %v624_v26, 0.0  ;;  %3727 = vmatmul.msk.bf16.gmra.mxu0 %vm553_vm2, %v4491_v24 }
  0xbb   : > { %v730_v30 = vmax.f32 %v698_v28, %v700_v29 }
  0xbd   : > { %733 = vst.msk [vmem:[#allocation2] sm:$0xff] %vm732_vm4, %v730_v30  ;;  %v4495_v30 = vld [vmem:[%s4913_s16 + $0x68] sm:$0xff] }
  0xbe   : > { %v625_v33 = vpop.f32.mrf.mxu0 }
  0xbf   : > { %v626_v34 = vadd.f32 %v4945_v21, %v625_v33  ;;  %v4522_v33 = vld [vmem:[%s5984_s3 + $0x70] sm:$0xff] }
  0xc1   : > { %v701_v36 = vmax.f32 %v626_v34, 0.0  ;;  %v863_v34 = vld [vmem:[#allocation3 + $0xc] sm:$0x7] }
  0xc3   : > { %v731_v37 = vmax.f32 %v699_v35, %v701_v36  ;;  %v4510_v36 = vld [vmem:[%s5984_s3 + $0x30] sm:$0xff] }
  0xc4   : > { %1128 = vmatpush.bf16.msra.mxu1 %v4510_v36 }
  0xc5   : > { %734 = vst.msk [vmem:[#allocation2 + $0x8] sm:$0xff] %vm732_vm4, %v731_v37 }
  0xc6   : > { %v628_v39 = vpop.f32.mrf.mxu0 }
  0xc7   : > { %v629_v52 = vadd.f32 %v4945_v21, %v628_v39 }
  0xc9   : > { %3728 = vmatmul.msk.bf16.gmra.mxu0 %vm553_vm2, %v4492_v38  ;;  %v702_v60 = vmax.f32 %v629_v52, 0.0 }
  0xcc   : > { %v763_v40 = vld [vmem:[#allocation2] ss:$2 sm:$0xff]  ;;  %v779_v41 = vld [vmem:[#allocation2 + $0x1] ss:$2 sm:$0xff] }
  0xcd   : > { %v794_v42 = vmax.f32 %v763_v40, %v779_v41  ;;  %v4513_v41 = vld [vmem:[%s5984_s3 + $0x48] sm:$0xff] }
  0xce   : > { %v630_v43 = vpop.f32.mrf.mxu0  ;;  %1295 = vmatpush.bf16.msra.mxu3 %v4513_v41 }
  0xcf   : > { %v818_v44 = vpack.c.bf16 %v794_v42, %v794_v42  ;;  %v631_v0 = vadd.f32 %v4945_v21, %v630_v43 }
  0xd1   : > { %v820_v45 = vshrl.u32 %v818_v44, 16  ;;  %v823_v46 = vshll.u32 %v818_v44, 16  ;;  %v703_v8 = vmax.f32 %v631_v0, 0.0  ;;  %v4509_v44 = vld [vmem:[%s5984_s3 + $0x28] sm:$0xff] }
  0xd2   : > { %1129 = vmatpush.bf16.msra.mxu1 %v4509_v44 }
  0xd3   : > { %v822_v47 = vrot.slane %v820_v45, 6  ;;  %v825_v48 = vrot.slane %v823_v46, 7  ;;  %v4512_v46 = vld [vmem:[%s5984_s3 + $0x40] sm:$0xff] }
  0xd4   : > { %1296 = vmatpush.bf16.msra.mxu3 %v4512_v46 }
  0xd5   : > { %v826_v51 = vor.u32 %v825_v48, %v822_v47 }
  0xd6   : > { %v633_v54 = vpop.f32.mrf.mxu0 }
  0xd7   : > { %v834_v57 = vsel %vm4987_vm9, %v826_v51, %v833_v50  ;;  %v634_v58 = vadd.f32 %v4945_v21, %v633_v54  ;;  %v827_v59 = vrot.slane %v826_v51, 4  ;;  %v4508_v50 = vld [vmem:[%s5984_s3 + $0x20] sm:$0xff]  ;;  %v4496_v54 = vld [vmem:[%s4913_s16 + $0x70] sm:$0xff] }
  0xd8   : > { %835 = vst [vmem:[#allocation3 + $0x4] sm:$0xe] %v834_v57  ;;  %1130 = vmatpush.bf16.msra.mxu1 %v4508_v50 }
  0xd9   : > { %v704_v61 = vmax.f32 %v634_v58, 0.0  ;;  %3729 = vmatmul.msk.bf16.gmra.mxu0 %vm553_vm2, %v4493_v53  ;;  %v840_v62 = vsel %vm4994_vm10, %v827_v59, %v839_v56 }
  0xda   : > { %841 = vst [vmem:[#allocation3 + $0x8] sm:$0x3] %v840_v62 }
  0xdb   : > { %v735_v63 = vmax.f32 %v702_v60, %v704_v61 }
  0xdd   : > { %737 = vst.msk [vmem:[#allocation2 + $0x10] sm:$0xff] %vm732_vm4, %v735_v63 }
  0xde   : > { %v635_v1 = vpop.f32.mrf.mxu0 }
  0xdf   : > { %v636_v2 = vadd.f32 %v4945_v21, %v635_v1  ;;  %v5007_v3 = vld [vmem:[#allocation3] sm:$0xff]   ;;  %v881_v1 = vld [vmem:[#allocation3 + $0xc] sm:$0x8] }
  0xe0   : > { %v5009_v4 = vld [vmem:[#allocation3] sm:$0xf0]  ;;  %3795 = vmatmul.msk.bf16.vlgmr.msra.gmra.mxu2 %vm732_vm4, %v5007_v3  ;;  %2202 = vst.msk [vmem:[#allocation3] sm:$0xf] %vm802_vm3, %v4783_v19 }
  0xe1   : > { %v5017_v6 = vld [vmem:[#allocation3 + $0x4] sm:$0xe]  ;;  %v705_v9 = vmax.f32 %v636_v2, 0.0  ;;  %v4634_v25 = vor.u32 %v5011_v5, %v5009_v4 }
  0xe2   : > { %v5019_v7 = vld [vmem:[#allocation3 + $0x4] sm:$0xc] }
  0xe3   : > { %2203 = vst.msk [vmem:[#allocation3 + $0x4] sm:$0xf] %vm802_vm3, %v4783_v19  ;;  %v736_v10 = vmax.f32 %v703_v8, %v705_v9  ;;  %v1239_v5 = vrot.slane %v4634_v25, 1 }
  0xe5   : > { %738 = vst.msk [vmem:[#allocation2 + $0x18] sm:$0xff] %vm732_vm4, %v736_v10 }
  0xe6   : > { %v638_v12 = vpop.f32.mrf.mxu0 }
  0xe7   : > { %v639_v29 = vadd.f32 %v4945_v21, %v638_v12 }
  0xe9   : > { %3730 = vmatmul.msk.bf16.gmra.mxu0 %vm553_vm2, %v4494_v11  ;;  %v706_v39 = vmax.f32 %v639_v29, 0.0  ;;  %v4497_v11 = vld [vmem:[%s4913_s16 + $0x78] sm:$0xff]  ;;  %s3542_s16 = sshll.u32 %s409_s29, 4  ;;  %s3543_s16 = int_to_ptr.vmem [resolvable:$true] %s3542_s16 }
  0xec   : > { %v765_v13 = vld [vmem:[#allocation2 + $0x10] ss:$2 sm:$0xff]  ;;  %v781_v14 = vld [vmem:[#allocation2 + $0x11] ss:$2 sm:$0xff] }
  0xed   : > { %v795_v15 = vmax.f32 %v765_v13, %v781_v14 }
  0xee   : > { %v640_v16 = vpop.f32.mrf.mxu0 }
  0xef   : > { %v842_v17 = vpack.c.bf16 %v795_v15, %v795_v15  ;;  %v641_v45 = vadd.f32 %v4945_v21, %v640_v16  ;;  %v887_v15 = vld [vmem:[#allocation3 + $0x10] sm:$0xf] }
  0xf1   : > { %v844_v18 = vshrl.u32 %v842_v17, 16  ;;  %v847_v20 = vshll.u32 %v842_v17, 16  ;;  %v707_v51 = vmax.f32 %v641_v45, 0.0 }
  0xf3   : > { %v846_v23 = vrot.slane %v844_v18, 5  ;;  %v849_v24 = vrot.slane %v847_v20, 6  ;;  %v1043_v18 = vshll.u32 %v5007_v3, 16 }
  0xf5   : > { %v850_v28 = vor.u32 %v849_v24, %v846_v23 }
  0xf6   : > { %v643_v32 = vpop.f32.mrf.mxu0 }
  0xf7   : > { %v644_v35 = vadd.f32 %v4945_v21, %v643_v32  ;;  %v851_v37 = vrot.slane %v850_v28, 4  ;;  %v858_v38 = vsel %vm5033_vm15, %v850_v28, %v857_v27  ;;  %v1045_v27 = vrot.slane %v1043_v18, 1 }
  0xf8   : > { %859 = vst [vmem:[#allocation3 + $0x8] sm:$0xc] %v858_v38 }
  0xf9   : > { %v708_v40 = vmax.f32 %v644_v35, 0.0  ;;  %3731 = vmatmul.msk.bf16.gmra.mxu0 %vm553_vm2, %v4495_v30  ;;  %v864_v42 = vsel %vm5043_vm6, %v851_v37, %v863_v34  ;;  %v1041_v34 = vshrl.u32 %v5007_v3, 16 }
  0xfa   : > { %865 = vst [vmem:[#allocation3 + $0xc] sm:$0x7] %v864_v42 }
  0xfb   : > { %v739_v43 = vmax.f32 %v706_v39, %v708_v40  ;;  %v1046_v3 = vor.u32 %v1045_v27, %v1041_v34 }
  0xfd   : > { %741 = vst.msk [vmem:[#allocation2 + $0x20] sm:$0xff] %vm732_vm4, %v739_v43 }
  0xfe   : > { %v645_v47 = vpop.f32.mrf.mxu0 }
  0xff   : > { %v646_v48 = vadd.f32 %v4945_v21, %v645_v47  ;;  %v5100_v31 = vld [vmem:[#allocation3 + $0x8] sm:$0xc] }
 0x100   : > { %v5105_v35 = vld [vmem:[#allocation3 + $0x8] sm:$0x8] }
 0x101   : > { %v709_v52 = vmax.f32 %v646_v48, 0.0 }
 0x103   : > { %v740_v53 = vmax.f32 %v707_v51, %v709_v52 }
 0x105   : > { %742 = vst.msk [vmem:[#allocation2 + $0x28] sm:$0xff] %vm732_vm4, %v740_v53 }
 0x106   : > { %v648_v56 = vpop.f32.mrf.mxu0 }
 0x107   : > { %v649_v10 = vadd.f32 %v4945_v21, %v648_v56 }
 0x109   : > { %3732 = vmatmul.msk.bf16.gmra.mxu0 %vm553_vm2, %v4496_v54  ;;  %v710_v20 = vmax.f32 %v649_v10, 0.0 }
 0x10c   : > { %v767_v57 = vld [vmem:[#allocation2 + $0x20] ss:$2 sm:$0xff]  ;;  %v783_v58 = vld [vmem:[#allocation2 + $0x21] ss:$2 sm:$0xff] }
 0x10d   : > { %v796_v59 = vmax.f32 %v767_v57, %v783_v58  ;;  %v903_v58 = vld [vmem:[#allocation3 + $0x14] sm:$0xf] }
 0x10e   : > { %v650_v60 = vpop.f32.mrf.mxu0 }
 0x10f   : > { %v866_v61 = vpack.c.bf16 %v796_v59, %v796_v59  ;;  %v651_v28 = vadd.f32 %v4945_v21, %v650_v60  ;;  %v909_v60 = vld [vmem:[#allocation3 + $0x18] sm:$0x1] }
 0x111   : > { %v868_v62 = vshll.u32 %v866_v61, 16  ;;  %v871_v63 = vshrl.u32 %v866_v61, 16  ;;  %v711_v38 = vmax.f32 %v651_v28, 0.0 }
 0x113   : > { %v870_v2 = vrot.slane %v868_v62, 5  ;;  %v873_v8 = vrot.slane %v871_v63, 4 }
 0x115   : > { %v874_v9 = vor.u32 %v873_v8, %v870_v2  ;;  %v882_v12 = vsel %vm5074_vm14, %v870_v2, %v881_v1 }
 0x116   : > { %v653_v13 = vpop.f32.mrf.mxu0  ;;  %883 = vst [vmem:[#allocation3 + $0xc] sm:$0x8] %v882_v12 }
 0x117   : > { %v875_v16 = vrot.slane %v874_v9, 4  ;;  %v654_v17 = vadd.f32 %v4945_v21, %v653_v13 }
 0x119   : > { %v712_v22 = vmax.f32 %v654_v17, 0.0  ;;  %3733 = vmatmul.msk.bf16.gmra.mxu0 %vm553_vm2, %v4497_v11  ;;  %v888_v23 = vsel %vm5083_vm7, %v875_v16, %v887_v15  ;;  %vm1238_vm2 = vcmask 1046528  }
 0x11a   : > { %889 = vst [vmem:[#allocation3 + $0x10] sm:$0xf] %v888_v23 }
 0x11b   : > { %v743_v24 = vmax.f32 %v710_v20, %v712_v22 }
 0x11d   : > { %745 = vst.msk [vmem:[#allocation2 + $0x30] sm:$0xff] %vm732_vm4, %v743_v24  ;;  %v5096_v29 = vld [vmem:[#allocation3 + $0x8] sm:$0xff] }
 0x11e   : > { %v5098_v30 = vld [vmem:[#allocation3 + $0x8] sm:$0xff]   ;;  %v655_v32 = vpop.f32.mrf.mxu0  ;;  %3796 = vmatmul.msk.bf16.gmra.mxu2 %vm732_vm4, %v5096_v29  ;;  %v1240_v36 = vrot.slane %v5096_v29, 1  ;;  %v1048_v37 = vshll.u32 %v5096_v29, 16  ;;  %v1052_v20 = vshrl.u32 %v5096_v29, 16 }
 0x11f   : > { %2205 = vst.msk [vmem:[#allocation3 + $0xc] sm:$0xf] %vm802_vm3, %v4783_v19  ;;  %v656_v4 = vadd.f32 %v4945_v21, %v655_v32 }
 0x120   : > { %2204 = vst.msk [vmem:[#allocation3 + $0x8] sm:$0xf] %vm802_vm3, %v4783_v19  ;;  %v1241_v40 = vsel %vm1238_vm2, %v1239_v5, %v1240_v36  ;;  %v1050_v41 = vrot.slane %v1048_v37, 1 }
 0x121   : > { %v713_v39 = vmax.f32 %v656_v4, 0.0  ;;  %v3942_v43 = vld [vmem:[#allocation3 + $0x10] sm:$0xf]  ;;  %3824 = vmatmul.msk.bf16.vlgmr.msra.gmra.mxu3 %vm732_vm4, %v1241_v40 }
 0x122   : > { %v1051_v45 = vsel %vm1039_vm12, %v1046_v3, %v1050_v41  ;;  %v1054_v29 = vor.u32 %v1052_v20, %v1050_v41 }
 0x123   : > { %v744_v44 = vmax.f32 %v711_v38, %v713_v39  ;;  %3774 = vmatmul.msk.bf16.vlgmr.msra.gmra.mxu1 %vm732_vm4, %v1051_v45  ;;  %v924_v45 = vld [vmem:[#allocation3 + $0x18] sm:$0xe] }
 0x125   : > { %746 = vst.msk [vmem:[#allocation2 + $0x38] sm:$0xff] %vm732_vm4, %v744_v44 }
 0x126   : > { %v5115_v42 = vld [vmem:[#allocation3 + $0xc] sm:$0xff]  ;;  %v658_v46 = vpop.f32.mrf.mxu0 }
 0x127   : > { %2206 = vst.msk [vmem:[#allocation3 + $0x10] sm:$0xf] %vm802_vm3, %v4783_v19  ;;  %v659_v63 = vadd.f32 %v4945_v21, %v658_v46 }
 0x129   : > { %v714_v10 = vmax.f32 %v659_v63, 0.0 }
 0x12c   : > { %v769_v47 = vld [vmem:[#allocation2 + $0x30] ss:$2 sm:$0xff]  ;;  %v785_v48 = vld [vmem:[#allocation2 + $0x31] ss:$2 sm:$0xff] }
 0x12d   : > { %v797_v50 = vmax.f32 %v769_v47, %v785_v48 }
 0x12e   : > { %v660_v51 = vpop.f32.mrf.mxu0 }
 0x12f   : > { %v890_v52 = vpack.c.bf16 %v797_v50, %v797_v50  ;;  %v661_v13 = vadd.f32 %v4945_v21, %v660_v51  ;;  %v927_v50 = vld [vmem:[#allocation3 + $0x1c] sm:$0x3] }
 0x131   : > { %v892_v53 = vshrl.u32 %v890_v52, 16  ;;  %v895_v56 = vshll.u32 %v890_v52, 16  ;;  %v715_v23 = vmax.f32 %v661_v13, 0.0 }
 0x133   : > { %v894_v54 = vrot.slane %v892_v53, 7 }
 0x135   : > { %v897_v61 = vor.u32 %v895_v56, %v894_v54  ;;  %v898_v62 = vrot.slane %v894_v54, 4 }
 0x136   : > { %v663_v1 = vpop.f32.mrf.mxu0 }
 0x137   : > { %v664_v2 = vadd.f32 %v4945_v21, %v663_v1  ;;  %v904_v8 = vsel %vm5124_vm5, %v897_v61, %v903_v58  ;;  %v910_v9 = vsel %vm5129_vm0, %v898_v62, %v909_v60 }
 0x138   : > { %905 = vst [vmem:[#allocation3 + $0x14] sm:$0xf] %v904_v8 }
 0x139   : > { %v716_v11 = vmax.f32 %v664_v2, 0.0  ;;  %911 = vst [vmem:[#allocation3 + $0x18] sm:$0x1] %v910_v9 }
 0x13b   : > { %v747_v12 = vmax.f32 %v714_v10, %v716_v11 }
 0x13d   : > { %749 = vst.msk [vmem:[#allocation2 + $0x40] sm:$0xff] %vm732_vm4, %v747_v12 }
 0x13e   : > { %v665_v15 = vpop.f32.mrf.mxu0 }
 0x13f   : > { %v666_v16 = vadd.f32 %v4945_v21, %v665_v15  ;;  %v5142_v17 = vld [vmem:[#allocation3 + $0x10] sm:$0xff] }
 0x140   : > { %v4532_v18 = vld [vmem:[#allocation3 + $0x10] sm:$0xf0]  ;;  %3797 = vmatmul.msk.bf16.gmra.mxu2 %vm732_vm4, %v5142_v17  ;;  %v1242_v25 = vrot.slane %v5142_v17, 1  ;;  %v1056_v27 = vshll.u32 %v5142_v17, 16 }
 0x141   : > { %2208 = vst.msk [vmem:[#allocation3 + $0x14] sm:$0x1] %vm906_vm13, %v4783_v19  ;;  %v5147_v22 = vor.u32 %v4532_v18, %v3942_v43  ;;  %v717_v24 = vmax.f32 %v666_v16, 0.0 }
 0x142   : > { %v1243_v32 = vsel %vm1238_vm2, %v1240_v36, %v1242_v25  ;;  %v5156_v34 = vrot.slane %v1056_v27, 1 }
 0x143   : > { %v748_v28 = vmax.f32 %v715_v23, %v717_v24  ;;  %3825 = vmatmul.msk.bf16.gmra.mxu3 %vm732_vm4, %v1243_v32  ;;  %v942_v23 = vld [vmem:[#allocation3 + $0x1c] sm:$0xc]  ;;  %v945_v32 = vld [vmem:[#allocation3 + $0x20] sm:$0x7] }
 0x144   : > { %v1059_v4 = vsel %vm1039_vm12, %v1054_v29, %v5156_v34 }
 0x145   : > { %750 = vst.msk [vmem:[#allocation2 + $0x48] sm:$0xff] %vm732_vm4, %v748_v28  ;;  %3775 = vmatmul.msk.bf16.gmra.mxu1 %vm732_vm4, %v1059_v4 }
 0x146   : > { %v668_v5 = vpop.f32.mrf.mxu0 }
 0x147   : > { %v669_v47 = vadd.f32 %v4945_v21, %v668_v5 }
 0x149   : > { %v718_v54 = vmax.f32 %v669_v47, 0.0 }
 0x14c   : > { %v771_v37 = vld [vmem:[#allocation2 + $0x40] ss:$2 sm:$0xff]  ;;  %v787_v3 = vld [vmem:[#allocation2 + $0x41] ss:$2 sm:$0xff] }
 0x14d   : > { %v798_v38 = vmax.f32 %v771_v37, %v787_v3  ;;  %v4527_v37 = vld [vmem:[%s5984_s3 + $0x98] sm:$0xff] }
 0x14e   : > { %v670_v39 = vpop.f32.mrf.mxu0  ;;  %v4531_v3 = vld [vmem:[%s5984_s3 + $0xb8] sm:$0xff]  ;;  %1585 = vmatpush.bf16.msrb.mxu2 %v4527_v37 }
 0x14f   : > { %v912_v40 = vpack.c.bf16 %v798_v38, %v798_v38  ;;  %v671_v61 = vadd.f32 %v4945_v21, %v670_v39  ;;  %v4523_v38 = vld [vmem:[%s5984_s3 + $0x78] sm:$0xff]  ;;  %1693 = vmatpush.bf16.msrb.mxu3 %v4531_v3 }
 0x150   : > { %1435 = vmatpush.bf16.msrb.mxu1 %v4523_v38 }
 0x151   : > { %v914_v43 = vshrl.u32 %v912_v40, 16  ;;  %v917_v36 = vshll.u32 %v912_v40, 16  ;;  %v719_v1 = vmax.f32 %v671_v61, 0.0 }
 0x153   : > { %v916_v41 = vrot.slane %v914_v43, 6  ;;  %v919_v44 = vrot.slane %v917_v36, 7 }
 0x154   : > { %1436 = vmatpush.bf16.msrb.mxu1 %v4522_v33 }
 0x155   : > { %v920_v46 = vor.u32 %v919_v44, %v916_v41  ;;  %v4526_v44 = vld [vmem:[%s5984_s3 + $0x90] sm:$0xff] }
 0x156   : > { %v673_v48 = vpop.f32.mrf.mxu0  ;;  %1586 = vmatpush.bf16.msrb.mxu2 %v4526_v44 }
 0x157   : > { %v921_v51 = vrot.slane %v920_v46, 4  ;;  %v674_v52 = vadd.f32 %v4945_v21, %v673_v48  ;;  %v925_v53 = vsel %vm4987_vm9, %v920_v46, %v924_v45  ;;  %v4530_v45 = vld [vmem:[%s5984_s3 + $0xb0] sm:$0xff]  ;;  %vm6003_vm9 = vcmask 1044480  }
 0x158   : > { %926 = vst [vmem:[#allocation3 + $0x18] sm:$0xe] %v925_v53  ;;  %1694 = vmatpush.bf16.msrb.mxu3 %v4530_v45  ;;  %vm6004_vm11 = vmmov %vm6003_vm9 }
 0x159   : > { %v720_v56 = vmax.f32 %v674_v52, 0.0  ;;  %v928_v58 = vsel %vm4994_vm10, %v921_v51, %v927_v50  ;;  %v1060_v50 = vshrl.u32 %v5142_v17, 16 }
 0x15a   : > { %929 = vst [vmem:[#allocation3 + $0x1c] sm:$0x3] %v928_v58 }
 0x15b   : > { %v751_v60 = vmax.f32 %v718_v54, %v720_v56 }
 0x15d   : > { %753 = vst.msk [vmem:[#allocation2 + $0x50] sm:$0xff] %vm732_vm4, %v751_v60  ;;  %v1062_v60 = vor.u32 %v1060_v50, %v5156_v34 }
 0x15e   : > { %v675_v62 = vpop.f32.mrf.mxu0 }
 0x15f   : > { %v676_v63 = vadd.f32 %v4945_v21, %v675_v62 }
 0x161   : > { %v721_v2 = vmax.f32 %v676_v63, 0.0 }
 0x163   : > { %v752_v8 = vmax.f32 %v719_v1, %v721_v2  ;;  %v4525_v1 = vld [vmem:[%s5984_s3 + $0x88] sm:$0xff] }
 0x164   : > { %1587 = vmatpush.bf16.msrb.mxu2 %v4525_v1 }
 0x165   : > { %754 = vst.msk [vmem:[#allocation2 + $0x58] sm:$0xff] %vm732_vm4, %v752_v8 }
 0x166   : > { %v678_v49 = vpop.f32.mrf.mxu0 }
 0x167   : > { %v679_v27 = vadd.f32 %v4945_v21, %v678_v49  ;;  %v4524_v49 = vld [vmem:[%s5984_s3 + $0x80] sm:$0xff] }
 0x168   : > { %1588 = vmatpush.bf16.msrb.mxu2 %v4524_v49 }
 0x169   : > { %v722_v39 = vmax.f32 %v679_v27, 0.0  ;;  %v963_v27 = vld [vmem:[#allocation3 + $0x24] sm:$0xf] }
 0x16c   : > { %v773_v9 = vld [vmem:[#allocation2 + $0x50] ss:$2 sm:$0xff]  ;;  %v789_v10 = vld [vmem:[#allocation2 + $0x51] ss:$2 sm:$0xff] }
 0x16d   : > { %v799_v11 = vmax.f32 %v773_v9, %v789_v10 }
 0x16e   : > { %v680_v12 = vpop.f32.mrf.mxu0 }
 0x16f   : > { %v930_v13 = vpack.c.bf16 %v799_v11, %v799_v11  ;;  %v681_v41 = vadd.f32 %v4945_v21, %v680_v12  ;;  %v960_v11 = vld [vmem:[#allocation3 + $0x20] sm:$0x8] }
 0x171   : > { %v932_v15 = vshrl.u32 %v930_v13, 16  ;;  %v935_v16 = vshll.u32 %v930_v13, 16  ;;  %v723_v51 = vmax.f32 %v681_v41, 0.0  ;;  %v1200_v41 = vpop.f32.mrf.mxu2 }
 0x173   : > { %v934_v18 = vrot.slane %v932_v15, 5  ;;  %v937_v20 = vrot.slane %v935_v16, 6 }
 0x175   : > { %v938_v24 = vor.u32 %v937_v20, %v934_v18  ;;  %v4529_v20 = vld [vmem:[%s5984_s3 + $0xa8] sm:$0xff] }
 0x176   : > { %v683_v28 = vpop.f32.mrf.mxu0  ;;  %1695 = vmatpush.bf16.msrb.mxu3 %v4529_v20 }
 0x177   : > { %v939_v29 = vrot.slane %v938_v24, 4  ;;  %v684_v4 = vadd.f32 %v4945_v21, %v683_v28  ;;  %v943_v5 = vsel %vm5033_vm15, %v938_v24, %v942_v23  ;;  %v4521_v23 = vld [vmem:[%s5984_s3 + $0x68] sm:$0xff] }
 0x178   : > { %944 = vst [vmem:[#allocation3 + $0x1c] sm:$0xc] %v943_v5  ;;  %1437 = vmatpush.bf16.msrb.mxu1 %v4521_v23  ;;  %v4543_v23 = vld [vmem:[%s5984_s3 + $0xf8] sm:$0xff] }
 0x179   : > { %v724_v40 = vmax.f32 %v684_v4, 0.0  ;;  %v946_v43 = vsel %vm5043_vm6, %v939_v29, %v945_v32  ;;  %v4528_v29 = vld [vmem:[%s5984_s3 + $0xa0] sm:$0xff]  ;;  %1985 = vmatpush.bf16.msra.mxu2 %v4543_v23  ;;  %v1382_v23 = vrot.slane %v5115_v42, 1  ;;  %vm6005_vm6 = vmmov %vm6003_vm9 }
 0x17a   : > { %947 = vst [vmem:[#allocation3 + $0x20] sm:$0x7] %v946_v43  ;;  %1696 = vmatpush.bf16.msrb.mxu3 %v4528_v29  ;;  %vm6006_vm8 = vmmov %vm6005_vm6 }
 0x17b   : > { %v755_v36 = vmax.f32 %v722_v39, %v724_v40  ;;  %v1365_v39 = vunpack.c.l.b16 %v5098_v30 }
 0x17d   : > { %757 = vst.msk [vmem:[#allocation2 + $0x60] sm:$0xff] %vm732_vm4, %v755_v36  ;;  %v1364_v36 = vunpack.c.l.b16 %v5017_v6 }
 0x17e   : > { %v685_v46 = vpop.f32.mrf.mxu0 }
 0x17f   : > { %v686_v47 = vadd.f32 %v4945_v21, %v685_v46  ;;  %v5200_v48 = vld [vmem:[#allocation3 + $0x18] sm:$0xff]  ;;  %v5247_v46 = vpack.c.b16 %v1365_v39, %v1364_v36  ;;  %v5294_v36 = vpop.f32.mrf.mxu2 }
 0x180   : > { %3798 = vmatmul.msk.bf16.gmra.mxu2 %vm732_vm4, %v5200_v48  ;;  %v1244_v53 = vrot.slane %v5200_v48, 1  ;;  %v1064_v54 = vshll.u32 %v5200_v48, 16 }
 0x181   : > { %v725_v52 = vmax.f32 %v686_v47, 0.0  ;;  %v1493_v1 = vshll.u32 %v5247_v46, 16 }
 0x182   : > { %v1245_v58 = vsel %vm1238_vm2, %v1242_v25, %v1244_v53  ;;  %v1066_v61 = vrot.slane %v1064_v54, 1 }
 0x183   : > { %v756_v56 = vmax.f32 %v723_v51, %v725_v52  ;;  %3826 = vmatmul.msk.bf16.gmra.mxu3 %vm732_vm4, %v1245_v58  ;;  %v4520_v52 = vld [vmem:[%s5984_s3 + $0x60] sm:$0xff] }
 0x184   : > { %v1067_v62 = vsel %vm1039_vm12, %v1062_v60, %v1066_v61  ;;  %1438 = vmatpush.bf16.msrb.mxu1 %v4520_v52 }
 0x185   : > { %758 = vst.msk [vmem:[#allocation2 + $0x68] sm:$0xff] %vm732_vm4, %v756_v56  ;;  %3776 = vmatmul.msk.bf16.gmra.mxu1 %vm732_vm4, %v1067_v62  ;;  %v1490_v62 = vshrl.u32 %v5247_v46, 16 }
 0x186   : > { %v688_v63 = vpop.f32.mrf.mxu0 }
 0x187   : > { %v689_v16 = vadd.f32 %v4945_v21, %v688_v63 }
 0x189   : > { %v726_v4 = vmax.f32 %v689_v16, 0.0  ;;  %v5276_v16 = vld [vmem:[#allocation3 + $0x14] sm:$0xff] }
 0x18a   : > { %v1507_v29 = vshrl.u32 %v5276_v16, 16 }
 0x18c   : > { %v775_v2 = vld [vmem:[#allocation2 + $0x60] ss:$2 sm:$0xff]  ;;  %v791_v17 = vld [vmem:[#allocation2 + $0x61] ss:$2 sm:$0xff] }
 0x18d   : > { %v800_v8 = vmax.f32 %v775_v2, %v791_v17  ;;  %v1498_v2 = vshrl.u32 %v5115_v42, 16  ;;  %v1501_v17 = vshll.u32 %v5115_v42, 16 }
 0x18e   : > { %v690_v25 = vpop.f32.mrf.mxu0 }
 0x18f   : > { %v948_v34 = vpack.c.bf16 %v800_v8, %v800_v8  ;;  %v691_v38 = vadd.f32 %v4945_v21, %v690_v25  ;;  %v1500_v8 = vrot.slane %v1498_v2, 1  ;;  %v1503_v25 = vrot.slane %v1501_v17, 2 }
 0x191   : > { %v950_v9 = vshll.u32 %v948_v34, 16  ;;  %v953_v10 = vshrl.u32 %v948_v34, 16  ;;  %v727_v44 = vmax.f32 %v691_v38, 0.0  ;;  %v4539_v38 = vld [vmem:[%s5984_s3 + $0xd8] sm:$0xff] }
 0x192   : > { %1835 = vmatpush.bf16.msra.mxu1 %v4539_v38 }
 0x193   : > { %v952_v12 = vrot.slane %v950_v9, 5  ;;  %v955_v13 = vrot.slane %v953_v10, 4 }
 0x195   : > { %v956_v15 = vor.u32 %v955_v13, %v952_v12  ;;  %v961_v18 = vsel %vm5074_vm14, %v952_v12, %v960_v11  ;;  %v1504_v11 = vor.u32 %v1503_v25, %v1500_v8 }
 0x196   : > { %v693_v24 = vpop.f32.mrf.mxu0  ;;  %962 = vst [vmem:[#allocation3 + $0x20] sm:$0x8] %v961_v18 }
 0x197   : > { %v957_v28 = vrot.slane %v956_v15, 4  ;;  %v694_v32 = vadd.f32 %v4945_v21, %v693_v24  ;;  %v977_v24 = vld [vmem:[#allocation3 + $0x28] sm:$0xf] }
 0x199   : > { %v728_v5 = vmax.f32 %v694_v32, 0.0  ;;  %v964_v37 = vsel %vm5083_vm7, %v957_v28, %v963_v27  ;;  %vm1488_vm7 = vsmask.f32 6400  ;;  %v980_v27 = vld [vmem:[#allocation3 + $0x2c] sm:$0x1] }
 0x19a   : > { %965 = vst [vmem:[#allocation3 + $0x24] sm:$0xf] %v964_v37  ;;  %v4547_v37 = vld [vmem:[%s5984_s3 + $0x118] sm:$0xff] }
 0x19b   : > { %v759_v3 = vmax.f32 %v726_v4, %v728_v5  ;;  %v1510_v4 = vshll.u32 %v5276_v16, 16  ;;  %2093 = vmatpush.bf16.msra.mxu3 %v4547_v37 }
 0x19d   : > { %761 = vst.msk [vmem:[#allocation2 + $0x70] sm:$0xff] %vm732_vm4, %v759_v3 }
 0x19e   : > { %v695_v40 = vpop.f32.mrf.mxu0 }
 0x19f   : > { %v696_v43 = vadd.f32 %v4945_v21, %v695_v40  ;;  %v1068_v21 = vshrl.u32 %v5200_v48, 16  ;;  %v1509_v40 = vrot.slane %v1507_v29, 1 }
 0x1a0   : > { %v1132_v33 = vpop.f32.mrf.mxu1 }
 0x1a1   : > { %v729_v45 = vmax.f32 %v696_v43, 0.0  ;;  %v5243_v14 = vld [vmem:[#allocation3 + $0x20] sm:$0xff]  ;;  %v1201_v47 = vadd.f32 %v1200_v41, %v1132_v33  ;;  %v1070_v58 = vor.u32 %v1068_v21, %v1066_v61  ;;  %v1495_v61 = vrot.slane %v1493_v1, 2 }
 0x1a2   : > { %3799 = vmatmul.msk.bf16.gmra.mxu2 %vm732_vm4, %v5243_v14  ;;  %v1246_v51 = vrot.slane %v5243_v14, 1  ;;  %v1072_v6 = vshll.u32 %v5243_v14, 16  ;;  %v1512_v43 = vrot.slane %v1510_v4, 2 }
 0x1a3   : > { %v760_v50 = vmax.f32 %v727_v44, %v729_v45 }
 0x1a4   : > { %v1298_v54 = vpop.f32.mrf.mxu3  ;;  %v1247_v56 = vsel %vm1238_vm2, %v1244_v53, %v1246_v51  ;;  %v5263_v60 = vrot.slane %v1072_v6, 1  ;;  %v1492_v53 = vrot.slane %v1490_v62, 1  ;;  %v1513_v41 = vor.u32 %v1512_v43, %v1509_v40  ;;  %v1205_v6 = vpop.f32.mrf.mxu2 }
 0x1a5   : > { %762 = vst.msk [vmem:[#allocation2 + $0x78] sm:$0xff] %vm732_vm4, %v760_v50  ;;  %v5266_v63 = vadd.f32 %v1298_v54, %v1201_v47  ;;  %3827 = vmatmul.msk.bf16.gmra.mxu3 %vm732_vm4, %v1247_v56  ;;  %v5300_v47 = vld [vmem:[#allocation3 + $0x1c] sm:$0xff]  ;;  %v1642_v40 = vrot.slane %v5276_v16, 2 }
 0x1a6   : > { %v1075_v48 = vsel %vm1039_vm12, %v1070_v58, %v5263_v60  ;;  %v1496_v10 = vor.u32 %v1495_v61, %v1492_v53  ;;  %v1514_v50 = vsel %vm1488_vm7, %v1504_v11, %v1513_v41  ;;  %v1076_v58 = vshrl.u32 %v5243_v14, 16  ;;  %v4542_v14 = vld [vmem:[%s5984_s3 + $0xf0] sm:$0xff] }
 0x1a7   : > { %3777 = vmatmul.msk.bf16.gmra.mxu1 %vm732_vm4, %v1075_v48  ;;  %v1516_v1 = vshrl.u32 %v5300_v47, 16  ;;  %v1519_v53 = vshll.u32 %v5300_v47, 16  ;;  %1986 = vmatpush.bf16.msra.mxu2 %v4542_v14 }
 0x1a8   : > { %v1505_v15 = vsel %vm1488_vm7, %v1496_v10, %v1504_v11  ;;  %v5296_v57 = vpop.f32.mrf.mxu1  ;;  %v1078_v17 = vor.u32 %v1076_v58, %v5263_v60  ;;  %v4538_v60 = vld [vmem:[%s5984_s3 + $0xd0] sm:$0xff] }
 0x1a9   : > { %1836 = vmatpush.bf16.msra.mxu1 %v4538_v60 }
 0x1ac   : > { %v777_v34 = vld [vmem:[#allocation2 + $0x70] ss:$2 sm:$0xff]  ;;  %v793_v49 = vld [vmem:[#allocation2 + $0x71] ss:$2 sm:$0xff]  ;;  %v5298_v44 = vpop.f32.mrf.mxu3 }
 0x1ad   : > { %v801_v9 = vmax.f32 %v777_v34, %v793_v49  ;;  %v1518_v34 = vrot.slane %v1516_v1, 1  ;;  %v1521_v49 = vrot.slane %v1519_v53, 2  ;;  %v1764_v1 = vunpack.c.l.b16 %v5100_v31 }
 0x1ae   : > { %v1901_v31 = vshll.u32 %v5147_v22, 16 }
 0x1af   : > { %v966_v12 = vpack.c.bf16 %v801_v9, %v801_v9  ;;  %v1636_v9 = vunpack.c.l.b16 %v5019_v7  ;;  %v1522_v10 = vor.u32 %v1521_v49, %v1518_v34 }
 0x1b0   : > { %v1903_v34 = vrot.slane %v1901_v31, 3 }
 0x1b1   : > { %v968_v13 = vshrl.u32 %v966_v12, 16  ;;  %v971_v20 = vshll.u32 %v966_v12, 16  ;;  %v1637_v11 = vpack.c.b16 %v1365_v39, %v1636_v9  ;;  %v1523_v12 = vsel %vm1488_vm7, %v1513_v41, %v1522_v10 }
 0x1b2   : > { %3898 = vmatmul.msk.bf16.vlgmr.msrb.gmra.mxu2 %vm732_vm4, %v1505_v15  ;;  %v1640_v15 = vrot.slane %v5115_v42, 2  ;;  %v4545_v42 = vld [vmem:[%s5984_s3 + $0x108] sm:$0xff]  ;;  %v1384_v41 = vrot.slane %v5276_v16, 1  ;;  %v4544_v16 = vld [vmem:[%s5984_s3 + $0x100] sm:$0xff] }
 0x1b3   : > { %v970_v18 = vrot.slane %v968_v13, 7  ;;  %v1639_v13 = vrot.slane %v1637_v11, 2 }
 0x1b5   : > { %v973_v28 = vor.u32 %v971_v20, %v970_v18  ;;  %v974_v32 = vrot.slane %v970_v18, 4  ;;  %v1381_v20 = vrot.slane %v5247_v46, 1  ;;  %v1641_v7 = vsel %vm603_vm1, %v1639_v13, %v1640_v15  ;;  %v4537_v46 = vld [vmem:[%s5984_s3 + $0xc8] sm:$0xff] }
 0x1b6   : > { %1837 = vmatpush.bf16.msra.mxu1 %v4537_v46 }
 0x1b7   : > { %v978_v5 = vsel %vm5124_vm5, %v973_v28, %v977_v24  ;;  %v981_v3 = vsel %vm5129_vm0, %v974_v32, %v980_v27  ;;  %v1383_v39 = vsel %vm1238_vm2, %v1381_v20, %v1382_v23  ;;  %v4541_v28 = vld [vmem:[%s5984_s3 + $0xe8] sm:$0xff]  ;;  %vm1888_vm5 = vsmask.f32 5376 }
 0x1b8   : > { %979 = vst [vmem:[#allocation3 + $0x28] sm:$0xf] %v978_v5  ;;  %1987 = vmatpush.bf16.msra.mxu2 %v4541_v28  ;;  %v4540_v5 = vld [vmem:[%s5984_s3 + $0xe0] sm:$0xff] }
 0x1b9   : > { %982 = vst [vmem:[#allocation3 + $0x2c] sm:$0x1] %v981_v3 }
 0x1bc   : > { %1988 = vmatpush.bf16.msra.mxu2 %v4540_v5 }
 0x1bf   : > { %v1001_v45 = vld [vmem:[#allocation3 + $0x28] sm:$0x1] }
 0x1c0   : > { %v1032_v33 = vunpack.c.l.b16 %v1001_v45  ;;  %v5330_v18 = vld [vmem:[#allocation3 + $0x24] sm:$0xff]  ;;  %v1475_v4 = vld [vmem:[#allocation3 + $0x2c] sm:$0x3]  ;;  %v1643_v45 = vsel %vm603_vm1, %v1640_v15, %v1642_v40 }
 0x1c1   : > { %v1525_v24 = vshrl.u32 %v5330_v18, 16  ;;  %v1528_v27 = vshll.u32 %v5330_v18, 16  ;;  %v1486_v3 = vunpack.c.l.b16 %v1475_v4  ;;  %v1343_v5 = vld [vmem:[#allocation3 + $0x2c] sm:$0x1] }
 0x1c2   : > { %v1038_v21 = vpack.c.b16 %v1032_v33, %v1032_v33  ;;  %v1137_v52 = vpop.f32.mrf.mxu1  ;;  %3899 = vmatmul.msk.bf16.gmra.mxu2 %vm732_vm4, %v1514_v50 }
 0x1c3   : > { %v1206_v54 = vadd.f32 %v1205_v6, %v1137_v52  ;;  %v1527_v32 = vrot.slane %v1525_v24, 1  ;;  %v1530_v29 = vrot.slane %v1528_v27, 2  ;;  %v5355_v43 = vpack.c.b16 %v1486_v3, %v1486_v3 }
 0x1c4   : > { %v1248_v56 = vrot.slane %v1038_v21, 1  ;;  %v1080_v62 = vshll.u32 %v1038_v21, 16  ;;  %v1385_v21 = vsel %vm1238_vm2, %v1382_v23, %v1384_v41  ;;  %v1646_v23 = vrot.slane %v5330_v18, 2 }
 0x1c5   : > { %v1531_v37 = vor.u32 %v1530_v29, %v1527_v32  ;;  %v1534_v33 = vshrl.u32 %v5355_v43, 16  ;;  %v1537_v50 = vshll.u32 %v5355_v43, 16 }
 0x1c6   : > { %v1249_v2 = vsel %vm1238_vm2, %v1246_v51, %v1248_v56  ;;  %v1082_v48 = vrot.slane %v1080_v62, 1  ;;  %v1303_v61 = vpop.f32.mrf.mxu3  ;;  %v4546_v51 = vld [vmem:[%s5984_s3 + $0x110] sm:$0xff]  ;;  %v1765_v56 = vunpack.c.h.b16 %v5098_v30  ;;  %v1644_v62 = vrot.slane %v5300_v47, 2 }
 0x1c7   : > { %3828 = vmatmul.msk.bf16.gmra.mxu3 %vm732_vm4, %v1249_v2  ;;  %v5312_v8 = vadd.f32 %v1303_v61, %v1206_v54  ;;  %v1532_v38 = vsel %vm1488_vm7, %v1522_v10, %v1531_v37  ;;  %v1536_v6 = vrot.slane %v1534_v33, 1  ;;  %v1539_v52 = vrot.slane %v1537_v50, 2  ;;  %v4536_v2 = vld [vmem:[%s5984_s3 + $0xc0] sm:$0xff]  ;;  %s4706_s3 = scalar_lea.hbm %s5967_s11, 2 }
 0x1c8   : > { %v1083_v25 = vsel %vm1039_vm12, %v1078_v17, %v1082_v48  ;;  %2094 = vmatpush.bf16.msra.mxu3 %v4546_v51  ;;  %v1386_v17 = vrot.slane %v5300_v47, 1  ;;  %v5379_v48 = vpack.c.b16 %v1765_v56, %v1764_v1  ;;  %1838 = vmatpush.bf16.msra.mxu1 %v4536_v2  ;;  %v1645_v53 = vsel %vm603_vm1, %v1642_v40, %v1644_v62  ;;  %v5389_v47 = vpop.f32.mrf.mxu2  ;;  %v5413_v50 = vld [vmem:[#allocation3 + $0x20] sm:$0xff]  ;;  %p4708_p1 = scmp.lt.s32.totalorder %s4706_s3, %s4702_s26 }
 0x1c9   : > { %3778 = vmatmul.msk.bf16.gmra.mxu1 %vm732_vm4, %v1083_v25  ;;  %v1540_v54 = vor.u32 %v1539_v52, %v1536_v6  ;;  %v1898_v61 = vshrl.u32 %v5147_v22, 16  ;;  %v1647_v28 = vsel %vm603_vm1, %v1644_v62, %v1646_v23  ;;  %v1648_v33 = vrot.slane %v5355_v43, 2 }
 0x1ca   : > { %v1387_v25 = vsel %vm1238_vm2, %v1384_v41, %v1386_v17  ;;  %v1890_v14 = vshrl.u32 %v5379_v48, 16  ;;  %v1893_v51 = vshll.u32 %v5379_v48, 16  ;;  %v5391_v49 = vpop.f32.mrf.mxu1  ;;  %p4709_p2 = por %p4708_p1, %p4707_p0 }
 0x1cb   : > { %v1541_v58 = vsel %vm1488_vm7, %v1531_v37, %v1540_v54  ;;  %v1900_v60 = vrot.slane %v1898_v61, 2  ;;  %v1649_v52 = vsel %vm603_vm1, %v1646_v23, %v1648_v33  ;;  %v1916_v54 = vshrl.u32 %v5413_v50, 16  ;;  %v4563_v61 = vld [vmem:[%s6002_s5 + $0x78] sm:$0xff]  ;;  %vm6007_vm7 = vmmov %vm6005_vm6 }
 0x1cc   : > { %2095 = vmatpush.bf16.msra.mxu3 %v4545_v42  ;;  %v1892_v9 = vrot.slane %v1890_v14, 2  ;;  %v1895_v10 = vrot.slane %v1893_v51, 3  ;;  %2526 = vmatpush.bf16.msrb.mxu0 %v4563_v61  ;;  %v2040_v51 = vrot.slane %v5147_v22, 3  ;;  %p4710_p3 = pnand %p4709_p2, %p4705_p13 }
 0x1cd   : > { %v1904_v11 = vor.u32 %v1903_v34, %v1900_v60  ;;  %v1918_v62 = vrot.slane %v1916_v54, 2  ;;  %v5436_v60 = vld [vmem:[#allocation3 + $0x28] sm:$0xff] }
 0x1ce   : > { %v1896_v13 = vor.u32 %v1895_v10, %v1892_v9  ;;  %v1781_v10 = vrot.slane %v5379_v48, 2  ;;  %v1875_v48 = vld [vmem:[#allocation3 + $0x30] sm:$0x7] }
 0x1d0   : > { %2096 = vmatpush.bf16.msra.mxu3 %v4544_v16  ;;  %v1210_v15 = vpop.f32.mrf.mxu2  ;;  %v1905_v20 = vsel %vm1888_vm5, %v1896_v13, %v1904_v11  ;;  %v1919_v16 = vshll.u32 %v5413_v50, 16  ;;  %v1925_v13 = vshrl.u32 %v5436_v60, 16 }
 0x1d2   : > { %3900 = vmatmul.msk.bf16.gmra.mxu2 %vm732_vm4, %v1523_v12  ;;  %v5393_v12 = vpop.f32.mrf.mxu3  ;;  %v1921_v43 = vrot.slane %v1919_v16, 3  ;;  %v2044_v16 = vrot.slane %v5413_v50, 3 }
 0x1d7   : > { %3927 = vmatmul.msk.bf16.vlgmr.msrb.gmra.mxu3 %vm732_vm4, %v1641_v7  ;;  %v5397_v7 = vld [vmem:[#allocation3 + $0x18] sm:$0xff] }
 0x1d8   : > { %v1907_v42 = vshrl.u32 %v5397_v7, 16  ;;  %v1910_v46 = vshll.u32 %v5397_v7, 16 }
 0x1d9   : > { %3869 = vmatmul.msk.bf16.vlgmr.msrb.gmra.mxu1 %vm732_vm4, %v1383_v39  ;;  %v1388_v39 = vrot.slane %v5330_v18, 1  ;;  %v1374_v18 = vunpack.c.l.b16 %v1343_v5  ;;  %v1784_v5 = vrot.slane %v5397_v7, 2 }
 0x1da   : > { %v1909_v37 = vrot.slane %v1907_v42, 2  ;;  %v1912_v3 = vrot.slane %v1910_v46, 3  ;;  %v1886_v42 = vunpack.c.l.b16 %v1875_v48 }
 0x1db   : > { %v1389_v4 = vsel %vm1238_vm2, %v1386_v17, %v1388_v39  ;;  %v1380_v41 = vpack.c.b16 %v1374_v18, %v1374_v18  ;;  %v1922_v17 = vor.u32 %v1921_v43, %v1918_v62 }
 0x1dc   : > { %v1913_v40 = vor.u32 %v1912_v3, %v1909_v37 }
 0x1dd   : > { %v1390_v6 = vrot.slane %v1380_v41, 1 }
 0x1de   : > { %v1923_v14 = vsel %vm1888_vm5, %v1913_v40, %v1922_v17 }
 0x1e2   : > { %3901 = vmatmul.msk.bf16.gmra.mxu2 %vm732_vm4, %v1532_v38  ;;  %v5409_v38 = vpop.f32.mrf.mxu2 }
 0x1e7   : > { %3928 = vmatmul.msk.bf16.gmra.mxu3 %vm732_vm4, %v1643_v45  ;;  %v1914_v45 = vsel %vm1888_vm5, %v1904_v11, %v1913_v40 }
 0x1e9   : > { %3870 = vmatmul.msk.bf16.gmra.mxu1 %vm732_vm4, %v1385_v21 }
 0x1f2   : > { %3902 = vmatmul.msk.bf16.gmra.mxu2 %vm732_vm4, %v1541_v58  ;;  %v1391_v58 = vsel %vm1238_vm2, %v1388_v39, %v1390_v6 }
 0x1f7   : > { %3929 = vmatmul.msk.bf16.gmra.mxu3 %vm732_vm4, %v1645_v53  ;;  %v2036_v53 = vunpack.c.l.b16 %v5105_v35  ;;  %v1782_v35 = vrot.slane %v5147_v22, 2  ;;  %v1927_v22 = vrot.slane %v1925_v13, 2 }
 0x1f9   : > { %3871 = vmatmul.msk.bf16.gmra.mxu1 %vm732_vm4, %v1387_v25  ;;  %v2037_v31 = vpack.c.b16 %v1765_v56, %v2036_v53  ;;  %v1785_v41 = vsel %vm603_vm1, %v1782_v35, %v1784_v5 }
 0x1fb   : > { %v2039_v34 = vrot.slane %v2037_v31, 3 }
 0x1fd   : > { %v2041_v56 = vsel %vm6003_vm9, %v2039_v34, %v2040_v51  ;;  %vm2174_vm9 = vcmask 523268  }
 0x202   : > { %v1142_v24 = vpop.f32.mrf.mxu1  ;;  %4001 = vmatmul.msk.bf16.vlgmr.msra.gmra.mxu2 %vm732_vm4, %v1905_v20  ;;  %v1783_v20 = vsel %vm603_vm1, %v1781_v10, %v1782_v35 }
 0x203   : > { %v1211_v27 = vadd.f32 %v1210_v15, %v1142_v24  ;;  %v1215_v21 = vpop.f32.mrf.mxu2  ;;  %v1928_v15 = vshll.u32 %v5436_v60, 16 }
 0x206   : > { %v1308_v32 = vpop.f32.mrf.mxu3 }
 0x207   : > { %3930 = vmatmul.msk.bf16.gmra.mxu3 %vm732_vm4, %v1647_v28  ;;  %v5405_v29 = vadd.f32 %v1308_v32, %v1211_v27  ;;  %v1930_v27 = vrot.slane %v1928_v15, 3  ;;  %v2042_v32 = vrot.slane %v5397_v7, 3  ;;  %v1743_v15 = vld [vmem:[#allocation3 + $0x30] sm:$0x3] }
 0x209   : > { %3872 = vmatmul.msk.bf16.gmra.mxu1 %vm732_vm4, %v1389_v4  ;;  %v1931_v28 = vor.u32 %v1930_v27, %v1927_v22  ;;  %v1887_v4 = vpack.c.b16 %v1886_v42, %v1886_v42  ;;  %v2043_v3 = vsel %vm6004_vm11, %v2040_v51, %v2042_v32  ;;  %v1774_v27 = vunpack.c.l.b16 %v1743_v15 }
 0x20a   : > { %v5422_v1 = vpop.f32.mrf.mxu1  ;;  %vm6010_vm11 = vcmask 518144  }
 0x20b   : > { %v5424_v2 = vpop.f32.mrf.mxu2  ;;  %v1932_v46 = vsel %vm1888_vm5, %v1922_v17, %v1931_v28  ;;  %v1934_v18 = vshrl.u32 %v1887_v4, 16  ;;  %v1937_v40 = vshll.u32 %v1887_v4, 16  ;;  %v2045_v17 = vsel %vm6005_vm6, %v2042_v32, %v2044_v16 }
 0x20c   : > { %v2048_v42 = vrot.slane %v1887_v4, 3 }
 0x20d   : > { %v1939_v33 = vrot.slane %v1937_v40, 3 }
 0x20e   : > { %v5432_v25 = vpop.f32.mrf.mxu3 }
 0x212   : > { %4002 = vmatmul.msk.bf16.gmra.mxu2 %vm732_vm4, %v1914_v45  ;;  %v1936_v45 = vrot.slane %v1934_v18, 2 }
 0x217   : > { %3931 = vmatmul.msk.bf16.gmra.mxu3 %vm732_vm4, %v1649_v52  ;;  %v1940_v52 = vor.u32 %v1939_v33, %v1936_v45 }
 0x219   : > { %3873 = vmatmul.msk.bf16.gmra.mxu1 %vm732_vm4, %v1391_v58  ;;  %v1941_v7 = vsel %vm1888_vm5, %v1931_v28, %v1940_v52  ;;  %v1786_v58 = vrot.slane %v5413_v50, 2  ;;  %v2046_v50 = vrot.slane %v5436_v60, 3  ;;  %v1780_v28 = vpack.c.b16 %v1774_v27, %v1774_v27 }
 0x21b   : > { %v1787_v61 = vsel %vm603_vm1, %v1784_v5, %v1786_v58  ;;  %v1790_v32 = vrot.slane %v1780_v28, 2 }
 0x222   : > { %4003 = vmatmul.msk.bf16.gmra.mxu2 %vm732_vm4, %v1923_v14 }
 0x224   : > { %v1147_v9 = vpop.f32.mrf.mxu1 }
 0x225   : > { %v1216_v11 = vadd.f32 %v1215_v21, %v1147_v9  ;;  %v1220_v30 = vpop.f32.mrf.mxu2  ;;  %v1788_v9 = vrot.slane %v5436_v60, 2 }
 0x227   : > { %4030 = vmatmul.msk.bf16.vlgmr.msra.gmra.mxu3 %vm732_vm4, %v2041_v56  ;;  %v1789_v56 = vsel %vm603_vm1, %v1786_v58, %v1788_v9  ;;  %v1791_v18 = vsel %vm603_vm1, %v1788_v9, %v1790_v32 }
 0x228   : > { %v1313_v23 = vpop.f32.mrf.mxu3 }
 0x229   : > { %3972 = vmatmul.msk.bf16.vlgmr.msra.gmra.mxu1 %vm732_vm4, %v1783_v20  ;;  %v5447_v24 = vadd.f32 %v1313_v23, %v1216_v11  ;;  %v2047_v11 = vsel %vm6006_vm8, %v2044_v16, %v2046_v50  ;;  %vm6011_vm8 = vcmask 517120  }
 0x22c   : > { %v5459_v21 = vpop.f32.mrf.mxu1 }
 0x22d   : > { %v5449_v39 = vpop.f32.mrf.mxu2 }
 0x230   : > { %v5463_v54 = vpop.f32.mrf.mxu3 }
 0x232   : > { %4004 = vmatmul.msk.bf16.gmra.mxu2 %vm732_vm4, %v1932_v46 }
 0x235   : > { %v1590_v37 = vpop.f32.mrf.mxu2 }
 0x237   : > { %4031 = vmatmul.msk.bf16.gmra.mxu3 %vm732_vm4, %v2043_v3 }
 0x239   : > { %3973 = vmatmul.msk.bf16.gmra.mxu1 %vm732_vm4, %v1785_v41 }
 0x23d   : > { %v5461_v6 = vpop.f32.mrf.mxu2 }
 0x242   : > { %4005 = vmatmul.msk.bf16.gmra.mxu2 %vm732_vm4, %v1941_v7 }
 0x245   : > { %v1595_v43 = vpop.f32.mrf.mxu2 }
 0x246   : > { %v1152_v62 = vpop.f32.mrf.mxu1 }
 0x247   : > { %v1221_v53 = vadd.f32 %v1220_v30, %v1152_v62  ;;  %4032 = vmatmul.msk.bf16.gmra.mxu3 %vm732_vm4, %v2045_v17 }
 0x249   : > { %3974 = vmatmul.msk.bf16.gmra.mxu1 %vm732_vm4, %v1787_v61 }
 0x24a   : > { %v1318_v31 = vpop.f32.mrf.mxu3 }
 0x24b   : > { %v1331_v14 = vadd.f32 %v1318_v31, %v1221_v53 }
 0x24d   : > { %v5475_v34 = vpop.f32.mrf.mxu2 }
 0x24e   : > { %v5473_v51 = vpop.f32.mrf.mxu1 }
 0x252   : > { %v5477_v35 = vpop.f32.mrf.mxu3 }
 0x255   : > { %v1600_v20 = vpop.f32.mrf.mxu2 }
 0x256   : > { %v1440_v10 = vpop.f32.mrf.mxu1 }
 0x257   : > { %v1465_v30 = vadd.f32 %v1440_v10, %v5266_v63  ;;  %4033 = vmatmul.msk.bf16.gmra.mxu3 %vm732_vm4, %v2047_v11  ;;  %v4562_v63 = vld [vmem:[%s6002_s5 + $0x70] sm:$0xff] }
 0x258   : > { %2527 = vmatpush.bf16.msrb.mxu0 %v4562_v63  ;;  %v1203_v63 = vadd.f32 %v5294_v36, %v5296_v57  ;;  %v1208_v36 = vadd.f32 %v5389_v47, %v5391_v49 }
 0x259   : > { %3975 = vmatmul.msk.bf16.gmra.mxu1 %vm732_vm4, %v1789_v56  ;;  %v1615_v13 = vadd.f32 %v1590_v37, %v1465_v30  ;;  %v2049_v37 = vsel %vm6007_vm7, %v2046_v50, %v2048_v42 }
 0x25a   : > { %v1698_v23 = vpop.f32.mrf.mxu3 }
 0x25b   : > { %v1723_v22 = vadd.f32 %v1698_v23, %v1615_v13 }
 0x25d   : > { %v5489_v46 = vpop.f32.mrf.mxu2 }
 0x25e   : > { %v1442_v48 = vpop.f32.mrf.mxu1 }
 0x262   : > { %v1700_v60 = vpop.f32.mrf.mxu3 }
 0x265   : > { %v1605_v45 = vpop.f32.mrf.mxu2 }
 0x266   : > { %v1445_v5 = vpop.f32.mrf.mxu1 }
 0x267   : > { %v1467_v3 = vadd.f32 %v1445_v5, %v5312_v8  ;;  %4034 = vmatmul.msk.bf16.gmra.mxu3 %vm732_vm4, %v2049_v37  ;;  %v1324_v5 = vadd.f32 %v5298_v44, %v1203_v63 }
 0x269   : > { %3976 = vmatmul.msk.bf16.gmra.mxu1 %vm732_vm4, %v1791_v18  ;;  %v1617_v4 = vadd.f32 %v1595_v43, %v1467_v3  ;;  %v1466_v37 = vadd.f32 %v1442_v48, %v1324_v5  ;;  %v1326_v48 = vadd.f32 %v5393_v12, %v1208_v36 }
 0x26a   : > { %v1703_v40 = vpop.f32.mrf.mxu3 }
 0x26b   : > { %v1725_v41 = vadd.f32 %v1703_v40, %v1617_v4  ;;  %v1616_v18 = vadd.f32 %v5461_v6, %v1466_v37 }
 0x26d   : > { %v5497_v58 = vpop.f32.mrf.mxu2 }
 0x26e   : > { %v1447_v33 = vpop.f32.mrf.mxu1 }
 0x26f   : > { %v1468_v6 = vadd.f32 %v1447_v33, %v1326_v48 }
 0x272   : > { %v1705_v52 = vpop.f32.mrf.mxu3 }
 0x275   : > { %v1610_v61 = vpop.f32.mrf.mxu2 }
 0x276   : > { %v1450_v7 = vpop.f32.mrf.mxu1 }
 0x277   : > { %v1469_v16 = vadd.f32 %v1450_v7, %v5405_v29 }
 0x279   : > { %v1619_v62 = vadd.f32 %v1600_v20, %v1469_v16 }
 0x27a   : > { %v1708_v17 = vpop.f32.mrf.mxu3 }
 0x27b   : > { %v5499_v8 = vadd.f32 %v1708_v17, %v1619_v62 }
 0x27d   : > { %v5508_v30 = vpop.f32.mrf.mxu2 }
 0x27e   : > { %v5501_v53 = vpop.f32.mrf.mxu1 }
 0x282   : > { %v5503_v31 = vpop.f32.mrf.mxu3 }
 0x285   : > { %v1990_v13 = vpop.f32.mrf.mxu2 }
 0x286   : > { %v1455_v43 = vpop.f32.mrf.mxu1 }
 0x287   : > { %v1471_v50 = vadd.f32 %v1455_v43, %v5447_v24 }
 0x289   : > { %v1621_v9 = vadd.f32 %v1605_v45, %v1471_v50  ;;  %v1724_v45 = vadd.f32 %v1700_v60, %v1616_v18 }
 0x28a   : > { %v1713_v10 = vpop.f32.mrf.mxu3 }
 0x28b   : > { %v5506_v11 = vadd.f32 %v1713_v10, %v1621_v9  ;;  %v5533_v9 = vld [vmem:[%s6008_s4] ss:$0 sm:$0xff]  ;;  %v1618_v10 = vadd.f32 %v5475_v34, %v1468_v6 }
 0x28d   : > { %v1992_v24 = vpop.f32.mrf.mxu2  ;;  %v1726_v12 = vadd.f32 %v1705_v52, %v1618_v10  ;;  %v1218_v10 = vadd.f32 %v5424_v2, %v5459_v21 }
 0x28e   : > { %v5510_v29 = vpop.f32.mrf.mxu1 }
 0x292   : > { %v5512_v56 = vpop.f32.mrf.mxu3 }
 0x295   : > { %v1995_v4 = vpop.f32.mrf.mxu2 }
 0x296   : > { %v1460_v15 = vpop.f32.mrf.mxu1 }
 0x297   : > { %v1473_v20 = vadd.f32 %v1460_v15, %v1331_v14  ;;  %v4561_v14 = vld [vmem:[%s6002_s5 + $0x68] sm:$0xff] }
 0x298   : > { %2528 = vmatpush.bf16.msrb.mxu0 %v4561_v14 }
 0x299   : > { %v1623_v23 = vadd.f32 %v1610_v61, %v1473_v20 }
 0x29a   : > { %v1718_v27 = vpop.f32.mrf.mxu3 }
 0x29b   : > { %v5514_v28 = vadd.f32 %v1718_v27, %v1623_v23 }
 0x29d   : > { %v1997_v17 = vpop.f32.mrf.mxu2 }
 0x29e   : > { %v5516_v42 = vpop.f32.mrf.mxu1 }
 0x2a2   : > { %v5520_v32 = vpop.f32.mrf.mxu3 }
 0x2a6   : > { %v1840_v3 = vpop.f32.mrf.mxu1 }
 0x2a7   : > { %v1865_v62 = vadd.f32 %v1840_v3, %v1723_v22 }
 0x2a9   : > { %v2015_v43 = vadd.f32 %v1990_v13, %v1865_v62  ;;  %v2000_v13 = vpop.f32.mrf.mxu2 }
 0x2aa   : > { %v2098_v40 = vpop.f32.mrf.mxu3 }
 0x2ab   : > { %v2123_v22 = vadd.f32 %v2098_v40, %v2015_v43 }
 0x2ad   : > { %v2137_v27 = vadd.f32 %v5533_v9, %v2123_v22  ;;  %v4549_v22 = vld [vmem:[%s6002_s5 + $0x8] sm:$0xff] }
 0x2ae   : > { %v1842_v7 = vpop.f32.mrf.mxu1 }
 0x2af   : > { %v1866_v16 = vadd.f32 %v1842_v7, %v1724_v45  ;;  %v2147_v34 = vmax.f32 %v2137_v27, 0.0 }
 0x2b1   : > { %v2016_v57 = vadd.f32 %v1992_v24, %v1866_v16  ;;  %v2002_v7 = vpop.f32.mrf.mxu2 }
 0x2b2   : > { %v2100_v44 = vpop.f32.mrf.mxu3 }
 0x2b3   : > { %v2124_v61 = vadd.f32 %v2100_v44, %v2016_v57  ;;  %v4555_v57 = vld [vmem:[%s6002_s5 + $0x38] sm:$0xff]  ;;  %v1213_v44 = vadd.f32 %v5409_v38, %v5422_v1  ;;  %v4550_v38 = vld [vmem:[%s6002_s5 + $0x10] sm:$0xff] }
 0x2b4   : > { %2343 = vmatpush.bf16.msrb.mxu1 %v4555_v57 }
 0x2b5   : > { %v2138_v47 = vadd.f32 %v5533_v9, %v2124_v61 }
 0x2b6   : > { %v1845_v50 = vpop.f32.mrf.mxu1 }
 0x2b7   : > { %v1867_v60 = vadd.f32 %v1845_v50, %v1725_v41  ;;  %v2148_v23 = vmax.f32 %v2138_v47, 0.0  ;;  %v4554_v50 = vld [vmem:[%s6002_s5 + $0x30] sm:$0xff] }
 0x2b8   : > { %2344 = vmatpush.bf16.msrb.mxu1 %v4554_v50  ;;  %v2235_v50 = vld [vmem:[#allocation3 + $0x8] sm:$0x1] }
 0x2b9   : > { %v2017_v49 = vadd.f32 %v1995_v4, %v1867_v60  ;;  %v2159_v37 = vrot.slane %v2148_v23, 2 }
 0x2ba   : > { %v2103_v15 = vpop.f32.mrf.mxu3 }
 0x2bb   : > { %v2125_v20 = vadd.f32 %v2103_v15, %v2017_v49  ;;  %v4559_v49 = vld [vmem:[%s6002_s5 + $0x58] sm:$0xff]  ;;  %v1330_v15 = vadd.f32 %v5463_v54, %v1218_v10 }
 0x2bc   : > { %2455 = vmatpush.bf16.msrb.mxu3 %v4559_v49  ;;  %v2224_v49 = vld [vmem:[#allocation3 + $0x4] sm:$0x3]  ;;  %2345 = vmatpush.bf16.msrb.mxu1 %v4553_v55 }
 0x2bd   : > { %v2139_v33 = vadd.f32 %v5533_v9, %v2125_v20  ;;  %v2005_v20 = vpop.f32.mrf.mxu2 }
 0x2be   : > { %v1847_v24 = vpop.f32.mrf.mxu1 }
 0x2bf   : > { %v2149_v63 = vmax.f32 %v2139_v33, 0.0  ;;  %v1868_v5 = vadd.f32 %v1847_v24, %v1726_v12  ;;  %v1472_v33 = vadd.f32 %v5510_v29, %v1330_v15 }
 0x2c1   : > { %v2160_v41 = vrot.slane %v2149_v63, 2  ;;  %v2018_v3 = vadd.f32 %v1997_v17, %v1868_v5  ;;  %v4551_v17 = vld [vmem:[%s6002_s5 + $0x18] sm:$0xff]  ;;  %v1622_v24 = vadd.f32 %v5497_v58, %v1472_v33 }
 0x2c2   : > { %v2105_v18 = vpop.f32.mrf.mxu3  ;;  %2391 = vmatpush.bf16.msrb.mxu2 %v4551_v17 }
 0x2c3   : > { %v2161_v14 = vsel %vm603_vm1, %v2159_v37, %v2160_v41  ;;  %v2126_v40 = vadd.f32 %v2105_v18, %v2018_v3  ;;  %v1730_v41 = vadd.f32 %v5512_v56, %v1622_v24 }
 0x2c4   : > { %v2163_v4 = vmax.f32 %v2147_v34, %v2161_v14 }
 0x2c5   : > { %v2140_v16 = vadd.f32 %v5533_v9, %v2126_v40  ;;  %v2007_v37 = vpop.f32.mrf.mxu2 }
 0x2c6   : > { %2164 = vst.msk [vmem:[#allocation2] sm:$0xff] %vm732_vm4, %v2163_v4  ;;  %v1850_v52 = vpop.f32.mrf.mxu1  ;;  %2392 = vmatpush.bf16.msrb.mxu2 %v4550_v38 }
 0x2c7   : > { %v1869_v45 = vadd.f32 %v1850_v52, %v5499_v8  ;;  %v1328_v8 = vadd.f32 %v5432_v25, %v1213_v44  ;;  %v2150_v6 = vmax.f32 %v2140_v16, 0.0  ;;  %v2221_v44 = vld [vmem:[#allocation3] sm:$0x8] }
 0x2c9   : > { %v2019_v36 = vadd.f32 %v2000_v13, %v1869_v45  ;;  %v1470_v1 = vadd.f32 %v5501_v53, %v1328_v8  ;;  %v2167_v25 = vrot.slane %v2150_v6, 2  ;;  %v4548_v13 = vld [vmem:[%s6002_s5] sm:$0xff] }
 0x2ca   : > { %v2108_v62 = vpop.f32.mrf.mxu3  ;;  %2393 = vmatpush.bf16.msrb.mxu2 %v4549_v22 }
 0x2cb   : > { %v2127_v48 = vadd.f32 %v2108_v62, %v2019_v36  ;;  %v1620_v12 = vadd.f32 %v5489_v46, %v1470_v1 }
 0x2cd   : > { %v2141_v61 = vadd.f32 %v5533_v9, %v2127_v48  ;;  %v1728_v46 = vadd.f32 %v5503_v31, %v1620_v12  ;;  %v1223_v31 = vadd.f32 %v5449_v39, %v5473_v51  ;;  %v2010_v38 = vpop.f32.mrf.mxu2 }
 0x2ce   : > { %v1852_v43 = vpop.f32.mrf.mxu1  ;;  %2394 = vmatpush.bf16.msrb.mxu2 %v4548_v13 }
 0x2cf   : > { %v2151_v60 = vmax.f32 %v2141_v61, 0.0  ;;  %v1870_v5 = vadd.f32 %v1852_v43, %v1728_v46  ;;  %v1332_v56 = vadd.f32 %v5477_v35, %v1223_v31  ;;  %v2232_v61 = vld [vmem:[#allocation3 + $0x4] sm:$0xc] }
 0x2d1   : > { %v2168_v47 = vrot.slane %v2151_v60, 2  ;;  %v2020_v18 = vadd.f32 %v2002_v7, %v1870_v5 }
 0x2d2   : > { %v2110_v53 = vpop.f32.mrf.mxu3 }
 0x2d3   : > { %v2169_v2 = vsel %vm603_vm1, %v2167_v25, %v2168_v47  ;;  %v2173_v21 = vmax.f32 %v2150_v6, %v2168_v47  ;;  %v1474_v6 = vadd.f32 %v5516_v42, %v1332_v56  ;;  %v4569_v56 = vld [vmem:[%s6002_s5 + $0xa8] sm:$0xff] }
 0x2d4   : > { %v2172_v23 = vmax.f32 %v2149_v63, %v2169_v2 }
 0x2d5   : > { %2176 = vst.msk [vmem:[#allocation2 + $0xc] sm:$0xf] %vm802_vm3, %v2173_v21  ;;  %v2012_v46 = vpop.f32.mrf.mxu2 }
 0x2d6   : > { %2175 = vst.msk [vmem:[#allocation2 + $0x4] sm:$0xf0] %vm2174_vm9, %v2172_v23  ;;  %v1855_v54 = vpop.f32.mrf.mxu1 }
 0x2d7   : > { %v1871_v27 = vadd.f32 %v1855_v54, %v5506_v11  ;;  %v2128_v11 = vadd.f32 %v2110_v53, %v2020_v18  ;;  %v1624_v53 = vadd.f32 %v5508_v30, %v1474_v6  ;;  %v4552_v18 = vld [vmem:[%s6002_s5 + $0x20] sm:$0xff] }
 0x2d8   : > { %2346 = vmatpush.bf16.msrb.mxu1 %v4552_v18  ;;  %v4576_v18 = vld [vmem:[%s6002_s5 + $0xe0] sm:$0xff] }
 0x2d9   : > { %v2021_v63 = vadd.f32 %v2005_v20, %v1871_v27  ;;  %v2142_v43 = vadd.f32 %v5533_v9, %v2128_v11  ;;  %v1732_v13 = vadd.f32 %v5520_v32, %v1624_v53  ;;  %v4560_v32 = vld [vmem:[%s6002_s5 + $0x60] sm:$0xff]  ;;  %v4574_v53 = vld [vmem:[%s6002_s5 + $0xd0] sm:$0xff] }
 0x2da   : > { %v2113_v29 = vpop.f32.mrf.mxu3  ;;  %2529 = vmatpush.bf16.msrb.mxu0 %v4560_v32 }
 0x2db   : > { %v2129_v14 = vadd.f32 %v2113_v29, %v2021_v63  ;;  %v2152_v21 = vmax.f32 %v2142_v43, 0.0  ;;  %v4558_v63 = vld [vmem:[%s6002_s5 + $0x50] sm:$0xff] }
 0x2dc   : > { %2456 = vmatpush.bf16.msrb.mxu3 %v4558_v63 }
 0x2dd   : > { %v2196_v3 = vld [vmem:[#allocation2] ss:$2 sm:$0xff]  ;;  %v2198_v34 = vld [vmem:[#allocation2 + $0x1] ss:$2 sm:$0xff]  ;;  %v2143_v58 = vadd.f32 %v5533_v9, %v2129_v14 }
 0x2de   : > { %v2200_v4 = vmax.f32 %v2196_v3, %v2198_v34  ;;  %v1857_v40 = vpop.f32.mrf.mxu1 }
 0x2df   : > { %v1872_v52 = vadd.f32 %v1857_v40, %v1730_v41  ;;  %v2153_v39 = vmax.f32 %v2143_v58, 0.0 }
 0x2e0   : > { %v2209_v45 = vpack.c.bf16 %v2200_v4, %v2200_v4  ;;  %v4557_v4 = vld [vmem:[%s6002_s5 + $0x48] sm:$0xff] }
 0x2e1   : > { %v2022_v16 = vadd.f32 %v2007_v37, %v1872_v52  ;;  %v2179_v12 = vrot.slane %v2153_v39, 2  ;;  %2457 = vmatpush.bf16.msrb.mxu3 %v4557_v4 }
 0x2e2   : > { %v2211_v36 = vshll.u32 %v2209_v45, 16  ;;  %v2214_v57 = vshrl.u32 %v2209_v45, 16  ;;  %v2115_v62 = vpop.f32.mrf.mxu3 }
 0x2e3   : > { %v2130_v48 = vadd.f32 %v2115_v62, %v2022_v16  ;;  %v4556_v62 = vld [vmem:[%s6002_s5 + $0x40] sm:$0xff] }
 0x2e4   : > { %v2216_v7 = vrot.slane %v2214_v57, 4  ;;  %v2227_v17 = vrot.slane %v2214_v57, 7  ;;  %v2213_v8 = vrot.slane %v2211_v36, 5  ;;  %v4571_v57 = vld [vmem:[%s6002_s5 + $0xb8] sm:$0xff] }
 0x2e5   : > { %v5588_v51 = vadd.f32 %v5533_v9, %v2130_v48  ;;  %2670 = vmatpush.bf16.msra.mxu2 %v4571_v57  ;;  %2458 = vmatpush.bf16.msrb.mxu3 %v4556_v62  ;;  %v4582_v62 = vld [vmem:[%s6002_s5 + $0x110] sm:$0xff] }
 0x2e6   : > { %v2228_v1 = vor.u32 %v2227_v17, %v2211_v36  ;;  %v2229_v60 = vrot.slane %v2227_v17, 4  ;;  %v1860_v10 = vpop.f32.mrf.mxu1  ;;  %v2217_v25 = vor.u32 %v2216_v7, %v2213_v8  ;;  %v2222_v35 = vsel %vm5074_vm14, %v2213_v8, %v2221_v44  ;;  %v4567_v44 = vld [vmem:[%s6002_s5 + $0x98] sm:$0xff]  ;;  %v4566_v8 = vld [vmem:[%s6002_s5 + $0x90] sm:$0xff] }
 0x2e7   : > { %v2154_v47 = vmax.f32 %v5588_v51, 0.0  ;;  %v1873_v42 = vadd.f32 %v1860_v10, %v5514_v28  ;;  %2223 = vst [vmem:[#allocation3] sm:$0x8] %v2222_v35  ;;  %2608 = vmatpush.bf16.msra.mxu1 %v4567_v44  ;;  %v2260_v35 = vld [vmem:[#allocation3 + $0xc] sm:$0x7] }
 0x2e8   : > { %v2233_v22 = vsel %vm5033_vm15, %v2228_v1, %v2232_v61  ;;  %v2218_v15 = vrot.slane %v2217_v25, 4  ;;  %v2236_v20 = vsel %vm5129_vm0, %v2229_v60, %v2235_v50  ;;  %v4568_v61 = vld [vmem:[%s6002_s5 + $0xa0] sm:$0xff]  ;;  %vm2248_vm0 = vsmask.f32 3334  ;;  %v2250_v60 = vld [vmem:[#allocation3 + $0x8] sm:$0xe] }
 0x2e9   : > { %2234 = vst [vmem:[#allocation3 + $0x4] sm:$0xc] %v2233_v22  ;;  %v2180_v2 = vrot.slane %v2154_v47, 2  ;;  %v2023_v0 = vadd.f32 %v2010_v38, %v1873_v42  ;;  %vm6009_vm15 = vcmask 519169   ;;  %v4575_v22 = vld [vmem:[%s6002_s5 + $0xd8] sm:$0xff] }
 0x2ea   : > { %v2118_v23 = vpop.f32.mrf.mxu3  ;;  %v2225_v28 = vsel %vm4994_vm10, %v2218_v15, %v2224_v49  ;;  %2237 = vst [vmem:[#allocation3 + $0x8] sm:$0x1] %v2236_v20  ;;  %vm2258_vm10 = vsmask.f32 2306  ;;  %vm2249_vm14 = vmand %vm6009_vm15, %vm2248_vm0  ;;  %v4579_v15 = vld [vmem:[%s6002_s5 + $0xf8] sm:$0xff]  ;;  %2747 = vmatpush.bf16.msra.mxu3 %v4575_v22  ;;  %v4565_v20 = vld [vmem:[%s6002_s5 + $0x88] sm:$0xff] }
 0x2eb   : > { %v2181_v33 = vsel %vm603_vm1, %v2179_v12, %v2180_v2  ;;  %2226 = vst [vmem:[#allocation3 + $0x4] sm:$0x3] %v2225_v28  ;;  %v2131_v59 = vadd.f32 %v2118_v23, %v2023_v0  ;;  %2609 = vmatpush.bf16.msra.mxu1 %v4566_v8  ;;  %vm2259_vm6 = vmand %vm6010_vm11, %vm2258_vm10  ;;  %2828 = vmatpush.bf16.msra.mxu0 %v4579_v15  ;;  %v4578_v12 = vld [vmem:[%s6002_s5 + $0xf0] sm:$0xff]  ;;  %v4564_v0 = vld [vmem:[%s6002_s5 + $0x80] sm:$0xff] }
 0x2ec   : > { %v2183_v26 = vmax.f32 %v2152_v21, %v2181_v33  ;;  %v4573_v28 = vld [vmem:[%s6002_s5 + $0xc8] sm:$0xff]  ;;  %vm6014_vm10 = vmmov %vm6011_vm8 }
 0x2ed   : > { %v2145_v24 = vadd.f32 %v5533_v9, %v2131_v59  ;;  %v4577_v33 = vld [vmem:[%s6002_s5 + $0xe8] sm:$0xff] }
 0x2ee   : > { %2184 = vst.msk [vmem:[#allocation2 + $0x10] sm:$0xff] %vm732_vm4, %v2183_v26  ;;  %v1862_v30 = vpop.f32.mrf.mxu1  ;;  %v5604_v27 = vld [vmem:[#allocation3] sm:$0xe]  ;;  %2748 = vmatpush.bf16.msra.mxu3 %v4574_v53 }
 0x2ef   : > { %v1874_v54 = vadd.f32 %v1862_v30, %v1732_v13  ;;  %v5618_v41 = vld [vmem:[#allocation3] sm:$0x8]  ;;  %v2155_v40 = vmax.f32 %v2145_v24, 0.0  ;;  %2610 = vmatpush.bf16.msra.mxu1 %v4565_v20  ;;  %v2416_v23 = vunpack.c.l.b16 %v5604_v27  ;;  %2829 = vmatpush.bf16.msra.mxu0 %v4578_v12 }
 0x2f0   : > { %v5620_v3 = vld [vmem:[#allocation3 + $0x4] sm:$0xc]  ;;  %v2485_v13 = vunpack.c.l.b16 %v5618_v41 }
 0x2f1   : > { %v2024_v5 = vadd.f32 %v2012_v46, %v1874_v54  ;;  %v5629_v14 = vld [vmem:[#allocation3 + $0x4] sm:$0x8]  ;;  %v2187_v31 = vrot.slane %v2155_v40, 2 }
 0x2f2   : > { %v2120_v29 = vpop.f32.mrf.mxu3  ;;  %v5616_v37 = vld [vmem:[#allocation3] sm:$0xff]   ;;  %2749 = vmatpush.bf16.msra.mxu3 %v4573_v28 }
 0x2f3   : > { %v2132_v34 = vadd.f32 %v2120_v29, %v2024_v5  ;;  %4077 = vmatmul.msk.bf16.vlgmr.msrb.gmra.mxu2 %vm732_vm4, %v5616_v37  ;;  %2939 = vst.msk [vmem:[#allocation3] sm:$0xf] %vm802_vm3, %v4783_v19  ;;  %v4627_v2 = vunpack.c.h.b16 %v5616_v37  ;;  %v2297_v59 = vshll.u32 %v5616_v37, 16  ;;  %2611 = vmatpush.bf16.msra.mxu1 %v4564_v0 }
 0x2f4   : > { %2940 = vst.msk [vmem:[#allocation3 + $0x4] sm:$0xf] %vm802_vm3, %v4783_v19  ;;  %2830 = vmatpush.bf16.msra.mxu0 %v4577_v33 }
 0x2f5   : > { %v2146_v52 = vadd.f32 %v5533_v9, %v2132_v34  ;;  %v4570_v9 = vld [vmem:[%s6002_s5 + $0xb0] sm:$0xff]  ;;  %v2417_v54 = vpack.c.b16 %v4627_v2, %v2416_v23  ;;  %v5691_v55 = vpack.c.b16 %v4627_v2, %v2485_v13  ;;  %v2299_v41 = vrot.slane %v2297_v59, 1  ;;  %v4572_v34 = vld [vmem:[%s6002_s5 + $0xc0] sm:$0xff] }
 0x2f6   : > { %2671 = vmatpush.bf16.msra.mxu2 %v4570_v9  ;;  %2750 = vmatpush.bf16.msra.mxu3 %v4572_v34  ;;  %v2764_v9 = vld [vmem:[#allocation3 + $0x10] sm:$0x7] }
 0x2f7   : > { %v2156_v45 = vmax.f32 %v2146_v52, 0.0  ;;  %v2418_v4 = vrot.slane %v2417_v54, 1  ;;  %v2558_v15 = vshrl.u32 %v5691_v55, 16  ;;  %v2561_v20 = vshll.u32 %v5691_v55, 16 }
 0x2f8   : > { %2831 = vmatpush.bf16.msra.mxu0 %v4576_v18 }
 0x2f9   : > { %v2188_v11 = vrot.slane %v2156_v45, 2  ;;  %v2489_v45 = vrot.slane %v5691_v55, 3  ;;  %v2560_v33 = vrot.slane %v2558_v15, 3 }
 0x2fa   : > { %2672 = vmatpush.bf16.msra.mxu2 %v4569_v56 }
 0x2fb   : > { %v2189_v58 = vsel %vm603_vm1, %v2187_v31, %v2188_v11  ;;  %v2193_v16 = vmax.f32 %v2155_v40, %v2188_v11  ;;  %v2295_v40 = vshrl.u32 %v5616_v37, 16  ;;  %v4583_v37 = vld [vmem:[%s6002_s5 + $0x118] sm:$0xff] }
 0x2fc   : > { %v2192_v36 = vmax.f32 %v2154_v47, %v2189_v58 }
 0x2fd   : > { %2195 = vst.msk [vmem:[#allocation2 + $0x1c] sm:$0xf] %vm802_vm3, %v2193_v16  ;;  %v2300_v16 = vor.u32 %v2299_v41, %v2295_v40 }
 0x2fe   : > { %2194 = vst.msk [vmem:[#allocation2 + $0x14] sm:$0xf0] %vm2174_vm9, %v2192_v36  ;;  %2673 = vmatpush.bf16.msra.mxu2 %v4568_v61 }
 0x305   : > { %v2197_v48 = vld [vmem:[#allocation2 + $0x10] ss:$2 sm:$0xff]  ;;  %v2199_v7 = vld [vmem:[#allocation2 + $0x11] ss:$2 sm:$0xff] }
 0x306   : > { %v2201_v17 = vmax.f32 %v2197_v48, %v2199_v7 }
 0x308   : > { %v2238_v6 = vpack.c.bf16 %v2201_v17, %v2201_v17  ;;  %v2775_v17 = vunpack.c.l.b16 %v2764_v9 }
 0x30a   : > { %v2240_v43 = vshrl.u32 %v2238_v6, 16  ;;  %v2243_v39 = vshll.u32 %v2238_v6, 16  ;;  %v2704_v6 = vunpack.c.l.b16 %v5620_v3 }
 0x30c   : > { %v2242_v51 = vrot.slane %v2240_v43, 6  ;;  %v2245_v50 = vrot.slane %v2243_v39, 7  ;;  %v2253_v38 = vrot.slane %v2240_v43, 5  ;;  %v2254_v1 = vrot.slane %v2243_v39, 6  ;;  %v2690_v43 = vld [vmem:[#allocation3 + $0x10] sm:$0x3] }
 0x30e   : > { %v2246_v10 = vor.u32 %v2245_v50, %v2242_v51  ;;  %v2255_v25 = vor.u32 %v2254_v1, %v2253_v38  ;;  %v2707_v1 = vunpack.c.l.b16 %v2690_v43 }
 0x310   : > { %v2251_v47 = vsel %vm2249_vm14, %v2246_v10, %v2250_v60  ;;  %v2256_v42 = vrot.slane %v2255_v25, 4  ;;  %v4581_v60 = vld [vmem:[%s6002_s5 + $0x108] sm:$0xff]  ;;  %vm6015_vm14 = vmmov %vm6011_vm8 }
 0x311   : > { %2252 = vst [vmem:[#allocation3 + $0x8] sm:$0xe] %v2251_v47  ;;  %v4580_v47 = vld [vmem:[%s6002_s5 + $0x100] sm:$0xff] }
 0x312   : > { %v2261_v49 = vsel %vm2259_vm6, %v2256_v42, %v2260_v35 }
 0x313   : > { %2262 = vst [vmem:[#allocation3 + $0xc] sm:$0x7] %v2261_v49 }
 0x318   : > { %v2265_v21 = vld [vmem:[#allocation3 + $0x8] sm:$0xf] }
 0x319   : > { %v2290_v26 = vunpack.c.l.b16 %v2265_v21 }
 0x31a   : > { %v2274_v30 = vld [vmem:[#allocation3 + $0xc] sm:$0x1] }
 0x31b   : > { %v2473_v46 = vld [vmem:[#allocation3 + $0xc] sm:$0x7]  ;;  %v2357_v27 = vpack.c.b16 %v2290_v26, %v2290_v26  ;;  %v2291_v24 = vunpack.c.l.b16 %v2274_v30  ;;  %v2634_v44 = vpack.c.b16 %v2290_v26, %v4627_v2 }
 0x31c   : > { %v2486_v5 = vunpack.c.l.b16 %v2473_v46  ;;  %v5693_v63 = vld [vmem:[#allocation3 + $0x8] sm:$0xff]  }
 0x31d   : > { %2942 = vst.msk [vmem:[#allocation3 + $0x8] sm:$0x3] %vm6011_vm8, %v4783_v19  ;;  %4078 = vmatmul.msk.bf16.gmra.mxu2 %vm732_vm4, %v2357_v27  ;;  %v2293_v32 = vpack.c.b16 %v2291_v24, %v2290_v26  ;;  %v2543_v56 = vld [vmem:[#allocation3 + $0xc] sm:$0xf]  ;;  %v4630_v48 = vunpack.c.l.b16 %v5693_v63  ;;  %v4631_v7 = vunpack.c.h.b16 %v5693_v63  ;;  %v2856_v63 = vunpack.c.l.b16 %v5629_v14 }
 0x31e   : > { %v2488_v29 = vpack.c.b16 %v2486_v5, %v2290_v26  ;;  %v2554_v8 = vunpack.c.l.b16 %v2543_v56 }
 0x31f   : > { %v2419_v52 = vrot.slane %v2293_v32, 1  ;;  %v2302_v31 = vshll.u32 %v2293_v32, 16  ;;  %v2306_v61 = vshrl.u32 %v2293_v32, 16  ;;  %v2708_v39 = vpack.c.b16 %v4630_v48, %v2704_v6 }
 0x320   : > { %v2490_v19 = vrot.slane %v2488_v29, 3  ;;  %v2776_v51 = vpack.c.b16 %v2775_v17, %v4631_v7  ;;  %v2555_v38 = vpack.c.b16 %v2554_v8, %v2290_v26  ;;  %v2709_v22 = vpack.c.b16 %v2707_v1, %v4631_v7 }
 0x321   : > { %v2420_v11 = vsel %vm1238_vm2, %v2418_v4, %v2419_v52  ;;  %v2304_v36 = vrot.slane %v2302_v31, 1  ;;  %v2778_v10 = vshrl.u32 %v2708_v39, 16  ;;  %v2781_v25 = vshll.u32 %v2708_v39, 16 }
 0x322   : > { %v2491_v58 = vsel %vm6007_vm7, %v2489_v45, %v2490_v19  ;;  %4103 = vmatmul.msk.bf16.vlgmr.msrb.gmra.mxu3 %vm732_vm4, %v2420_v11  ;;  %v2786_v3 = vshrl.u32 %v2776_v51, 16  ;;  %v2789_v35 = vshll.u32 %v2776_v51, 16  ;;  %v2566_v42 = vshrl.u32 %v2555_v38, 16 }
 0x323   : > { %4129 = vmatmul.msk.bf16.vlgmr.msrb.gmra.mxu0 %vm732_vm4, %v2491_v58  ;;  %v2305_v57 = vsel %vm1039_vm12, %v2300_v16, %v2304_v36  ;;  %v2308_v50 = vor.u32 %v2306_v61, %v2304_v36  ;;  %v2569_v49 = vshll.u32 %v2555_v38, 16  ;;  %v2780_v53 = vrot.slane %v2778_v10, 2 }
 0x324   : > { %4059 = vmatmul.msk.bf16.vlgmr.msrb.gmra.mxu1 %vm732_vm4, %v2305_v57  ;;  %v2783_v12 = vrot.slane %v2781_v25, 3  ;;  %v2788_v2 = vrot.slane %v2786_v3, 2  ;;  %v2791_v0 = vrot.slane %v2789_v35, 3  ;;  %v2568_v21 = vrot.slane %v2566_v42, 3 }
 0x325   : > { %2895 = vmatpush.bf16.msrb.mxu1 %v4583_v37  ;;  %v2571_v23 = vrot.slane %v2569_v49, 4  ;;  %v2635_v28 = vpack.c.b16 %v2554_v8, %v2554_v8  ;;  %v2563_v26 = vrot.slane %v2561_v20, 4  ;;  %v2710_v13 = vrot.slane %v2708_v39, 2 }
 0x326   : > { %v2711_v59 = vrot.slane %v2709_v22, 2  ;;  %v2784_v30 = vor.u32 %v2783_v12, %v2780_v53  ;;  %v2792_v54 = vor.u32 %v2791_v0, %v2788_v2  ;;  %vm2556_vm2 = vsmask.f32 4352 }
 0x327   : > { %v2572_v46 = vor.u32 %v2571_v23, %v2568_v21  ;;  %v2564_v5 = vor.u32 %v2563_v26, %v2560_v33  ;;  %v2857_v32 = vpack.c.b16 %v4630_v48, %v2856_v63  ;;  %v2859_v41 = vrot.slane %v2776_v51, 3 }
 0x328   : > { %v2712_v27 = vsel %vm603_vm1, %v2710_v13, %v2711_v59  ;;  %v2793_v24 = vsel %vm1888_vm5, %v2784_v30, %v2792_v54  ;;  %vm6012_vm1 = vmmov %vm6007_vm7  ;;  %vm2924_vm12 = vcmask 1041408   ;;  %vm2963_vm5 = vsmask.f32 1282 }
 0x329   : > { %2896 = vmatpush.bf16.msrb.mxu1 %v4582_v62  ;;  %v2573_v55 = vsel %vm2556_vm2, %v2564_v5, %v2572_v46  ;;  %v2858_v29 = vrot.slane %v2857_v32, 3  ;;  %vm2964_vm15 = vmand %vm6014_vm10, %vm2963_vm5 }
 0x32b   : > { %v2860_v34 = vsel %vm6012_vm1, %v2858_v29, %v2859_v41  ;;  %v4591_v29 = vld [vmem:[%s5963_s7 + $0x38] sm:$0xff] }
 0x32c   : > { %3030 = vmatpush.bf16.msrb.mxu2 %v4591_v29 }
 0x32d   : > { %4181 = vmatmul.msk.bf16.vlgmr.msra.gmra.mxu2 %vm732_vm4, %v2634_v44  ;;  %2897 = vmatpush.bf16.msrb.mxu1 %v4581_v60 }
 0x331   : > { %2898 = vmatpush.bf16.msrb.mxu1 %v4580_v47 }
 0x332   : > { %4104 = vmatmul.msk.bf16.gmra.mxu3 %vm732_vm4, %v2419_v52 }
 0x333   : > { %4130 = vmatmul.msk.bf16.gmra.mxu0 %vm732_vm4, %v2490_v19 }
 0x334   : > { %4060 = vmatmul.msk.bf16.gmra.mxu1 %vm732_vm4, %v2308_v50 }
 0x33d   : > { %4182 = vmatmul.msk.bf16.gmra.mxu2 %vm732_vm4, %v2635_v28 }
 0x342   : > { %4207 = vmatmul.msk.bf16.vlgmr.msra.gmra.mxu3 %vm732_vm4, %v2712_v27 }
 0x343   : > { %4233 = vmatmul.msk.bf16.vlgmr.msra.gmra.mxu0 %vm732_vm4, %v2793_v24 }
 0x344   : > { %4155 = vmatmul.msk.bf16.vlgmr.msra.gmra.mxu1 %vm732_vm4, %v2573_v55 }
 0x352   : > { %4208 = vmatmul.msk.bf16.gmra.mxu3 %vm732_vm4, %v2711_v59  ;;  %v4684_v59 = vld [vmem:[%s5962_s6] ss:$0 sm:$0xff] }
 0x353   : > { %4234 = vmatmul.msk.bf16.gmra.mxu0 %vm732_vm4, %v2792_v54 }
 0x354   : > { %4156 = vmatmul.msk.bf16.gmra.mxu1 %vm732_vm4, %v2572_v46 }
 0x364   : > { %4259 = vmatmul.msk.bf16.vlgmr.msrb.gmra.mxu1 %vm732_vm4, %v2860_v34  ;;  %v4611_v34 = vld [vmem:[%s5963_s7 + $0xd8] sm:$0xff] }
 0x365   : > { %3350 = vmatpush.bf16.msra.mxu1 %v4611_v34 }
 0x374   : > { %4260 = vmatmul.msk.bf16.gmra.mxu1 %vm732_vm4, %v2859_v41  ;;  %v4587_v41 = vld [vmem:[%s5963_s7 + $0x18] sm:$0xff] }
 0x375   : > { %3070 = vmatpush.bf16.msrb.mxu3 %v4587_v41 }
 0x376   : > { %v2396_v18 = vpop.f32.mrf.mxu2 }
 0x37e   : > { %v2398_v4 = vpop.f32.mrf.mxu2 }
 0x3a0   : > { %v2531_v40 = vpop.f32.mrf.mxu0  ;;  %v2401_v52 = vpop.f32.mrf.mxu2 }
 0x3a1   : > { %v2348_v45 = vpop.f32.mrf.mxu1 }
 0x3a2   : > { %v2397_v19 = vadd.f32 %v2396_v18, %v2348_v45  ;;  %v4586_v45 = vld [vmem:[%s5963_s7 + $0x10] sm:$0xff] }
 0x3a3   : > { %3071 = vmatpush.bf16.msrb.mxu3 %v4586_v45 }
 0x3a5   : > { %v2460_v31 = vpop.f32.mrf.mxu3 }
 0x3a6   : > { %v2469_v11 = vadd.f32 %v2460_v31, %v2397_v19  ;;  %v4595_v19 = vld [vmem:[%s5963_s7 + $0x58] sm:$0xff] }
 0x3a7   : > { %3124 = vmatpush.bf16.msrb.mxu0 %v4595_v19 }
 0x3a8   : > { %v2533_v58 = vpop.f32.mrf.mxu0  ;;  %v2403_v16 = vpop.f32.mrf.mxu2  ;;  %v2540_v14 = vadd.f32 %v2531_v40, %v2469_v11  ;;  %v4610_v11 = vld [vmem:[%s5963_s7 + $0xd0] sm:$0xff] }
 0x3a9   : > { %v2350_v36 = vpop.f32.mrf.mxu1  ;;  %3351 = vmatpush.bf16.msra.mxu1 %v4610_v11 }
 0x3aa   : > { %v2399_v10 = vadd.f32 %v2398_v4, %v2350_v36 }
 0x3ad   : > { %v2462_v57 = vpop.f32.mrf.mxu3 }
 0x3ae   : > { %v2470_v3 = vadd.f32 %v2462_v57, %v2399_v10  ;;  %v4599_v10 = vld [vmem:[%s5963_s7 + $0x78] sm:$0xff] }
 0x3b0   : > { %v2536_v37 = vpop.f32.mrf.mxu0  ;;  %v2675_v62 = vpop.f32.mrf.mxu2  ;;  %v2541_v22 = vadd.f32 %v2533_v58, %v2470_v3 }
 0x3b1   : > { %v2353_v9 = vpop.f32.mrf.mxu1 }
 0x3b2   : > { %v2402_v15 = vadd.f32 %v2401_v52, %v2353_v9  ;;  %v4590_v52 = vld [vmem:[%s5963_s7 + $0x30] sm:$0xff]  ;;  %v4609_v9 = vld [vmem:[%s5963_s7 + $0xc8] sm:$0xff] }
 0x3b3   : > { %3031 = vmatpush.bf16.msrb.mxu2 %v4590_v52  ;;  %3352 = vmatpush.bf16.msra.mxu1 %v4609_v9 }
 0x3b5   : > { %v2465_v44 = vpop.f32.mrf.mxu3 }
 0x3b6   : > { %v2471_v12 = vadd.f32 %v2465_v44, %v2402_v15 }
 0x3b8   : > { %v2538_v56 = vpop.f32.mrf.mxu0  ;;  %v2677_v48 = vpop.f32.mrf.mxu2  ;;  %v2542_v23 = vadd.f32 %v2536_v37, %v2471_v12  ;;  %v4585_v37 = vld [vmem:[%s5963_s7 + $0x8] sm:$0xff] }
 0x3b9   : > { %v2355_v7 = vpop.f32.mrf.mxu1  ;;  %3072 = vmatpush.bf16.msrb.mxu3 %v4585_v37  ;;  %v4615_v37 = vld [vmem:[%s5963_s7 + $0xf8] sm:$0xff] }
 0x3bd   : > { %v2467_v17 = vpop.f32.mrf.mxu3 }
 0x3be   : > { %v4608_v17 = vld [vmem:[%s5963_s7 + $0xc0] sm:$0xff] }
 0x3bf   : > { %3353 = vmatpush.bf16.msra.mxu1 %v4608_v17 }
 0x3c0   : > { %v2833_v8 = vpop.f32.mrf.mxu0  ;;  %v2680_v6 = vpop.f32.mrf.mxu2 }
 0x3c1   : > { %v2613_v61 = vpop.f32.mrf.mxu1 }
 0x3c2   : > { %v2622_v35 = vadd.f32 %v2613_v61, %v2540_v14  ;;  %v4594_v14 = vld [vmem:[%s5963_s7 + $0x50] sm:$0xff]  ;;  %v4603_v61 = vld [vmem:[%s5963_s7 + $0x98] sm:$0xff] }
 0x3c3   : > { %3125 = vmatpush.bf16.msrb.mxu0 %v4594_v14 }
 0x3c4   : > { %v2684_v49 = vadd.f32 %v2675_v62, %v2622_v35  ;;  %v4589_v62 = vld [vmem:[%s5963_s7 + $0x28] sm:$0xff]  ;;  %v4606_v35 = vld [vmem:[%s5963_s7 + $0xb0] sm:$0xff] }
 0x3c5   : > { %v2752_v43 = vpop.f32.mrf.mxu3  ;;  %3032 = vmatpush.bf16.msrb.mxu2 %v4589_v62  ;;  %v4616_v62 = vld [vmem:[%s5963_s7 + $0x100] sm:$0xff] }
 0x3c6   : > { %v2761_v2 = vadd.f32 %v2752_v43, %v2684_v49  ;;  %v4588_v43 = vld [vmem:[%s5963_s7 + $0x20] sm:$0xff] }
 0x3c8   : > { %v2835_v39 = vpop.f32.mrf.mxu0  ;;  %v2682_v51 = vpop.f32.mrf.mxu2  ;;  %v2842_v28 = vadd.f32 %v2833_v8, %v2761_v2  ;;  %v4605_v2 = vld [vmem:[%s5963_s7 + $0xa8] sm:$0xff] }
 0x3c9   : > { %v2615_v50 = vpop.f32.mrf.mxu1  ;;  %v4602_v51 = vld [vmem:[%s5963_s7 + $0x90] sm:$0xff]  ;;  %3033 = vmatpush.bf16.msrb.mxu2 %v4588_v43 }
 0x3ca   : > { %v2623_v20 = vadd.f32 %v2615_v50, %v2541_v22  ;;  %v4607_v50 = vld [vmem:[%s5963_s7 + $0xb8] sm:$0xff]  ;;  %v4600_v22 = vld [vmem:[%s5963_s7 + $0x80] sm:$0xff] }
 0x3cc   : > { %v2685_v0 = vadd.f32 %v2677_v48, %v2623_v20  ;;  %v4584_v48 = vld [vmem:[%s5963_s7] sm:$0xff] }
 0x3cd   : > { %v2754_v38 = vpop.f32.mrf.mxu3  ;;  %3073 = vmatpush.bf16.msrb.mxu3 %v4584_v48  ;;  %3182 = vmatpush.bf16.msra.mxu2 %v4599_v10 }
 0x3ce   : > { %v2762_v33 = vadd.f32 %v2754_v38, %v2685_v0  ;;  %v4597_v0 = vld [vmem:[%s5963_s7 + $0x68] sm:$0xff] }
 0x3d0   : > { %v2838_v1 = vpop.f32.mrf.mxu0  ;;  %v2843_v46 = vadd.f32 %v2835_v39, %v2762_v33  ;;  %v4592_v39 = vld [vmem:[%s5963_s7 + $0x40] sm:$0xff] }
 0x3d1   : > { %v2618_v60 = vpop.f32.mrf.mxu1  ;;  %3244 = vmatpush.bf16.msra.mxu3 %v4603_v61  ;;  %v2965_v33 = vld [vmem:[#allocation3 + $0x4] sm:$0x3]  ;;  %v4613_v61 = vld [vmem:[%s5963_s7 + $0xe8] sm:$0xff] }
 0x3d2   : > { %v2624_v26 = vadd.f32 %v2618_v60, %v2542_v23 }
 0x3d4   : > { %v2686_v30 = vadd.f32 %v2680_v6, %v2624_v26  ;;  %v4593_v6 = vld [vmem:[%s5963_s7 + $0x48] sm:$0xff] }
 0x3d5   : > { %v2757_v25 = vpop.f32.mrf.mxu3  ;;  %3126 = vmatpush.bf16.msrb.mxu0 %v4593_v6  ;;  %3245 = vmatpush.bf16.msra.mxu3 %v4602_v51  ;;  %v3361_v51 = vld [vmem:[#allocation3 + $0x8] sm:$0x1] }
 0x3d6   : > { %v2763_v5 = vadd.f32 %v2757_v25, %v2686_v30  ;;  %v4601_v25 = vld [vmem:[%s5963_s7 + $0x88] sm:$0xff]  ;;  %v4596_v30 = vld [vmem:[%s5963_s7 + $0x60] sm:$0xff]  ;;  %v3374_v10 = vunpack.c.l.b16 %v3361_v51 }
 0x3d8   : > { %v2840_v47 = vpop.f32.mrf.mxu0  ;;  %v2844_v40 = vadd.f32 %v2838_v1, %v2763_v5 }
 0x3d9   : > { %v2620_v42 = vpop.f32.mrf.mxu1  ;;  %3127 = vmatpush.bf16.msrb.mxu0 %v4592_v39  ;;  %v4598_v47 = vld [vmem:[%s5963_s7 + $0x70] sm:$0xff]  ;;  %3246 = vmatpush.bf16.msra.mxu3 %v4601_v25 }
 0x3da   : > { %3183 = vmatpush.bf16.msra.mxu2 %v4598_v47 }
 0x3dd   : > { %v2759_v53 = vpop.f32.mrf.mxu3  ;;  %3299 = vmatpush.bf16.msra.mxu0 %v4607_v50  ;;  %3247 = vmatpush.bf16.msra.mxu3 %v4600_v22 }
 0x3de   : > { %3184 = vmatpush.bf16.msra.mxu2 %v4597_v0 }
 0x3e1   : > { %v2900_v21 = vpop.f32.mrf.mxu1  ;;  %3300 = vmatpush.bf16.msra.mxu0 %v4606_v35 }
 0x3e2   : > { %v2909_v13 = vadd.f32 %v2900_v21, %v2842_v28  ;;  %v2955_v21 = vld [vmem:[#allocation3] sm:$0xc]  ;;  %3185 = vmatpush.bf16.msra.mxu2 %v4596_v30 }
 0x3e4   : > { %v2916_v54 = vadd.f32 %v4684_v59, %v2909_v13 }
 0x3e5   : > { %3301 = vmatpush.bf16.msra.mxu0 %v4605_v2 }
 0x3e6   : > { %v2919_v55 = vmax.f32 %v2916_v54, 0.0 }
 0x3e8   : > { %v2925_v18 = vrot.slane %v2919_v55, 6 }
 0x3e9   : > { %v2902_v27 = vpop.f32.mrf.mxu1 }
 0x3ea   : > { %v2910_v24 = vadd.f32 %v2902_v27, %v2843_v46  ;;  %v4619_v46 = vld [vmem:[%s5963_s7 + $0x118] sm:$0xff] }
 0x3ec   : > { %v2917_v63 = vadd.f32 %v4684_v59, %v2910_v24 }
 0x3ee   : > { %v2920_v32 = vmax.f32 %v2917_v63, 0.0 }
 0x3f0   : > { %v2926_v4 = vrot.slane %v2920_v32, 6 }
 0x3f1   : > { %v2905_v31 = vpop.f32.mrf.mxu1 }
 0x3f2   : > { %v2927_v58 = vsel %vm2924_vm12, %v2925_v18, %v2926_v4  ;;  %v2911_v16 = vadd.f32 %v2905_v31, %v2844_v40  ;;  %v4617_v31 = vld [vmem:[%s5963_s7 + $0x108] sm:$0xff] }
 0x3f3   : > { %v2929_v36 = vmax.f32 %v2919_v55, %v2927_v58  ;;  %v4618_v55 = vld [vmem:[%s5963_s7 + $0x110] sm:$0xff] }
 0x3f4   : > { %v2918_v57 = vadd.f32 %v4684_v59, %v2911_v16  ;;  %v4604_v59 = vld [vmem:[%s5963_s7 + $0xa0] sm:$0xff] }
 0x3f5   : > { %2930 = vst.msk [vmem:[#allocation2] sm:$0xf] %vm802_vm3, %v2929_v36  ;;  %vm2953_vm3 = vsmask.f32 3338  ;;  %3302 = vmatpush.bf16.msra.mxu0 %v4604_v59 }
 0x3f6   : > { %v2921_v44 = vmax.f32 %v2918_v57, 0.0 }
 0x3f8   : > { %v2932_v56 = vrot.slane %v2921_v44, 6 }
 0x3f9   : > { %v2907_v7 = vpop.f32.mrf.mxu1 }
 0x3fa   : > { %v2934_v8 = vmax.f32 %v2920_v32, %v2932_v56  ;;  %v4614_v7 = vld [vmem:[%s5963_s7 + $0xf0] sm:$0xff] }
 0x3fc   : > { %2935 = vst.msk [vmem:[#allocation2] sm:$0xf0] %vm2174_vm9, %v2934_v8  ;;  %vm6013_vm9 = vcmask 519170  }
 0x3fd   : > { %vm2954_vm0 = vmand %vm6013_vm9, %vm2953_vm3 }
 0x403   : > { %v2936_v38 = vld [vmem:[#allocation2] ss:$2 sm:$0xf]  ;;  %v2937_v1 = vld [vmem:[#allocation2 + $0x1] ss:$2 sm:$0xf] }
 0x404   : > { %v2938_v60 = vmax.f32 %v2936_v38, %v2937_v1  ;;  %v4612_v38 = vld [vmem:[%s5963_s7 + $0xe0] sm:$0xff] }
 0x406   : > { %v2943_v3 = vpack.c.bf16 %v2938_v60, %v2938_v60 }
 0x408   : > { %v2945_v42 = vshrl.u32 %v2943_v3, 16  ;;  %v2948_v49 = vshll.u32 %v2943_v3, 16 }
 0x40a   : > { %v2958_v15 = vrot.slane %v2945_v42, 4  ;;  %v2959_v20 = vrot.slane %v2948_v49, 5  ;;  %v2947_v53 = vrot.slane %v2945_v42, 5  ;;  %v2950_v12 = vrot.slane %v2948_v49, 6 }
 0x40c   : > { %v2960_v23 = vor.u32 %v2959_v20, %v2958_v15  ;;  %v2951_v28 = vor.u32 %v2950_v12, %v2947_v53 }
 0x40e   : > { %v2961_v26 = vrot.slane %v2960_v23, 4  ;;  %v2956_v13 = vsel %vm2954_vm0, %v2951_v28, %v2955_v21 }
 0x40f   : > { %2957 = vst [vmem:[#allocation3] sm:$0xc] %v2956_v13 }
 0x410   : > { %v2966_v54 = vsel %vm2964_vm15, %v2961_v26, %v2965_v33 }
 0x411   : > { %2967 = vst [vmem:[#allocation3 + $0x4] sm:$0x3] %v2966_v54 }
 0x416   : > { %v2968_v27 = vld [vmem:[#allocation3] sm:$0xf] }
 0x417   : > { %v3079_v24 = vld [vmem:[#allocation3] sm:$0xe]  ;;  %4302 = vmatmul.msk.bf16.vlgmr.msrb.gmra.mxu3 %vm732_vm4, %v2968_v27  ;;  %v2989_v32 = vunpack.c.l.b16 %v2968_v27  ;;  %v3501_v27 = vld [vmem:[%s5965_s9 + $0x38] sm:$0xff] }
 0x418   : > { %v3134_v5 = vld [vmem:[#allocation3] sm:$0xc]  ;;  %v2977_v63 = vld [vmem:[#allocation3 + $0x4] sm:$0x1]  ;;  %3469 = vmatpush.bf16.msrb.mxu3 %v4619_v46  ;;  %v3090_v18 = vunpack.c.l.b16 %v3079_v24  ;;  %v3424_v50 = vld [vmem:[#allocation3 + $0x4] sm:$0xe] }
 0x419   : > { %v3309_v29 = vld [vmem:[#allocation3 + $0x4] sm:$0xf]  ;;  %v2990_v34 = vunpack.c.l.b16 %v2977_v63  ;;  %v3147_v4 = vunpack.c.l.b16 %v3134_v5  ;;  %v3254_v48 = vld [vmem:[#allocation3] sm:$0x8]  ;;  %v3435_v25 = vunpack.c.l.b16 %v3424_v50  ;;  %v3500_v24 = vld [vmem:[%s5965_s9 + $0x30] sm:$0xff] }
 0x41a   : > { %v3192_v41 = vld [vmem:[#allocation3 + $0x4] sm:$0x7]  ;;  %4427 = vmatmul.msk.bf16.vlgmr.msra.gmra.mxu1 %vm732_vm4, %v3309_v29  ;;  %v3265_v6 = vunpack.c.l.b16 %v3254_v48 }
 0x41b   : > { %v3203_v40 = vunpack.c.l.b16 %v3192_v41  ;;  %v2991_v52 = vpack.c.b16 %v2990_v34, %v2989_v32  ;;  %v3091_v45 = vpack.c.b16 %v2990_v34, %v3090_v18  ;;  %v3135_v8 = vld [vmem:[#allocation3 + $0x4] sm:$0x3]  ;;  %v3436_v47 = vpack.c.b16 %v3374_v10, %v3435_v25  ;;  %v3497_v34 = vld [vmem:[%s5965_s9 + $0x18] sm:$0xff] }
 0x41c   : > { %3470 = vmatpush.bf16.msrb.mxu3 %v4618_v55  ;;  %v3148_v39 = vunpack.c.l.b16 %v3135_v8  ;;  %v3360_v3 = vld [vmem:[#allocation3 + $0x4] sm:$0xf]  ;;  %v3499_v55 = vld [vmem:[%s5965_s9 + $0x28] sm:$0xff] }
 0x41d   : > { %v3204_v19 = vpack.c.b16 %v3203_v40, %v3147_v4  ;;  %v2995_v11 = vshll.u32 %v2991_v52, 16  ;;  %v3092_v58 = vrot.slane %v3091_v45, 1  ;;  %v2993_v36 = vshrl.u32 %v2991_v52, 16  ;;  %v3498_v29 = vld [vmem:[%s5965_s9 + $0x20] sm:$0xff]  ;;  %v3495_v52 = vld [vmem:[%s5965_s9 + $0x8] sm:$0xff] }
 0x41e   : > { %v3266_v43 = vpack.c.b16 %v3203_v40, %v3265_v6  ;;  %v3149_v60 = vpack.c.b16 %v3148_v39, %v3147_v4  ;;  %v3373_v42 = vunpack.c.l.b16 %v3360_v3  ;;  %v3437_v49 = vrot.slane %v3436_v47, 1  ;;  %v3496_v4 = vld [vmem:[%s5965_s9 + $0x10] sm:$0xff] }
 0x41f   : > { %v3206_v16 = vshrl.u32 %v3204_v19, 16  ;;  %v3209_v14 = vshll.u32 %v3204_v19, 16  ;;  %v2997_v57 = vrot.slane %v2995_v11, 1  ;;  %4327 = vmatmul.msk.bf16.vlgmr.msrb.gmra.mxu0 %vm732_vm4, %v3092_v58  ;;  %v3494_v19 = vld [vmem:[%s5965_s9] sm:$0xff] }
 0x420   : > { %3471 = vmatpush.bf16.msrb.mxu3 %v4617_v31  ;;  %v3267_v1 = vrot.slane %v3266_v43, 3  ;;  %v3150_v35 = vrot.slane %v3149_v60, 2  ;;  %v3375_v22 = vpack.c.b16 %v3374_v10, %v3373_v42  ;;  %3514 = vmatpush.msrb.mxu0 %v3501_v27 }
 0x421   : > { %v2998_v9 = vor.u32 %v2997_v57, %v2993_v36  ;;  %v3208_v44 = vrot.slane %v3206_v16, 2  ;;  %v3211_v56 = vrot.slane %v3209_v14, 3  ;;  %v4685_v36 = vld [vmem:[%s5964_s8] ss:$0 sm:$0xff] }
 0x422   : > { %v3379_v15 = vshll.u32 %v3375_v22, 16  ;;  %v3377_v53 = vshrl.u32 %v3375_v22, 16  ;;  %3515 = vmatpush.msrb.mxu0 %v3500_v24 }
 0x423   : > { %4285 = vmatmul.msk.bf16.vlgmr.msrb.gmra.mxu2 %vm732_vm4, %v2998_v9  ;;  %v3212_v17 = vor.u32 %v3211_v56, %v3208_v44 }
 0x424   : > { %3414 = vmatpush.bf16.msrb.mxu2 %v4615_v37  ;;  %3472 = vmatpush.bf16.msrb.mxu3 %v4616_v62  ;;  %v3381_v20 = vrot.slane %v3379_v15, 1 }
 0x425   : > { %3516 = vmatpush.msrb.mxu0 %v3499_v55 }
 0x426   : > { %v3382_v12 = vor.u32 %v3381_v20, %v3377_v53 }
 0x427   : > { %4377 = vmatmul.msk.bf16.vlgmr.msra.gmra.mxu3 %vm732_vm4, %v3212_v17  ;;  %3517 = vmatpush.msrb.mxu0 %v3498_v29 }
 0x428   : > { %3415 = vmatpush.bf16.msrb.mxu2 %v4614_v7 }
 0x429   : > { %3518 = vmatpush.msrb.mxu0 %v3497_v34 }
 0x42b   : > { %3519 = vmatpush.msrb.mxu0 %v3496_v4 }
 0x42c   : > { %3416 = vmatpush.bf16.msrb.mxu2 %v4613_v61 }
 0x42d   : > { %3520 = vmatpush.msrb.mxu0 %v3495_v52 }
 0x42f   : > { %4402 = vmatmul.msk.bf16.vlgmr.msra.gmra.mxu0 %vm732_vm4, %v3267_v1 }
 0x430   : > { %3417 = vmatpush.bf16.msrb.mxu2 %v4612_v38  ;;  %3521 = vmatpush.msrb.mxu0 %v3494_v19 }
 0x433   : > { %4352 = vmatmul.msk.bf16.vlgmr.msra.gmra.mxu2 %vm732_vm4, %v3150_v35 }
 0x437   : > { %4477 = vmatmul.msk.bf16.vlgmr.msrb.gmra.mxu3 %vm732_vm4, %v3437_v49 }
 0x443   : > { %4452 = vmatmul.msk.bf16.vlgmr.msrb.gmra.mxu2 %vm732_vm4, %v3382_v12 }
 0x497   : > { %v3355_v2 = vpop.f32.mrf.mxu1 }
 0x49a   : > { %v3075_v0 = vpop.f32.mrf.mxu3 }
 0x49c   : > { %v3129_v21 = vpop.f32.mrf.mxu0 }
 0x49f   : > { %v3357_v23 = vpop.f32.mrf.mxu1 }
 0x4a2   : > { %v3077_v28 = vpop.f32.mrf.mxu3 }
 0x4a4   : > { %v3131_v33 = vpop.f32.mrf.mxu0 }
 0x4a6   : > { %v3035_v26 = vpop.f32.mrf.mxu2 }
 0x4a7   : > { %v3076_v46 = vadd.f32 %v3075_v0, %v3035_v26 }
 0x4a9   : > { %v3133_v32 = vadd.f32 %v3129_v21, %v3076_v46 }
 0x4aa   : > { %v3249_v13 = vpop.f32.mrf.mxu3 }
 0x4ac   : > { %v3304_v59 = vpop.f32.mrf.mxu0 }
 0x4ae   : > { %v3037_v30 = vpop.f32.mrf.mxu2 }
 0x4b2   : > { %v3251_v54 = vpop.f32.mrf.mxu3 }
 0x4b4   : > { %v3306_v5 = vpop.f32.mrf.mxu0 }
 0x4b6   : > { %v3187_v63 = vpop.f32.mrf.mxu2 }
 0x4b7   : > { %v3191_v41 = vadd.f32 %v3187_v63, %v3133_v32 }
 0x4b9   : > { %v3253_v40 = vadd.f32 %v3249_v13, %v3191_v41 }
 0x4ba   : > { %v3474_v18 = vpop.f32.mrf.mxu3 }
 0x4bb   : > { %v3308_v31 = vadd.f32 %v3304_v59, %v3253_v40 }
 0x4bd   : > { %v3359_v58 = vadd.f32 %v3355_v2, %v3308_v31 }
 0x4be   : > { %v3189_v45 = vpop.f32.mrf.mxu2 }
 0x4c2   : > { %v3476_v11 = vpop.f32.mrf.mxu3 }
 0x4c6   : > { %v3419_v16 = vpop.f32.mrf.mxu2 }
 0x4c7   : > { %v3423_v14 = vadd.f32 %v3419_v16, %v3359_v58 }
 0x4c9   : > { %v3478_v57 = vadd.f32 %v3474_v18, %v3423_v14 }
 0x4cb   : > { %v3483_v37 = vadd.f32 %v4685_v36, %v3478_v57 }
 0x4cd   : > { %v3484_v62 = vmax.f32 %v3483_v37, 0.0 }
 0x4ce   : > { %v3421_v9 = vpop.f32.mrf.mxu2 }
 0x4cf   : > { %v3486_v44 = vrot.slane %v3484_v62, 4 }
 0x4d1   : > { %v3488_v56 = vmax.f32 %v3484_v62, %v3486_v44 }
 0x4d3   : > { %3489 = vst.msk [vmem:[#allocation2] sm:$0x3] %vm6015_vm14, %v3488_v56 }
 0x4da   : > { %v3490_v48 = vld [vmem:[#allocation2] ss:$2 sm:$0x1]  ;;  %v3491_v7 = vld [vmem:[#allocation2 + $0x1] ss:$2 sm:$0x1] }
 0x4db   : > { %v3492_v17 = vmax.f32 %v3490_v48, %v3491_v7 }
 0x4dd   : > { %4478 = vmatmul.msk.f32.vlgmr.msrb.gmra.mxu0 %vm732_vm4, %v3492_v17  ;;  %3493 = vst.msk [vmem:[%s409_s29] sm:$0x1] %vm906_vm13, %v3492_v17 }
 0x4de   : > { %4713 = shalt.err (!%p4710_p3)
}
 0x4df   : > { %4636 = dma.vmem_to_hbm [thread:$0]  (%p4887_p5), %s3543_s16, 16, %s3545_s0, %s3528_s19   ;;  %v3502_v8 = vld [vmem:[%s5966_s10] sm:$0x1] }
 0x4e0   : > { %s3553_s1 = scalar_lea.hbm %s5968_s12, %s4870_s25  ;;  %s415_s4 = scalar_lea.vmem [#allocation6], %s5900_s28 }
 0x4e1   : > { %s3555_s3 = sshll.u32 %s415_s4, 4  ;;  %s3557_s5 = sshll.u32 %s3553_s1, 4  ;;  %s3556_s3 = int_to_ptr.vmem [resolvable:$true] %s3555_s3  ;;  %s3558_s5 = int_to_ptr.hbm [resolvable:$true] %s3557_s5 }
 0x4e2   : > { %s3532_s18 = scalar_lea.sflag [#allocation7], %s5900_s28  ;;  %s4728_s20 = sshra.s32 %s3558_s5, 4  ;;  %s4729_s20 = int_to_ptr.hbm [resolvable:$true] %s4728_s20 }
 0x4e3   : > { %s4730_s16 = scalar_lea.hbm %s4729_s20, 1  ;;  %s4734_s19 = scalar_lea.hbm %s5968_s12, 2 }
 0x4e4   : > { %p4731_p4 = scmp.ne.s32.totalorder %s4729_s20, %s4730_s16  ;;  %p4735_p9 = scmp.lt.s32.totalorder %s4729_s20, %s5968_s12 }
 0x4e5   : > { %p4736_p10 = scmp.lt.s32.totalorder %s4734_s19, %s4730_s16 }
 0x4e6   : > { %p4732_p7 = pnand %p4731_p4, %p4887_p5 }
 0x4e7   : > { %p4737_p11 = por %p4736_p10, %p4735_p9 }
 0x4e8   : > { %p4733_p8 = pneg %p4732_p7 }
 0x4ea   : > { %p4738_p12 = pnand %p4737_p11, %p4733_p8 }
 0x55a   : > { %v3523_v6 = vpop.f32.mrf.mxu0 }
 0x55b   : > { %v3524_v61 = vadd.f32 %v3523_v6, %v3502_v8 }
 0x55d   : > { %3526 = vst [vmem:[%s415_s4] sm:$0x1] %v3524_v61 }
 0x55e   : > { %4741 = shalt.err (!%p4738_p12)
}
 0x55f   : > { %4637 = dma.vmem_to_hbm [thread:$0]  (%p4887_p5), %s3556_s3, 16, %s3558_s5, %s3532_s18  }
 0x560 PF: > { %p4647_p13 = scmp.ge.s32.totalorder %s4780_s24, 2  ;;  %s3569_s28 = sand.u32 1, %s4768_s21  }
 0x561   : > { %s3570_s15 = scalar_lea.sflag [#allocation5], %s3569_s28 }
 0x562   : > { %p4641_p0 = pnand %p4647_p13, %p4891_p6 }
 0x564   : > { %p4642_p1 = pneg %p4641_p0 }
 0x566   : > { %4759 = dma.done.wait (%p4642_p1), %s3570_s15, 16  }
 0x567   : > { %4761 = vsyncadd (%p4642_p1), %s3570_s15, 4294967280  ;;  %s3579_s1 = scalar_lea.sflag [#allocation7], %s3569_s28 }
 0x568   : > { %4763 = dma.done.wait (%p4642_p1), %s3579_s1, 16  }
 0x569   : > { %4765 = vsyncadd (%p4642_p1), %s3579_s1, 4294967280  ;;  %p26_p5 = scmp.ge.s32.totalorder %s4874_s27, 4   ;;  %s6016_s21 = smov %s4772_s22 }
 0x56a   : > { %s6017_s22 = smov %s4776_s23  ;;  %s6018_s23 = smov %s4885_s30 }
 0x56b   : > { %s6019_s24 = smov %s4874_s27  ;;  %28 = sbr.rel (!%p26_p5) target bundleno = 12 (0xc), region = 155 }
 0x570   :  { %3584 = vsyncpa [#allocation5], 1 }
 0x571   :  { %3586 = vsyncpa [#allocation5 + $0x1], 1 }
 0x572   :  { %3587 = vsyncpa [#allocation7], 1 }
 0x573   :  { %3589 = vsyncpa [#allocation7 + $0x1], 1 }

</bundles_post_ra>
